<compile_context>
chip_gen: v5e
topology: v5e:2x2
jax: 0.10.0
libtpu: 0.0.40
codegen_flags: <defaults>
</compile_context>

<pallas_src>
import jax
import jax.numpy as jnp
from jax.experimental import pallas as pl
from jax.experimental.pallas import tpu as pltpu

# ----------------------------- hyperparameters ------------------------------
VOCAB = 32          # embedding rows
EMBED = 16          # embedding dim == GRU input_size
HIDDEN = 16         # GRU hidden_size
NUM_LAYERS = 2
NUM_CLASS = 8
BATCH = 2
SEQ = 8
PAD_ID = 0
LN_EPS = 1e-5

_VMEM_SPEC = pl.BlockSpec(memory_space=pltpu.MemorySpace.VMEM)


# ------------------------------- kernel --------------------------------------
def _gru_gates(gi, gh, h_prev):
    """PyTorch GRU cell update (gate order r, z, n)."""
    H = HIDDEN
    r = jax.nn.sigmoid(gi[:, :H] + gh[:, :H])
    z = jax.nn.sigmoid(gi[:, H:2 * H] + gh[:, H:2 * H])
    n = jnp.tanh(gi[:, 2 * H:] + r * gh[:, 2 * H:])
    return (1.0 - z) * n + z * h_prev


def seq_classifier_kernel(x_ref,
                          wih0_ref, bih0_ref, whh0_ref, bhh0_ref,
                          wih1_ref, bih1_ref, whh1_ref, bhh1_ref,
                          cg_ref, cb_ref, cw_ref, cbias_ref,
                          o_ref):
    """Fully fused forward pass.

    x_ref:    [S*B, E]   time-major embeddings (row t*B+b = token (b, t))
    wih{l}:   [I, 6H]    [W_ih_fwd | W_ih_bwd]   (LN affine folded in for l=0)
    bih{l}:   [1, 6H]
    whh{l}:   [2H, 6H]   block-diagonal: [:H,:3H]=W_hh_fwd, [H:,3H:]=W_hh_bwd
    bhh{l}:   [1, 6H]
    cg/cb:    [1, 2H]    classifier LayerNorm gamma/beta
    cw:       [2H, C]    Linear weight (pre-transposed), cbias: [1, C]
    o_ref:    [B, C]     logits
    """
    S, B, H = SEQ, BATCH, HIDDEN
    H3 = 3 * H

    # ---- embedding LayerNorm (affine folded into layer-0 W_ih / b_ih) ----
    x = x_ref[...]                                           # [S*B, E]
    mu = jnp.mean(x, axis=-1, keepdims=True)
    var = jnp.mean((x - mu) ** 2, axis=-1, keepdims=True)
    xn = (x - mu) * jax.lax.rsqrt(var + LN_EPS)

    def bi_gru_layer(inp, wih, bih, whh, bhh):
        # Hoisted input projection: every timestep of both directions in ONE
        # matmul (the serial recurrence keeps only the h @ W_hh push).
        gi_all = jnp.dot(inp, wih, preferred_element_type=jnp.float32) + bih  # [S*B, 6H]
        h = jnp.zeros((B, 2 * H), jnp.float32)               # [h_fwd | h_bwd]
        outs_f = [None] * S
        outs_b = [None] * S
        for t in range(S):                                   # static unroll (S=8)
            gh = jnp.dot(h, whh, preferred_element_type=jnp.float32) + bhh    # [B, 6H]
            gi_f = gi_all[t * B:(t + 1) * B, :H3]             # fwd consumes x[t]
            gi_b = gi_all[(S - 1 - t) * B:(S - t) * B, H3:]   # bwd consumes x[S-1-t]
            h_f = _gru_gates(gi_f, gh[:, :H3], h[:, :H])
            h_b = _gru_gates(gi_b, gh[:, H3:], h[:, H:])
            h = jnp.concatenate([h_f, h_b], axis=-1)
            outs_f[t] = h_f
            outs_b[S - 1 - t] = h_b
        # Per-timestep outputs (time-major) feed the next layer; everything
        # stays in vregs — no VMEM/HBM round trips.
        out = jnp.concatenate(
            [jnp.concatenate([outs_f[t], outs_b[t]], axis=-1) for t in range(S)],
            axis=0)                                           # [S*B, 2H]
        return out, h                                         # h == [h_n_fwd | h_n_bwd]

    out0, _ = bi_gru_layer(xn, wih0_ref[...], bih0_ref[...],
                           whh0_ref[...], bhh0_ref[...])
    # Dropout between GRU layers: eval mode -> identity.
    _, h_final = bi_gru_layer(out0, wih1_ref[...], bih1_ref[...],
                              whh1_ref[...], bhh1_ref[...])

    # h_n.reshape(L,2,B,H)[-1].permute(1,0,2).reshape(B,2H) == h_final
    # ---- classifier: LayerNorm(2H) + Dropout(eval => identity) + Linear ----
    mu2 = jnp.mean(h_final, axis=-1, keepdims=True)
    var2 = jnp.mean((h_final - mu2) ** 2, axis=-1, keepdims=True)
    fn = (h_final - mu2) * jax.lax.rsqrt(var2 + LN_EPS) * cg_ref[...] + cb_ref[...]
    o_ref[...] = jnp.dot(fn, cw_ref[...],
                         preferred_element_type=jnp.float32) + cbias_ref[...]


# ------------------------------ wrapper ---------------------------------------
def seq_classifier_forward(x_ids, p):
    """Full forward pass of SeqClassifier (single fused pallas_call)."""
    # Embedding lookup (XLA gather glue). Gathering with x_ids.T yields the
    # time-major layout [S, B, E] directly, so no transpose is needed.
    emb_tm = p["embedding"][x_ids.T].reshape(SEQ * BATCH, EMBED)
    return pl.pallas_call(
        seq_classifier_kernel,
        out_shape=jax.ShapeDtypeStruct((BATCH, NUM_CLASS), jnp.float32),
        in_specs=[_VMEM_SPEC] * 13,
        out_specs=_VMEM_SPEC,
    )(emb_tm,
      p["wih0"], p["bih0"], p["whh0"], p["bhh0"],
      p["wih1"], p["bih1"], p["whh1"], p["bhh1"],
      p["cls_ln_g"], p["cls_ln_b"], p["cls_w_t"], p["cls_b"])


# --------------------------- parameter init / packing -------------------------
def _pack_bigru_layer(wih_f, bih_f, whh_f, bhh_f,
                      wih_b, bih_b, whh_b, bhh_b,
                      ln_g=None, ln_b=None):
    """Pack one bidirectional GRU layer into the fused-kernel layout.

    Optionally folds a preceding LayerNorm's affine (gamma, beta) into the
    input projection: (xn*g + b) @ W + b_ih == xn @ (g[:,None]*W) + (b@W + b_ih).
    """
    if ln_g is not None:
        bih_f = ln_b @ wih_f + bih_f
        bih_b = ln_b @ wih_b + bih_b
        wih_f = ln_g[:, None] * wih_f
        wih_b = ln_g[:, None] * wih_b
    H = whh_f.shape[0]
    wih = jnp.concatenate([wih_f, wih_b], axis=1)             # [I, 6H]
    bih = jnp.concatenate([bih_f, bih_b])[None, :]            # [1, 6H]
    whh = jnp.zeros((2 * H, 6 * H), jnp.float32)              # block-diagonal
    whh = whh.at[:H, :3 * H].set(whh_f).at[H:, 3 * H:].set(whh_b)
    bhh = jnp.concatenate([bhh_f, bhh_b])[None, :]            # [1, 6H]
    return wih, bih, whh, bhh


def init_params(key):
    ks = iter(jax.random.split(key, 32))
    p = {}
    # "pretrained" embedding table (padding_idx only affects gradients in
    # PyTorch, not the forward lookup).
    p["embedding"] = jax.random.normal(next(ks), (VOCAB, EMBED), jnp.float32)
    # LayerNorm after embedding: weight=1, bias=0 (per _init_weights); folded
    # into layer-0 W_ih / b_ih below.
    emb_ln_g = jnp.ones((EMBED,), jnp.float32)
    emb_ln_b = jnp.zeros((EMBED,), jnp.float32)

    # GRU weights: PyTorch default U(-1/sqrt(H), 1/sqrt(H)); gate order r,z,n.
    # (_init_weights does not touch nn.GRU.)  Stored pre-transposed [I, 3H].
    bound = 1.0 / (HIDDEN ** 0.5)

    def u(shape):
        return jax.random.uniform(next(ks), shape, jnp.float32, -bound, bound)

    for l in range(NUM_LAYERS):
        in_dim = EMBED if l == 0 else 2 * HIDDEN
        raw = dict(
            wih_f=u((in_dim, 3 * HIDDEN)), bih_f=u((3 * HIDDEN,)),
            whh_f=u((HIDDEN, 3 * HIDDEN)), bhh_f=u((3 * HIDDEN,)),
            wih_b=u((in_dim, 3 * HIDDEN)), bih_b=u((3 * HIDDEN,)),
            whh_b=u((HIDDEN, 3 * HIDDEN)), bhh_b=u((3 * HIDDEN,)),
        )
        ln_g, ln_b = (emb_ln_g, emb_ln_b) if l == 0 else (None, None)
        wih, bih, whh, bhh = _pack_bigru_layer(**raw, ln_g=ln_g, ln_b=ln_b)
        p[f"wih{l}"], p[f"bih{l}"], p[f"whh{l}"], p[f"bhh{l}"] = wih, bih, whh, bhh

    # classifier: LayerNorm(2H) weight=1 bias=0; Linear init_method='normal'
    # std=0.02, bias=0; Linear weight stored pre-transposed [2H, C].
    p["cls_ln_g"] = jnp.ones((1, 2 * HIDDEN), jnp.float32)
    p["cls_ln_b"] = jnp.zeros((1, 2 * HIDDEN), jnp.float32)
    p["cls_w_t"] = 0.02 * jax.random.normal(next(ks), (2 * HIDDEN, NUM_CLASS),
                                            jnp.float32)
    p["cls_b"] = jnp.zeros((1, NUM_CLASS), jnp.float32)
    return p


# ---------------------------------- main --------------------------------------
if __name__ == "__main__":
    key = jax.random.PRNGKey(0)
    k_param, k_x = jax.random.split(key)
    params = init_params(k_param)

    x_ids = jax.random.randint(k_x, (BATCH, SEQ), 1, VOCAB, dtype=jnp.int32)
    x_ids = x_ids.at[:, -2:].set(PAD_ID)   # a couple of pad tokens, like padded batches
    # NOTE: like the reference module (no pack_padded_sequence), the GRU runs
    # over PAD positions too — semantics preserved.

    logits = jax.jit(seq_classifier_forward)(x_ids, params)
    logits = jax.block_until_ready(logits)
    assert logits.shape == (BATCH, NUM_CLASS) and logits.dtype == jnp.float32
    print("KERNEL_OK")
</pallas_src>

<mosaic_0001>
module attributes {stable_mosaic.version = 11 : i64} {
  func.func @seq_classifier_kernel(%arg0: memref<16x16xf32, #tpu.memory_space<vmem>>, %arg1: memref<16x96xf32, #tpu.memory_space<vmem>>, %arg2: memref<1x96xf32, #tpu.memory_space<vmem>>, %arg3: memref<32x96xf32, #tpu.memory_space<vmem>>, %arg4: memref<1x96xf32, #tpu.memory_space<vmem>>, %arg5: memref<32x96xf32, #tpu.memory_space<vmem>>, %arg6: memref<1x96xf32, #tpu.memory_space<vmem>>, %arg7: memref<32x96xf32, #tpu.memory_space<vmem>>, %arg8: memref<1x96xf32, #tpu.memory_space<vmem>>, %arg9: memref<1x32xf32, #tpu.memory_space<vmem>>, %arg10: memref<1x32xf32, #tpu.memory_space<vmem>>, %arg11: memref<32x8xf32, #tpu.memory_space<vmem>>, %arg12: memref<1x8xf32, #tpu.memory_space<vmem>>, %arg13: memref<2x8xf32, #tpu.memory_space<vmem>>) attributes {dimension_semantics = [], scalar_prefetch = 0 : i64, scratch_operands = 0 : i64, tpu.core_type = #tpu.core_type<tc>} {
    %c0 = arith.constant 0 : index
    %c0_0 = arith.constant 0 : index
    %0 = vector.load %arg0[%c0, %c0_0] : memref<16x16xf32, #tpu.memory_space<vmem>>, vector<16x16xf32>
    %cst = arith.constant dense<0.000000e+00> : vector<16xf32>
    %1 = vector.multi_reduction <add>, %0, %cst [1] : vector<16x16xf32> to vector<16xf32>
    %2 = vector.shape_cast %1 : vector<16xf32> to vector<16x1xf32>
    %cst_1 = arith.constant 1.600000e+01 : f32
    %3 = vector.broadcast %cst_1 : f32 to vector<16x1xf32>
    %4 = arith.divf %2, %3 : vector<16x1xf32>
    %5 = vector.broadcast %4 : vector<16x1xf32> to vector<16x16xf32>
    %6 = arith.subf %0, %5 : vector<16x16xf32>
    %7 = arith.mulf %6, %6 : vector<16x16xf32>
    %cst_2 = arith.constant dense<0.000000e+00> : vector<16xf32>
    %8 = vector.multi_reduction <add>, %7, %cst_2 [1] : vector<16x16xf32> to vector<16xf32>
    %9 = vector.shape_cast %8 : vector<16xf32> to vector<16x1xf32>
    %cst_3 = arith.constant 1.600000e+01 : f32
    %10 = vector.broadcast %cst_3 : f32 to vector<16x1xf32>
    %11 = arith.divf %9, %10 : vector<16x1xf32>
    %12 = vector.broadcast %4 : vector<16x1xf32> to vector<16x16xf32>
    %13 = arith.subf %0, %12 : vector<16x16xf32>
    %cst_4 = arith.constant 9.99999974E-6 : f32
    %14 = vector.broadcast %cst_4 : f32 to vector<16x1xf32>
    %15 = arith.addf %11, %14 : vector<16x1xf32>
    %16 = math.rsqrt %15 : vector<16x1xf32>
    %17 = vector.broadcast %16 : vector<16x1xf32> to vector<16x16xf32>
    %18 = arith.mulf %13, %17 : vector<16x16xf32>
    %c0_5 = arith.constant 0 : index
    %c0_6 = arith.constant 0 : index
    %19 = vector.load %arg1[%c0_5, %c0_6] : memref<16x96xf32, #tpu.memory_space<vmem>>, vector<16x96xf32>
    %c0_7 = arith.constant 0 : index
    %c0_8 = arith.constant 0 : index
    %20 = vector.load %arg2[%c0_7, %c0_8] : memref<1x96xf32, #tpu.memory_space<vmem>>, vector<1x96xf32>
    %c0_9 = arith.constant 0 : index
    %c0_10 = arith.constant 0 : index
    %21 = vector.load %arg3[%c0_9, %c0_10] : memref<32x96xf32, #tpu.memory_space<vmem>>, vector<32x96xf32>
    %c0_11 = arith.constant 0 : index
    %c0_12 = arith.constant 0 : index
    %22 = vector.load %arg4[%c0_11, %c0_12] : memref<1x96xf32, #tpu.memory_space<vmem>>, vector<1x96xf32>
    %cst_13 = arith.constant dense<0.000000e+00> : vector<16x96xf32>
    %23 = tpu.matmul %18, %19, %cst_13 {dimension_numbers = #tpu.dot_dimension_numbers<[1], [0], [0], [1], [0, 0, 1, 1], [], []>} : vector<16x16xf32>, vector<16x96xf32>, vector<16x96xf32> -> vector<16x96xf32>
    %24 = vector.broadcast %20 : vector<1x96xf32> to vector<16x96xf32>
    %25 = arith.addf %23, %24 : vector<16x96xf32>
    %cst_14 = arith.constant 0.000000e+00 : f32
    %26 = vector.broadcast %cst_14 : f32 to vector<2x32xf32>
    %cst_15 = arith.constant dense<0.000000e+00> : vector<2x96xf32>
    %27 = tpu.matmul %26, %21, %cst_15 {dimension_numbers = #tpu.dot_dimension_numbers<[1], [0], [0], [1], [0, 0, 1, 1], [], []>} : vector<2x32xf32>, vector<32x96xf32>, vector<2x96xf32> -> vector<2x96xf32>
    %28 = vector.broadcast %22 : vector<1x96xf32> to vector<2x96xf32>
    %29 = arith.addf %27, %28 : vector<2x96xf32>
    %30 = vector.extract_strided_slice %25 {offsets = [0, 0], sizes = [2, 48], strides = [1, 1]} : vector<16x96xf32> to vector<2x48xf32>
    %31 = vector.extract_strided_slice %25 {offsets = [14, 48], sizes = [2, 48], strides = [1, 1]} : vector<16x96xf32> to vector<2x48xf32>
    %32 = vector.extract_strided_slice %29 {offsets = [0, 0], sizes = [2, 48], strides = [1, 1]} : vector<2x96xf32> to vector<2x48xf32>
    %33 = vector.extract_strided_slice %26 {offsets = [0, 0], sizes = [2, 16], strides = [1, 1]} : vector<2x32xf32> to vector<2x16xf32>
    %34 = vector.extract_strided_slice %30 {offsets = [0, 0], sizes = [2, 16], strides = [1, 1]} : vector<2x48xf32> to vector<2x16xf32>
    %35 = vector.extract_strided_slice %32 {offsets = [0, 0], sizes = [2, 16], strides = [1, 1]} : vector<2x48xf32> to vector<2x16xf32>
    %36 = arith.addf %34, %35 : vector<2x16xf32>
    %37 = arith.negf %36 : vector<2x16xf32>
    %38 = math.exp %37 : vector<2x16xf32>
    %cst_16 = arith.constant 1.000000e+00 : f32
    %39 = vector.broadcast %cst_16 : f32 to vector<2x16xf32>
    %40 = arith.addf %39, %38 : vector<2x16xf32>
    %41 = arith.divf %39, %40 : vector<2x16xf32>
    %42 = vector.extract_strided_slice %30 {offsets = [0, 16], sizes = [2, 16], strides = [1, 1]} : vector<2x48xf32> to vector<2x16xf32>
    %43 = vector.extract_strided_slice %32 {offsets = [0, 16], sizes = [2, 16], strides = [1, 1]} : vector<2x48xf32> to vector<2x16xf32>
    %44 = arith.addf %42, %43 : vector<2x16xf32>
    %45 = arith.negf %44 : vector<2x16xf32>
    %46 = math.exp %45 : vector<2x16xf32>
    %cst_17 = arith.constant 1.000000e+00 : f32
    %47 = vector.broadcast %cst_17 : f32 to vector<2x16xf32>
    %48 = arith.addf %47, %46 : vector<2x16xf32>
    %49 = arith.divf %47, %48 : vector<2x16xf32>
    %50 = vector.extract_strided_slice %30 {offsets = [0, 32], sizes = [2, 16], strides = [1, 1]} : vector<2x48xf32> to vector<2x16xf32>
    %51 = vector.extract_strided_slice %32 {offsets = [0, 32], sizes = [2, 16], strides = [1, 1]} : vector<2x48xf32> to vector<2x16xf32>
    %52 = arith.mulf %41, %51 : vector<2x16xf32>
    %53 = arith.addf %50, %52 : vector<2x16xf32>
    %54 = math.tanh %53 : vector<2x16xf32>
    %cst_18 = arith.constant 1.000000e+00 : f32
    %55 = vector.broadcast %cst_18 : f32 to vector<2x16xf32>
    %56 = arith.subf %55, %49 : vector<2x16xf32>
    %57 = arith.mulf %56, %54 : vector<2x16xf32>
    %58 = arith.mulf %49, %33 : vector<2x16xf32>
    %59 = arith.addf %57, %58 : vector<2x16xf32>
    %60 = vector.extract_strided_slice %29 {offsets = [0, 48], sizes = [2, 48], strides = [1, 1]} : vector<2x96xf32> to vector<2x48xf32>
    %61 = vector.extract_strided_slice %26 {offsets = [0, 16], sizes = [2, 16], strides = [1, 1]} : vector<2x32xf32> to vector<2x16xf32>
    %62 = vector.extract_strided_slice %31 {offsets = [0, 0], sizes = [2, 16], strides = [1, 1]} : vector<2x48xf32> to vector<2x16xf32>
    %63 = vector.extract_strided_slice %60 {offsets = [0, 0], sizes = [2, 16], strides = [1, 1]} : vector<2x48xf32> to vector<2x16xf32>
    %64 = arith.addf %62, %63 : vector<2x16xf32>
    %65 = arith.negf %64 : vector<2x16xf32>
    %66 = math.exp %65 : vector<2x16xf32>
    %cst_19 = arith.constant 1.000000e+00 : f32
    %67 = vector.broadcast %cst_19 : f32 to vector<2x16xf32>
    %68 = arith.addf %67, %66 : vector<2x16xf32>
    %69 = arith.divf %67, %68 : vector<2x16xf32>
    %70 = vector.extract_strided_slice %31 {offsets = [0, 16], sizes = [2, 16], strides = [1, 1]} : vector<2x48xf32> to vector<2x16xf32>
    %71 = vector.extract_strided_slice %60 {offsets = [0, 16], sizes = [2, 16], strides = [1, 1]} : vector<2x48xf32> to vector<2x16xf32>
    %72 = arith.addf %70, %71 : vector<2x16xf32>
    %73 = arith.negf %72 : vector<2x16xf32>
    %74 = math.exp %73 : vector<2x16xf32>
    %cst_20 = arith.constant 1.000000e+00 : f32
    %75 = vector.broadcast %cst_20 : f32 to vector<2x16xf32>
    %76 = arith.addf %75, %74 : vector<2x16xf32>
    %77 = arith.divf %75, %76 : vector<2x16xf32>
    %78 = vector.extract_strided_slice %31 {offsets = [0, 32], sizes = [2, 16], strides = [1, 1]} : vector<2x48xf32> to vector<2x16xf32>
    %79 = vector.extract_strided_slice %60 {offsets = [0, 32], sizes = [2, 16], strides = [1, 1]} : vector<2x48xf32> to vector<2x16xf32>
    %80 = arith.mulf %69, %79 : vector<2x16xf32>
    %81 = arith.addf %78, %80 : vector<2x16xf32>
    %82 = math.tanh %81 : vector<2x16xf32>
    %cst_21 = arith.constant 1.000000e+00 : f32
    %83 = vector.broadcast %cst_21 : f32 to vector<2x16xf32>
    %84 = arith.subf %83, %77 : vector<2x16xf32>
    %85 = arith.mulf %84, %82 : vector<2x16xf32>
    %86 = arith.mulf %77, %61 : vector<2x16xf32>
    %87 = arith.addf %85, %86 : vector<2x16xf32>
    %88 = tpu.concatenate %59, %87 in 1 : vector<2x16xf32>, vector<2x16xf32> -> vector<2x32xf32>
    %cst_22 = arith.constant dense<0.000000e+00> : vector<2x96xf32>
    %89 = tpu.matmul %88, %21, %cst_22 {dimension_numbers = #tpu.dot_dimension_numbers<[1], [0], [0], [1], [0, 0, 1, 1], [], []>} : vector<2x32xf32>, vector<32x96xf32>, vector<2x96xf32> -> vector<2x96xf32>
    %90 = vector.broadcast %22 : vector<1x96xf32> to vector<2x96xf32>
    %91 = arith.addf %89, %90 : vector<2x96xf32>
    %92 = vector.extract_strided_slice %25 {offsets = [2, 0], sizes = [2, 48], strides = [1, 1]} : vector<16x96xf32> to vector<2x48xf32>
    %93 = vector.extract_strided_slice %25 {offsets = [12, 48], sizes = [2, 48], strides = [1, 1]} : vector<16x96xf32> to vector<2x48xf32>
    %94 = vector.extract_strided_slice %91 {offsets = [0, 0], sizes = [2, 48], strides = [1, 1]} : vector<2x96xf32> to vector<2x48xf32>
    %95 = vector.extract_strided_slice %88 {offsets = [0, 0], sizes = [2, 16], strides = [1, 1]} : vector<2x32xf32> to vector<2x16xf32>
    %96 = vector.extract_strided_slice %92 {offsets = [0, 0], sizes = [2, 16], strides = [1, 1]} : vector<2x48xf32> to vector<2x16xf32>
    %97 = vector.extract_strided_slice %94 {offsets = [0, 0], sizes = [2, 16], strides = [1, 1]} : vector<2x48xf32> to vector<2x16xf32>
    %98 = arith.addf %96, %97 : vector<2x16xf32>
    %99 = arith.negf %98 : vector<2x16xf32>
    %100 = math.exp %99 : vector<2x16xf32>
    %cst_23 = arith.constant 1.000000e+00 : f32
    %101 = vector.broadcast %cst_23 : f32 to vector<2x16xf32>
    %102 = arith.addf %101, %100 : vector<2x16xf32>
    %103 = arith.divf %101, %102 : vector<2x16xf32>
    %104 = vector.extract_strided_slice %92 {offsets = [0, 16], sizes = [2, 16], strides = [1, 1]} : vector<2x48xf32> to vector<2x16xf32>
    %105 = vector.extract_strided_slice %94 {offsets = [0, 16], sizes = [2, 16], strides = [1, 1]} : vector<2x48xf32> to vector<2x16xf32>
    %106 = arith.addf %104, %105 : vector<2x16xf32>
    %107 = arith.negf %106 : vector<2x16xf32>
    %108 = math.exp %107 : vector<2x16xf32>
    %cst_24 = arith.constant 1.000000e+00 : f32
    %109 = vector.broadcast %cst_24 : f32 to vector<2x16xf32>
    %110 = arith.addf %109, %108 : vector<2x16xf32>
    %111 = arith.divf %109, %110 : vector<2x16xf32>
    %112 = vector.extract_strided_slice %92 {offsets = [0, 32], sizes = [2, 16], strides = [1, 1]} : vector<2x48xf32> to vector<2x16xf32>
    %113 = vector.extract_strided_slice %94 {offsets = [0, 32], sizes = [2, 16], strides = [1, 1]} : vector<2x48xf32> to vector<2x16xf32>
    %114 = arith.mulf %103, %113 : vector<2x16xf32>
    %115 = arith.addf %112, %114 : vector<2x16xf32>
    %116 = math.tanh %115 : vector<2x16xf32>
    %cst_25 = arith.constant 1.000000e+00 : f32
    %117 = vector.broadcast %cst_25 : f32 to vector<2x16xf32>
    %118 = arith.subf %117, %111 : vector<2x16xf32>
    %119 = arith.mulf %118, %116 : vector<2x16xf32>
    %120 = arith.mulf %111, %95 : vector<2x16xf32>
    %121 = arith.addf %119, %120 : vector<2x16xf32>
    %122 = vector.extract_strided_slice %91 {offsets = [0, 48], sizes = [2, 48], strides = [1, 1]} : vector<2x96xf32> to vector<2x48xf32>
    %123 = vector.extract_strided_slice %88 {offsets = [0, 16], sizes = [2, 16], strides = [1, 1]} : vector<2x32xf32> to vector<2x16xf32>
    %124 = vector.extract_strided_slice %93 {offsets = [0, 0], sizes = [2, 16], strides = [1, 1]} : vector<2x48xf32> to vector<2x16xf32>
    %125 = vector.extract_strided_slice %122 {offsets = [0, 0], sizes = [2, 16], strides = [1, 1]} : vector<2x48xf32> to vector<2x16xf32>
    %126 = arith.addf %124, %125 : vector<2x16xf32>
    %127 = arith.negf %126 : vector<2x16xf32>
    %128 = math.exp %127 : vector<2x16xf32>
    %cst_26 = arith.constant 1.000000e+00 : f32
    %129 = vector.broadcast %cst_26 : f32 to vector<2x16xf32>
    %130 = arith.addf %129, %128 : vector<2x16xf32>
    %131 = arith.divf %129, %130 : vector<2x16xf32>
    %132 = vector.extract_strided_slice %93 {offsets = [0, 16], sizes = [2, 16], strides = [1, 1]} : vector<2x48xf32> to vector<2x16xf32>
    %133 = vector.extract_strided_slice %122 {offsets = [0, 16], sizes = [2, 16], strides = [1, 1]} : vector<2x48xf32> to vector<2x16xf32>
    %134 = arith.addf %132, %133 : vector<2x16xf32>
    %135 = arith.negf %134 : vector<2x16xf32>
    %136 = math.exp %135 : vector<2x16xf32>
    %cst_27 = arith.constant 1.000000e+00 : f32
    %137 = vector.broadcast %cst_27 : f32 to vector<2x16xf32>
    %138 = arith.addf %137, %136 : vector<2x16xf32>
    %139 = arith.divf %137, %138 : vector<2x16xf32>
    %140 = vector.extract_strided_slice %93 {offsets = [0, 32], sizes = [2, 16], strides = [1, 1]} : vector<2x48xf32> to vector<2x16xf32>
    %141 = vector.extract_strided_slice %122 {offsets = [0, 32], sizes = [2, 16], strides = [1, 1]} : vector<2x48xf32> to vector<2x16xf32>
    %142 = arith.mulf %131, %141 : vector<2x16xf32>
    %143 = arith.addf %140, %142 : vector<2x16xf32>
    %144 = math.tanh %143 : vector<2x16xf32>
    %cst_28 = arith.constant 1.000000e+00 : f32
    %145 = vector.broadcast %cst_28 : f32 to vector<2x16xf32>
    %146 = arith.subf %145, %139 : vector<2x16xf32>
    %147 = arith.mulf %146, %144 : vector<2x16xf32>
    %148 = arith.mulf %139, %123 : vector<2x16xf32>
    %149 = arith.addf %147, %148 : vector<2x16xf32>
    %150 = tpu.concatenate %121, %149 in 1 : vector<2x16xf32>, vector<2x16xf32> -> vector<2x32xf32>
    %cst_29 = arith.constant dense<0.000000e+00> : vector<2x96xf32>
    %151 = tpu.matmul %150, %21, %cst_29 {dimension_numbers = #tpu.dot_dimension_numbers<[1], [0], [0], [1], [0, 0, 1, 1], [], []>} : vector<2x32xf32>, vector<32x96xf32>, vector<2x96xf32> -> vector<2x96xf32>
    %152 = vector.broadcast %22 : vector<1x96xf32> to vector<2x96xf32>
    %153 = arith.addf %151, %152 : vector<2x96xf32>
    %154 = vector.extract_strided_slice %25 {offsets = [4, 0], sizes = [2, 48], strides = [1, 1]} : vector<16x96xf32> to vector<2x48xf32>
    %155 = vector.extract_strided_slice %25 {offsets = [10, 48], sizes = [2, 48], strides = [1, 1]} : vector<16x96xf32> to vector<2x48xf32>
    %156 = vector.extract_strided_slice %153 {offsets = [0, 0], sizes = [2, 48], strides = [1, 1]} : vector<2x96xf32> to vector<2x48xf32>
    %157 = vector.extract_strided_slice %150 {offsets = [0, 0], sizes = [2, 16], strides = [1, 1]} : vector<2x32xf32> to vector<2x16xf32>
    %158 = vector.extract_strided_slice %154 {offsets = [0, 0], sizes = [2, 16], strides = [1, 1]} : vector<2x48xf32> to vector<2x16xf32>
    %159 = vector.extract_strided_slice %156 {offsets = [0, 0], sizes = [2, 16], strides = [1, 1]} : vector<2x48xf32> to vector<2x16xf32>
    %160 = arith.addf %158, %159 : vector<2x16xf32>
    %161 = arith.negf %160 : vector<2x16xf32>
    %162 = math.exp %161 : vector<2x16xf32>
    %cst_30 = arith.constant 1.000000e+00 : f32
    %163 = vector.broadcast %cst_30 : f32 to vector<2x16xf32>
    %164 = arith.addf %163, %162 : vector<2x16xf32>
    %165 = arith.divf %163, %164 : vector<2x16xf32>
    %166 = vector.extract_strided_slice %154 {offsets = [0, 16], sizes = [2, 16], strides = [1, 1]} : vector<2x48xf32> to vector<2x16xf32>
    %167 = vector.extract_strided_slice %156 {offsets = [0, 16], sizes = [2, 16], strides = [1, 1]} : vector<2x48xf32> to vector<2x16xf32>
    %168 = arith.addf %166, %167 : vector<2x16xf32>
    %169 = arith.negf %168 : vector<2x16xf32>
    %170 = math.exp %169 : vector<2x16xf32>
    %cst_31 = arith.constant 1.000000e+00 : f32
    %171 = vector.broadcast %cst_31 : f32 to vector<2x16xf32>
    %172 = arith.addf %171, %170 : vector<2x16xf32>
    %173 = arith.divf %171, %172 : vector<2x16xf32>
    %174 = vector.extract_strided_slice %154 {offsets = [0, 32], sizes = [2, 16], strides = [1, 1]} : vector<2x48xf32> to vector<2x16xf32>
    %175 = vector.extract_strided_slice %156 {offsets = [0, 32], sizes = [2, 16], strides = [1, 1]} : vector<2x48xf32> to vector<2x16xf32>
    %176 = arith.mulf %165, %175 : vector<2x16xf32>
    %177 = arith.addf %174, %176 : vector<2x16xf32>
    %178 = math.tanh %177 : vector<2x16xf32>
    %cst_32 = arith.constant 1.000000e+00 : f32
    %179 = vector.broadcast %cst_32 : f32 to vector<2x16xf32>
    %180 = arith.subf %179, %173 : vector<2x16xf32>
    %181 = arith.mulf %180, %178 : vector<2x16xf32>
    %182 = arith.mulf %173, %157 : vector<2x16xf32>
    %183 = arith.addf %181, %182 : vector<2x16xf32>
    %184 = vector.extract_strided_slice %153 {offsets = [0, 48], sizes = [2, 48], strides = [1, 1]} : vector<2x96xf32> to vector<2x48xf32>
    %185 = vector.extract_strided_slice %150 {offsets = [0, 16], sizes = [2, 16], strides = [1, 1]} : vector<2x32xf32> to vector<2x16xf32>
    %186 = vector.extract_strided_slice %155 {offsets = [0, 0], sizes = [2, 16], strides = [1, 1]} : vector<2x48xf32> to vector<2x16xf32>
    %187 = vector.extract_strided_slice %184 {offsets = [0, 0], sizes = [2, 16], strides = [1, 1]} : vector<2x48xf32> to vector<2x16xf32>
    %188 = arith.addf %186, %187 : vector<2x16xf32>
    %189 = arith.negf %188 : vector<2x16xf32>
    %190 = math.exp %189 : vector<2x16xf32>
    %cst_33 = arith.constant 1.000000e+00 : f32
    %191 = vector.broadcast %cst_33 : f32 to vector<2x16xf32>
    %192 = arith.addf %191, %190 : vector<2x16xf32>
    %193 = arith.divf %191, %192 : vector<2x16xf32>
    %194 = vector.extract_strided_slice %155 {offsets = [0, 16], sizes = [2, 16], strides = [1, 1]} : vector<2x48xf32> to vector<2x16xf32>
    %195 = vector.extract_strided_slice %184 {offsets = [0, 16], sizes = [2, 16], strides = [1, 1]} : vector<2x48xf32> to vector<2x16xf32>
    %196 = arith.addf %194, %195 : vector<2x16xf32>
    %197 = arith.negf %196 : vector<2x16xf32>
    %198 = math.exp %197 : vector<2x16xf32>
    %cst_34 = arith.constant 1.000000e+00 : f32
    %199 = vector.broadcast %cst_34 : f32 to vector<2x16xf32>
    %200 = arith.addf %199, %198 : vector<2x16xf32>
    %201 = arith.divf %199, %200 : vector<2x16xf32>
    %202 = vector.extract_strided_slice %155 {offsets = [0, 32], sizes = [2, 16], strides = [1, 1]} : vector<2x48xf32> to vector<2x16xf32>
    %203 = vector.extract_strided_slice %184 {offsets = [0, 32], sizes = [2, 16], strides = [1, 1]} : vector<2x48xf32> to vector<2x16xf32>
    %204 = arith.mulf %193, %203 : vector<2x16xf32>
    %205 = arith.addf %202, %204 : vector<2x16xf32>
    %206 = math.tanh %205 : vector<2x16xf32>
    %cst_35 = arith.constant 1.000000e+00 : f32
    %207 = vector.broadcast %cst_35 : f32 to vector<2x16xf32>
    %208 = arith.subf %207, %201 : vector<2x16xf32>
    %209 = arith.mulf %208, %206 : vector<2x16xf32>
    %210 = arith.mulf %201, %185 : vector<2x16xf32>
    %211 = arith.addf %209, %210 : vector<2x16xf32>
    %212 = tpu.concatenate %183, %211 in 1 : vector<2x16xf32>, vector<2x16xf32> -> vector<2x32xf32>
    %cst_36 = arith.constant dense<0.000000e+00> : vector<2x96xf32>
    %213 = tpu.matmul %212, %21, %cst_36 {dimension_numbers = #tpu.dot_dimension_numbers<[1], [0], [0], [1], [0, 0, 1, 1], [], []>} : vector<2x32xf32>, vector<32x96xf32>, vector<2x96xf32> -> vector<2x96xf32>
    %214 = vector.broadcast %22 : vector<1x96xf32> to vector<2x96xf32>
    %215 = arith.addf %213, %214 : vector<2x96xf32>
    %216 = vector.extract_strided_slice %25 {offsets = [6, 0], sizes = [2, 48], strides = [1, 1]} : vector<16x96xf32> to vector<2x48xf32>
    %217 = vector.extract_strided_slice %25 {offsets = [8, 48], sizes = [2, 48], strides = [1, 1]} : vector<16x96xf32> to vector<2x48xf32>
    %218 = vector.extract_strided_slice %215 {offsets = [0, 0], sizes = [2, 48], strides = [1, 1]} : vector<2x96xf32> to vector<2x48xf32>
    %219 = vector.extract_strided_slice %212 {offsets = [0, 0], sizes = [2, 16], strides = [1, 1]} : vector<2x32xf32> to vector<2x16xf32>
    %220 = vector.extract_strided_slice %216 {offsets = [0, 0], sizes = [2, 16], strides = [1, 1]} : vector<2x48xf32> to vector<2x16xf32>
    %221 = vector.extract_strided_slice %218 {offsets = [0, 0], sizes = [2, 16], strides = [1, 1]} : vector<2x48xf32> to vector<2x16xf32>
    %222 = arith.addf %220, %221 : vector<2x16xf32>
    %223 = arith.negf %222 : vector<2x16xf32>
    %224 = math.exp %223 : vector<2x16xf32>
    %cst_37 = arith.constant 1.000000e+00 : f32
    %225 = vector.broadcast %cst_37 : f32 to vector<2x16xf32>
    %226 = arith.addf %225, %224 : vector<2x16xf32>
    %227 = arith.divf %225, %226 : vector<2x16xf32>
    %228 = vector.extract_strided_slice %216 {offsets = [0, 16], sizes = [2, 16], strides = [1, 1]} : vector<2x48xf32> to vector<2x16xf32>
    %229 = vector.extract_strided_slice %218 {offsets = [0, 16], sizes = [2, 16], strides = [1, 1]} : vector<2x48xf32> to vector<2x16xf32>
    %230 = arith.addf %228, %229 : vector<2x16xf32>
    %231 = arith.negf %230 : vector<2x16xf32>
    %232 = math.exp %231 : vector<2x16xf32>
    %cst_38 = arith.constant 1.000000e+00 : f32
    %233 = vector.broadcast %cst_38 : f32 to vector<2x16xf32>
    %234 = arith.addf %233, %232 : vector<2x16xf32>
    %235 = arith.divf %233, %234 : vector<2x16xf32>
    %236 = vector.extract_strided_slice %216 {offsets = [0, 32], sizes = [2, 16], strides = [1, 1]} : vector<2x48xf32> to vector<2x16xf32>
    %237 = vector.extract_strided_slice %218 {offsets = [0, 32], sizes = [2, 16], strides = [1, 1]} : vector<2x48xf32> to vector<2x16xf32>
    %238 = arith.mulf %227, %237 : vector<2x16xf32>
    %239 = arith.addf %236, %238 : vector<2x16xf32>
    %240 = math.tanh %239 : vector<2x16xf32>
    %cst_39 = arith.constant 1.000000e+00 : f32
    %241 = vector.broadcast %cst_39 : f32 to vector<2x16xf32>
    %242 = arith.subf %241, %235 : vector<2x16xf32>
    %243 = arith.mulf %242, %240 : vector<2x16xf32>
    %244 = arith.mulf %235, %219 : vector<2x16xf32>
    %245 = arith.addf %243, %244 : vector<2x16xf32>
    %246 = vector.extract_strided_slice %215 {offsets = [0, 48], sizes = [2, 48], strides = [1, 1]} : vector<2x96xf32> to vector<2x48xf32>
    %247 = vector.extract_strided_slice %212 {offsets = [0, 16], sizes = [2, 16], strides = [1, 1]} : vector<2x32xf32> to vector<2x16xf32>
    %248 = vector.extract_strided_slice %217 {offsets = [0, 0], sizes = [2, 16], strides = [1, 1]} : vector<2x48xf32> to vector<2x16xf32>
    %249 = vector.extract_strided_slice %246 {offsets = [0, 0], sizes = [2, 16], strides = [1, 1]} : vector<2x48xf32> to vector<2x16xf32>
    %250 = arith.addf %248, %249 : vector<2x16xf32>
    %251 = arith.negf %250 : vector<2x16xf32>
    %252 = math.exp %251 : vector<2x16xf32>
    %cst_40 = arith.constant 1.000000e+00 : f32
    %253 = vector.broadcast %cst_40 : f32 to vector<2x16xf32>
    %254 = arith.addf %253, %252 : vector<2x16xf32>
    %255 = arith.divf %253, %254 : vector<2x16xf32>
    %256 = vector.extract_strided_slice %217 {offsets = [0, 16], sizes = [2, 16], strides = [1, 1]} : vector<2x48xf32> to vector<2x16xf32>
    %257 = vector.extract_strided_slice %246 {offsets = [0, 16], sizes = [2, 16], strides = [1, 1]} : vector<2x48xf32> to vector<2x16xf32>
    %258 = arith.addf %256, %257 : vector<2x16xf32>
    %259 = arith.negf %258 : vector<2x16xf32>
    %260 = math.exp %259 : vector<2x16xf32>
    %cst_41 = arith.constant 1.000000e+00 : f32
    %261 = vector.broadcast %cst_41 : f32 to vector<2x16xf32>
    %262 = arith.addf %261, %260 : vector<2x16xf32>
    %263 = arith.divf %261, %262 : vector<2x16xf32>
    %264 = vector.extract_strided_slice %217 {offsets = [0, 32], sizes = [2, 16], strides = [1, 1]} : vector<2x48xf32> to vector<2x16xf32>
    %265 = vector.extract_strided_slice %246 {offsets = [0, 32], sizes = [2, 16], strides = [1, 1]} : vector<2x48xf32> to vector<2x16xf32>
    %266 = arith.mulf %255, %265 : vector<2x16xf32>
    %267 = arith.addf %264, %266 : vector<2x16xf32>
    %268 = math.tanh %267 : vector<2x16xf32>
    %cst_42 = arith.constant 1.000000e+00 : f32
    %269 = vector.broadcast %cst_42 : f32 to vector<2x16xf32>
    %270 = arith.subf %269, %263 : vector<2x16xf32>
    %271 = arith.mulf %270, %268 : vector<2x16xf32>
    %272 = arith.mulf %263, %247 : vector<2x16xf32>
    %273 = arith.addf %271, %272 : vector<2x16xf32>
    %274 = tpu.concatenate %245, %273 in 1 : vector<2x16xf32>, vector<2x16xf32> -> vector<2x32xf32>
    %cst_43 = arith.constant dense<0.000000e+00> : vector<2x96xf32>
    %275 = tpu.matmul %274, %21, %cst_43 {dimension_numbers = #tpu.dot_dimension_numbers<[1], [0], [0], [1], [0, 0, 1, 1], [], []>} : vector<2x32xf32>, vector<32x96xf32>, vector<2x96xf32> -> vector<2x96xf32>
    %276 = vector.broadcast %22 : vector<1x96xf32> to vector<2x96xf32>
    %277 = arith.addf %275, %276 : vector<2x96xf32>
    %278 = vector.extract_strided_slice %25 {offsets = [8, 0], sizes = [2, 48], strides = [1, 1]} : vector<16x96xf32> to vector<2x48xf32>
    %279 = vector.extract_strided_slice %25 {offsets = [6, 48], sizes = [2, 48], strides = [1, 1]} : vector<16x96xf32> to vector<2x48xf32>
    %280 = vector.extract_strided_slice %277 {offsets = [0, 0], sizes = [2, 48], strides = [1, 1]} : vector<2x96xf32> to vector<2x48xf32>
    %281 = vector.extract_strided_slice %274 {offsets = [0, 0], sizes = [2, 16], strides = [1, 1]} : vector<2x32xf32> to vector<2x16xf32>
    %282 = vector.extract_strided_slice %278 {offsets = [0, 0], sizes = [2, 16], strides = [1, 1]} : vector<2x48xf32> to vector<2x16xf32>
    %283 = vector.extract_strided_slice %280 {offsets = [0, 0], sizes = [2, 16], strides = [1, 1]} : vector<2x48xf32> to vector<2x16xf32>
    %284 = arith.addf %282, %283 : vector<2x16xf32>
    %285 = arith.negf %284 : vector<2x16xf32>
    %286 = math.exp %285 : vector<2x16xf32>
    %cst_44 = arith.constant 1.000000e+00 : f32
    %287 = vector.broadcast %cst_44 : f32 to vector<2x16xf32>
    %288 = arith.addf %287, %286 : vector<2x16xf32>
    %289 = arith.divf %287, %288 : vector<2x16xf32>
    %290 = vector.extract_strided_slice %278 {offsets = [0, 16], sizes = [2, 16], strides = [1, 1]} : vector<2x48xf32> to vector<2x16xf32>
    %291 = vector.extract_strided_slice %280 {offsets = [0, 16], sizes = [2, 16], strides = [1, 1]} : vector<2x48xf32> to vector<2x16xf32>
    %292 = arith.addf %290, %291 : vector<2x16xf32>
    %293 = arith.negf %292 : vector<2x16xf32>
    %294 = math.exp %293 : vector<2x16xf32>
    %cst_45 = arith.constant 1.000000e+00 : f32
    %295 = vector.broadcast %cst_45 : f32 to vector<2x16xf32>
    %296 = arith.addf %295, %294 : vector<2x16xf32>
    %297 = arith.divf %295, %296 : vector<2x16xf32>
    %298 = vector.extract_strided_slice %278 {offsets = [0, 32], sizes = [2, 16], strides = [1, 1]} : vector<2x48xf32> to vector<2x16xf32>
    %299 = vector.extract_strided_slice %280 {offsets = [0, 32], sizes = [2, 16], strides = [1, 1]} : vector<2x48xf32> to vector<2x16xf32>
    %300 = arith.mulf %289, %299 : vector<2x16xf32>
    %301 = arith.addf %298, %300 : vector<2x16xf32>
    %302 = math.tanh %301 : vector<2x16xf32>
    %cst_46 = arith.constant 1.000000e+00 : f32
    %303 = vector.broadcast %cst_46 : f32 to vector<2x16xf32>
    %304 = arith.subf %303, %297 : vector<2x16xf32>
    %305 = arith.mulf %304, %302 : vector<2x16xf32>
    %306 = arith.mulf %297, %281 : vector<2x16xf32>
    %307 = arith.addf %305, %306 : vector<2x16xf32>
    %308 = vector.extract_strided_slice %277 {offsets = [0, 48], sizes = [2, 48], strides = [1, 1]} : vector<2x96xf32> to vector<2x48xf32>
    %309 = vector.extract_strided_slice %274 {offsets = [0, 16], sizes = [2, 16], strides = [1, 1]} : vector<2x32xf32> to vector<2x16xf32>
    %310 = vector.extract_strided_slice %279 {offsets = [0, 0], sizes = [2, 16], strides = [1, 1]} : vector<2x48xf32> to vector<2x16xf32>
    %311 = vector.extract_strided_slice %308 {offsets = [0, 0], sizes = [2, 16], strides = [1, 1]} : vector<2x48xf32> to vector<2x16xf32>
    %312 = arith.addf %310, %311 : vector<2x16xf32>
    %313 = arith.negf %312 : vector<2x16xf32>
    %314 = math.exp %313 : vector<2x16xf32>
    %cst_47 = arith.constant 1.000000e+00 : f32
    %315 = vector.broadcast %cst_47 : f32 to vector<2x16xf32>
    %316 = arith.addf %315, %314 : vector<2x16xf32>
    %317 = arith.divf %315, %316 : vector<2x16xf32>
    %318 = vector.extract_strided_slice %279 {offsets = [0, 16], sizes = [2, 16], strides = [1, 1]} : vector<2x48xf32> to vector<2x16xf32>
    %319 = vector.extract_strided_slice %308 {offsets = [0, 16], sizes = [2, 16], strides = [1, 1]} : vector<2x48xf32> to vector<2x16xf32>
    %320 = arith.addf %318, %319 : vector<2x16xf32>
    %321 = arith.negf %320 : vector<2x16xf32>
    %322 = math.exp %321 : vector<2x16xf32>
    %cst_48 = arith.constant 1.000000e+00 : f32
    %323 = vector.broadcast %cst_48 : f32 to vector<2x16xf32>
    %324 = arith.addf %323, %322 : vector<2x16xf32>
    %325 = arith.divf %323, %324 : vector<2x16xf32>
    %326 = vector.extract_strided_slice %279 {offsets = [0, 32], sizes = [2, 16], strides = [1, 1]} : vector<2x48xf32> to vector<2x16xf32>
    %327 = vector.extract_strided_slice %308 {offsets = [0, 32], sizes = [2, 16], strides = [1, 1]} : vector<2x48xf32> to vector<2x16xf32>
    %328 = arith.mulf %317, %327 : vector<2x16xf32>
    %329 = arith.addf %326, %328 : vector<2x16xf32>
    %330 = math.tanh %329 : vector<2x16xf32>
    %cst_49 = arith.constant 1.000000e+00 : f32
    %331 = vector.broadcast %cst_49 : f32 to vector<2x16xf32>
    %332 = arith.subf %331, %325 : vector<2x16xf32>
    %333 = arith.mulf %332, %330 : vector<2x16xf32>
    %334 = arith.mulf %325, %309 : vector<2x16xf32>
    %335 = arith.addf %333, %334 : vector<2x16xf32>
    %336 = tpu.concatenate %307, %335 in 1 : vector<2x16xf32>, vector<2x16xf32> -> vector<2x32xf32>
    %cst_50 = arith.constant dense<0.000000e+00> : vector<2x96xf32>
    %337 = tpu.matmul %336, %21, %cst_50 {dimension_numbers = #tpu.dot_dimension_numbers<[1], [0], [0], [1], [0, 0, 1, 1], [], []>} : vector<2x32xf32>, vector<32x96xf32>, vector<2x96xf32> -> vector<2x96xf32>
    %338 = vector.broadcast %22 : vector<1x96xf32> to vector<2x96xf32>
    %339 = arith.addf %337, %338 : vector<2x96xf32>
    %340 = vector.extract_strided_slice %25 {offsets = [10, 0], sizes = [2, 48], strides = [1, 1]} : vector<16x96xf32> to vector<2x48xf32>
    %341 = vector.extract_strided_slice %25 {offsets = [4, 48], sizes = [2, 48], strides = [1, 1]} : vector<16x96xf32> to vector<2x48xf32>
    %342 = vector.extract_strided_slice %339 {offsets = [0, 0], sizes = [2, 48], strides = [1, 1]} : vector<2x96xf32> to vector<2x48xf32>
    %343 = vector.extract_strided_slice %336 {offsets = [0, 0], sizes = [2, 16], strides = [1, 1]} : vector<2x32xf32> to vector<2x16xf32>
    %344 = vector.extract_strided_slice %340 {offsets = [0, 0], sizes = [2, 16], strides = [1, 1]} : vector<2x48xf32> to vector<2x16xf32>
    %345 = vector.extract_strided_slice %342 {offsets = [0, 0], sizes = [2, 16], strides = [1, 1]} : vector<2x48xf32> to vector<2x16xf32>
    %346 = arith.addf %344, %345 : vector<2x16xf32>
    %347 = arith.negf %346 : vector<2x16xf32>
    %348 = math.exp %347 : vector<2x16xf32>
    %cst_51 = arith.constant 1.000000e+00 : f32
    %349 = vector.broadcast %cst_51 : f32 to vector<2x16xf32>
    %350 = arith.addf %349, %348 : vector<2x16xf32>
    %351 = arith.divf %349, %350 : vector<2x16xf32>
    %352 = vector.extract_strided_slice %340 {offsets = [0, 16], sizes = [2, 16], strides = [1, 1]} : vector<2x48xf32> to vector<2x16xf32>
    %353 = vector.extract_strided_slice %342 {offsets = [0, 16], sizes = [2, 16], strides = [1, 1]} : vector<2x48xf32> to vector<2x16xf32>
    %354 = arith.addf %352, %353 : vector<2x16xf32>
    %355 = arith.negf %354 : vector<2x16xf32>
    %356 = math.exp %355 : vector<2x16xf32>
    %cst_52 = arith.constant 1.000000e+00 : f32
    %357 = vector.broadcast %cst_52 : f32 to vector<2x16xf32>
    %358 = arith.addf %357, %356 : vector<2x16xf32>
    %359 = arith.divf %357, %358 : vector<2x16xf32>
    %360 = vector.extract_strided_slice %340 {offsets = [0, 32], sizes = [2, 16], strides = [1, 1]} : vector<2x48xf32> to vector<2x16xf32>
    %361 = vector.extract_strided_slice %342 {offsets = [0, 32], sizes = [2, 16], strides = [1, 1]} : vector<2x48xf32> to vector<2x16xf32>
    %362 = arith.mulf %351, %361 : vector<2x16xf32>
    %363 = arith.addf %360, %362 : vector<2x16xf32>
    %364 = math.tanh %363 : vector<2x16xf32>
    %cst_53 = arith.constant 1.000000e+00 : f32
    %365 = vector.broadcast %cst_53 : f32 to vector<2x16xf32>
    %366 = arith.subf %365, %359 : vector<2x16xf32>
    %367 = arith.mulf %366, %364 : vector<2x16xf32>
    %368 = arith.mulf %359, %343 : vector<2x16xf32>
    %369 = arith.addf %367, %368 : vector<2x16xf32>
    %370 = vector.extract_strided_slice %339 {offsets = [0, 48], sizes = [2, 48], strides = [1, 1]} : vector<2x96xf32> to vector<2x48xf32>
    %371 = vector.extract_strided_slice %336 {offsets = [0, 16], sizes = [2, 16], strides = [1, 1]} : vector<2x32xf32> to vector<2x16xf32>
    %372 = vector.extract_strided_slice %341 {offsets = [0, 0], sizes = [2, 16], strides = [1, 1]} : vector<2x48xf32> to vector<2x16xf32>
    %373 = vector.extract_strided_slice %370 {offsets = [0, 0], sizes = [2, 16], strides = [1, 1]} : vector<2x48xf32> to vector<2x16xf32>
    %374 = arith.addf %372, %373 : vector<2x16xf32>
    %375 = arith.negf %374 : vector<2x16xf32>
    %376 = math.exp %375 : vector<2x16xf32>
    %cst_54 = arith.constant 1.000000e+00 : f32
    %377 = vector.broadcast %cst_54 : f32 to vector<2x16xf32>
    %378 = arith.addf %377, %376 : vector<2x16xf32>
    %379 = arith.divf %377, %378 : vector<2x16xf32>
    %380 = vector.extract_strided_slice %341 {offsets = [0, 16], sizes = [2, 16], strides = [1, 1]} : vector<2x48xf32> to vector<2x16xf32>
    %381 = vector.extract_strided_slice %370 {offsets = [0, 16], sizes = [2, 16], strides = [1, 1]} : vector<2x48xf32> to vector<2x16xf32>
    %382 = arith.addf %380, %381 : vector<2x16xf32>
    %383 = arith.negf %382 : vector<2x16xf32>
    %384 = math.exp %383 : vector<2x16xf32>
    %cst_55 = arith.constant 1.000000e+00 : f32
    %385 = vector.broadcast %cst_55 : f32 to vector<2x16xf32>
    %386 = arith.addf %385, %384 : vector<2x16xf32>
    %387 = arith.divf %385, %386 : vector<2x16xf32>
    %388 = vector.extract_strided_slice %341 {offsets = [0, 32], sizes = [2, 16], strides = [1, 1]} : vector<2x48xf32> to vector<2x16xf32>
    %389 = vector.extract_strided_slice %370 {offsets = [0, 32], sizes = [2, 16], strides = [1, 1]} : vector<2x48xf32> to vector<2x16xf32>
    %390 = arith.mulf %379, %389 : vector<2x16xf32>
    %391 = arith.addf %388, %390 : vector<2x16xf32>
    %392 = math.tanh %391 : vector<2x16xf32>
    %cst_56 = arith.constant 1.000000e+00 : f32
    %393 = vector.broadcast %cst_56 : f32 to vector<2x16xf32>
    %394 = arith.subf %393, %387 : vector<2x16xf32>
    %395 = arith.mulf %394, %392 : vector<2x16xf32>
    %396 = arith.mulf %387, %371 : vector<2x16xf32>
    %397 = arith.addf %395, %396 : vector<2x16xf32>
    %398 = tpu.concatenate %369, %397 in 1 : vector<2x16xf32>, vector<2x16xf32> -> vector<2x32xf32>
    %cst_57 = arith.constant dense<0.000000e+00> : vector<2x96xf32>
    %399 = tpu.matmul %398, %21, %cst_57 {dimension_numbers = #tpu.dot_dimension_numbers<[1], [0], [0], [1], [0, 0, 1, 1], [], []>} : vector<2x32xf32>, vector<32x96xf32>, vector<2x96xf32> -> vector<2x96xf32>
    %400 = vector.broadcast %22 : vector<1x96xf32> to vector<2x96xf32>
    %401 = arith.addf %399, %400 : vector<2x96xf32>
    %402 = vector.extract_strided_slice %25 {offsets = [12, 0], sizes = [2, 48], strides = [1, 1]} : vector<16x96xf32> to vector<2x48xf32>
    %403 = vector.extract_strided_slice %25 {offsets = [2, 48], sizes = [2, 48], strides = [1, 1]} : vector<16x96xf32> to vector<2x48xf32>
    %404 = vector.extract_strided_slice %401 {offsets = [0, 0], sizes = [2, 48], strides = [1, 1]} : vector<2x96xf32> to vector<2x48xf32>
    %405 = vector.extract_strided_slice %398 {offsets = [0, 0], sizes = [2, 16], strides = [1, 1]} : vector<2x32xf32> to vector<2x16xf32>
    %406 = vector.extract_strided_slice %402 {offsets = [0, 0], sizes = [2, 16], strides = [1, 1]} : vector<2x48xf32> to vector<2x16xf32>
    %407 = vector.extract_strided_slice %404 {offsets = [0, 0], sizes = [2, 16], strides = [1, 1]} : vector<2x48xf32> to vector<2x16xf32>
    %408 = arith.addf %406, %407 : vector<2x16xf32>
    %409 = arith.negf %408 : vector<2x16xf32>
    %410 = math.exp %409 : vector<2x16xf32>
    %cst_58 = arith.constant 1.000000e+00 : f32
    %411 = vector.broadcast %cst_58 : f32 to vector<2x16xf32>
    %412 = arith.addf %411, %410 : vector<2x16xf32>
    %413 = arith.divf %411, %412 : vector<2x16xf32>
    %414 = vector.extract_strided_slice %402 {offsets = [0, 16], sizes = [2, 16], strides = [1, 1]} : vector<2x48xf32> to vector<2x16xf32>
    %415 = vector.extract_strided_slice %404 {offsets = [0, 16], sizes = [2, 16], strides = [1, 1]} : vector<2x48xf32> to vector<2x16xf32>
    %416 = arith.addf %414, %415 : vector<2x16xf32>
    %417 = arith.negf %416 : vector<2x16xf32>
    %418 = math.exp %417 : vector<2x16xf32>
    %cst_59 = arith.constant 1.000000e+00 : f32
    %419 = vector.broadcast %cst_59 : f32 to vector<2x16xf32>
    %420 = arith.addf %419, %418 : vector<2x16xf32>
    %421 = arith.divf %419, %420 : vector<2x16xf32>
    %422 = vector.extract_strided_slice %402 {offsets = [0, 32], sizes = [2, 16], strides = [1, 1]} : vector<2x48xf32> to vector<2x16xf32>
    %423 = vector.extract_strided_slice %404 {offsets = [0, 32], sizes = [2, 16], strides = [1, 1]} : vector<2x48xf32> to vector<2x16xf32>
    %424 = arith.mulf %413, %423 : vector<2x16xf32>
    %425 = arith.addf %422, %424 : vector<2x16xf32>
    %426 = math.tanh %425 : vector<2x16xf32>
    %cst_60 = arith.constant 1.000000e+00 : f32
    %427 = vector.broadcast %cst_60 : f32 to vector<2x16xf32>
    %428 = arith.subf %427, %421 : vector<2x16xf32>
    %429 = arith.mulf %428, %426 : vector<2x16xf32>
    %430 = arith.mulf %421, %405 : vector<2x16xf32>
    %431 = arith.addf %429, %430 : vector<2x16xf32>
    %432 = vector.extract_strided_slice %401 {offsets = [0, 48], sizes = [2, 48], strides = [1, 1]} : vector<2x96xf32> to vector<2x48xf32>
    %433 = vector.extract_strided_slice %398 {offsets = [0, 16], sizes = [2, 16], strides = [1, 1]} : vector<2x32xf32> to vector<2x16xf32>
    %434 = vector.extract_strided_slice %403 {offsets = [0, 0], sizes = [2, 16], strides = [1, 1]} : vector<2x48xf32> to vector<2x16xf32>
    %435 = vector.extract_strided_slice %432 {offsets = [0, 0], sizes = [2, 16], strides = [1, 1]} : vector<2x48xf32> to vector<2x16xf32>
    %436 = arith.addf %434, %435 : vector<2x16xf32>
    %437 = arith.negf %436 : vector<2x16xf32>
    %438 = math.exp %437 : vector<2x16xf32>
    %cst_61 = arith.constant 1.000000e+00 : f32
    %439 = vector.broadcast %cst_61 : f32 to vector<2x16xf32>
    %440 = arith.addf %439, %438 : vector<2x16xf32>
    %441 = arith.divf %439, %440 : vector<2x16xf32>
    %442 = vector.extract_strided_slice %403 {offsets = [0, 16], sizes = [2, 16], strides = [1, 1]} : vector<2x48xf32> to vector<2x16xf32>
    %443 = vector.extract_strided_slice %432 {offsets = [0, 16], sizes = [2, 16], strides = [1, 1]} : vector<2x48xf32> to vector<2x16xf32>
    %444 = arith.addf %442, %443 : vector<2x16xf32>
    %445 = arith.negf %444 : vector<2x16xf32>
    %446 = math.exp %445 : vector<2x16xf32>
    %cst_62 = arith.constant 1.000000e+00 : f32
    %447 = vector.broadcast %cst_62 : f32 to vector<2x16xf32>
    %448 = arith.addf %447, %446 : vector<2x16xf32>
    %449 = arith.divf %447, %448 : vector<2x16xf32>
    %450 = vector.extract_strided_slice %403 {offsets = [0, 32], sizes = [2, 16], strides = [1, 1]} : vector<2x48xf32> to vector<2x16xf32>
    %451 = vector.extract_strided_slice %432 {offsets = [0, 32], sizes = [2, 16], strides = [1, 1]} : vector<2x48xf32> to vector<2x16xf32>
    %452 = arith.mulf %441, %451 : vector<2x16xf32>
    %453 = arith.addf %450, %452 : vector<2x16xf32>
    %454 = math.tanh %453 : vector<2x16xf32>
    %cst_63 = arith.constant 1.000000e+00 : f32
    %455 = vector.broadcast %cst_63 : f32 to vector<2x16xf32>
    %456 = arith.subf %455, %449 : vector<2x16xf32>
    %457 = arith.mulf %456, %454 : vector<2x16xf32>
    %458 = arith.mulf %449, %433 : vector<2x16xf32>
    %459 = arith.addf %457, %458 : vector<2x16xf32>
    %460 = tpu.concatenate %431, %459 in 1 : vector<2x16xf32>, vector<2x16xf32> -> vector<2x32xf32>
    %cst_64 = arith.constant dense<0.000000e+00> : vector<2x96xf32>
    %461 = tpu.matmul %460, %21, %cst_64 {dimension_numbers = #tpu.dot_dimension_numbers<[1], [0], [0], [1], [0, 0, 1, 1], [], []>} : vector<2x32xf32>, vector<32x96xf32>, vector<2x96xf32> -> vector<2x96xf32>
    %462 = vector.broadcast %22 : vector<1x96xf32> to vector<2x96xf32>
    %463 = arith.addf %461, %462 : vector<2x96xf32>
    %464 = vector.extract_strided_slice %25 {offsets = [14, 0], sizes = [2, 48], strides = [1, 1]} : vector<16x96xf32> to vector<2x48xf32>
    %465 = vector.extract_strided_slice %25 {offsets = [0, 48], sizes = [2, 48], strides = [1, 1]} : vector<16x96xf32> to vector<2x48xf32>
    %466 = vector.extract_strided_slice %463 {offsets = [0, 0], sizes = [2, 48], strides = [1, 1]} : vector<2x96xf32> to vector<2x48xf32>
    %467 = vector.extract_strided_slice %460 {offsets = [0, 0], sizes = [2, 16], strides = [1, 1]} : vector<2x32xf32> to vector<2x16xf32>
    %468 = vector.extract_strided_slice %464 {offsets = [0, 0], sizes = [2, 16], strides = [1, 1]} : vector<2x48xf32> to vector<2x16xf32>
    %469 = vector.extract_strided_slice %466 {offsets = [0, 0], sizes = [2, 16], strides = [1, 1]} : vector<2x48xf32> to vector<2x16xf32>
    %470 = arith.addf %468, %469 : vector<2x16xf32>
    %471 = arith.negf %470 : vector<2x16xf32>
    %472 = math.exp %471 : vector<2x16xf32>
    %cst_65 = arith.constant 1.000000e+00 : f32
    %473 = vector.broadcast %cst_65 : f32 to vector<2x16xf32>
    %474 = arith.addf %473, %472 : vector<2x16xf32>
    %475 = arith.divf %473, %474 : vector<2x16xf32>
    %476 = vector.extract_strided_slice %464 {offsets = [0, 16], sizes = [2, 16], strides = [1, 1]} : vector<2x48xf32> to vector<2x16xf32>
    %477 = vector.extract_strided_slice %466 {offsets = [0, 16], sizes = [2, 16], strides = [1, 1]} : vector<2x48xf32> to vector<2x16xf32>
    %478 = arith.addf %476, %477 : vector<2x16xf32>
    %479 = arith.negf %478 : vector<2x16xf32>
    %480 = math.exp %479 : vector<2x16xf32>
    %cst_66 = arith.constant 1.000000e+00 : f32
    %481 = vector.broadcast %cst_66 : f32 to vector<2x16xf32>
    %482 = arith.addf %481, %480 : vector<2x16xf32>
    %483 = arith.divf %481, %482 : vector<2x16xf32>
    %484 = vector.extract_strided_slice %464 {offsets = [0, 32], sizes = [2, 16], strides = [1, 1]} : vector<2x48xf32> to vector<2x16xf32>
    %485 = vector.extract_strided_slice %466 {offsets = [0, 32], sizes = [2, 16], strides = [1, 1]} : vector<2x48xf32> to vector<2x16xf32>
    %486 = arith.mulf %475, %485 : vector<2x16xf32>
    %487 = arith.addf %484, %486 : vector<2x16xf32>
    %488 = math.tanh %487 : vector<2x16xf32>
    %cst_67 = arith.constant 1.000000e+00 : f32
    %489 = vector.broadcast %cst_67 : f32 to vector<2x16xf32>
    %490 = arith.subf %489, %483 : vector<2x16xf32>
    %491 = arith.mulf %490, %488 : vector<2x16xf32>
    %492 = arith.mulf %483, %467 : vector<2x16xf32>
    %493 = arith.addf %491, %492 : vector<2x16xf32>
    %494 = vector.extract_strided_slice %463 {offsets = [0, 48], sizes = [2, 48], strides = [1, 1]} : vector<2x96xf32> to vector<2x48xf32>
    %495 = vector.extract_strided_slice %460 {offsets = [0, 16], sizes = [2, 16], strides = [1, 1]} : vector<2x32xf32> to vector<2x16xf32>
    %496 = vector.extract_strided_slice %465 {offsets = [0, 0], sizes = [2, 16], strides = [1, 1]} : vector<2x48xf32> to vector<2x16xf32>
    %497 = vector.extract_strided_slice %494 {offsets = [0, 0], sizes = [2, 16], strides = [1, 1]} : vector<2x48xf32> to vector<2x16xf32>
    %498 = arith.addf %496, %497 : vector<2x16xf32>
    %499 = arith.negf %498 : vector<2x16xf32>
    %500 = math.exp %499 : vector<2x16xf32>
    %cst_68 = arith.constant 1.000000e+00 : f32
    %501 = vector.broadcast %cst_68 : f32 to vector<2x16xf32>
    %502 = arith.addf %501, %500 : vector<2x16xf32>
    %503 = arith.divf %501, %502 : vector<2x16xf32>
    %504 = vector.extract_strided_slice %465 {offsets = [0, 16], sizes = [2, 16], strides = [1, 1]} : vector<2x48xf32> to vector<2x16xf32>
    %505 = vector.extract_strided_slice %494 {offsets = [0, 16], sizes = [2, 16], strides = [1, 1]} : vector<2x48xf32> to vector<2x16xf32>
    %506 = arith.addf %504, %505 : vector<2x16xf32>
    %507 = arith.negf %506 : vector<2x16xf32>
    %508 = math.exp %507 : vector<2x16xf32>
    %cst_69 = arith.constant 1.000000e+00 : f32
    %509 = vector.broadcast %cst_69 : f32 to vector<2x16xf32>
    %510 = arith.addf %509, %508 : vector<2x16xf32>
    %511 = arith.divf %509, %510 : vector<2x16xf32>
    %512 = vector.extract_strided_slice %465 {offsets = [0, 32], sizes = [2, 16], strides = [1, 1]} : vector<2x48xf32> to vector<2x16xf32>
    %513 = vector.extract_strided_slice %494 {offsets = [0, 32], sizes = [2, 16], strides = [1, 1]} : vector<2x48xf32> to vector<2x16xf32>
    %514 = arith.mulf %503, %513 : vector<2x16xf32>
    %515 = arith.addf %512, %514 : vector<2x16xf32>
    %516 = math.tanh %515 : vector<2x16xf32>
    %cst_70 = arith.constant 1.000000e+00 : f32
    %517 = vector.broadcast %cst_70 : f32 to vector<2x16xf32>
    %518 = arith.subf %517, %511 : vector<2x16xf32>
    %519 = arith.mulf %518, %516 : vector<2x16xf32>
    %520 = arith.mulf %511, %495 : vector<2x16xf32>
    %521 = arith.addf %519, %520 : vector<2x16xf32>
    %522 = tpu.concatenate %59, %521 in 1 : vector<2x16xf32>, vector<2x16xf32> -> vector<2x32xf32>
    %523 = tpu.concatenate %121, %459 in 1 : vector<2x16xf32>, vector<2x16xf32> -> vector<2x32xf32>
    %524 = tpu.concatenate %183, %397 in 1 : vector<2x16xf32>, vector<2x16xf32> -> vector<2x32xf32>
    %525 = tpu.concatenate %245, %335 in 1 : vector<2x16xf32>, vector<2x16xf32> -> vector<2x32xf32>
    %526 = tpu.concatenate %307, %273 in 1 : vector<2x16xf32>, vector<2x16xf32> -> vector<2x32xf32>
    %527 = tpu.concatenate %369, %211 in 1 : vector<2x16xf32>, vector<2x16xf32> -> vector<2x32xf32>
    %528 = tpu.concatenate %431, %149 in 1 : vector<2x16xf32>, vector<2x16xf32> -> vector<2x32xf32>
    %529 = tpu.concatenate %493, %87 in 1 : vector<2x16xf32>, vector<2x16xf32> -> vector<2x32xf32>
    %530 = tpu.concatenate %522, %523, %524, %525, %526, %527, %528, %529 in 0 : vector<2x32xf32>, vector<2x32xf32>, vector<2x32xf32>, vector<2x32xf32>, vector<2x32xf32>, vector<2x32xf32>, vector<2x32xf32>, vector<2x32xf32> -> vector<16x32xf32>
    %c0_71 = arith.constant 0 : index
    %c0_72 = arith.constant 0 : index
    %531 = vector.load %arg5[%c0_71, %c0_72] : memref<32x96xf32, #tpu.memory_space<vmem>>, vector<32x96xf32>
    %c0_73 = arith.constant 0 : index
    %c0_74 = arith.constant 0 : index
    %532 = vector.load %arg6[%c0_73, %c0_74] : memref<1x96xf32, #tpu.memory_space<vmem>>, vector<1x96xf32>
    %c0_75 = arith.constant 0 : index
    %c0_76 = arith.constant 0 : index
    %533 = vector.load %arg7[%c0_75, %c0_76] : memref<32x96xf32, #tpu.memory_space<vmem>>, vector<32x96xf32>
    %c0_77 = arith.constant 0 : index
    %c0_78 = arith.constant 0 : index
    %534 = vector.load %arg8[%c0_77, %c0_78] : memref<1x96xf32, #tpu.memory_space<vmem>>, vector<1x96xf32>
    %cst_79 = arith.constant dense<0.000000e+00> : vector<16x96xf32>
    %535 = tpu.matmul %530, %531, %cst_79 {dimension_numbers = #tpu.dot_dimension_numbers<[1], [0], [0], [1], [0, 0, 1, 1], [], []>} : vector<16x32xf32>, vector<32x96xf32>, vector<16x96xf32> -> vector<16x96xf32>
    %536 = vector.broadcast %532 : vector<1x96xf32> to vector<16x96xf32>
    %537 = arith.addf %535, %536 : vector<16x96xf32>
    %cst_80 = arith.constant 0.000000e+00 : f32
    %538 = vector.broadcast %cst_80 : f32 to vector<2x32xf32>
    %cst_81 = arith.constant dense<0.000000e+00> : vector<2x96xf32>
    %539 = tpu.matmul %538, %533, %cst_81 {dimension_numbers = #tpu.dot_dimension_numbers<[1], [0], [0], [1], [0, 0, 1, 1], [], []>} : vector<2x32xf32>, vector<32x96xf32>, vector<2x96xf32> -> vector<2x96xf32>
    %540 = vector.broadcast %534 : vector<1x96xf32> to vector<2x96xf32>
    %541 = arith.addf %539, %540 : vector<2x96xf32>
    %542 = vector.extract_strided_slice %537 {offsets = [0, 0], sizes = [2, 48], strides = [1, 1]} : vector<16x96xf32> to vector<2x48xf32>
    %543 = vector.extract_strided_slice %537 {offsets = [14, 48], sizes = [2, 48], strides = [1, 1]} : vector<16x96xf32> to vector<2x48xf32>
    %544 = vector.extract_strided_slice %541 {offsets = [0, 0], sizes = [2, 48], strides = [1, 1]} : vector<2x96xf32> to vector<2x48xf32>
    %545 = vector.extract_strided_slice %538 {offsets = [0, 0], sizes = [2, 16], strides = [1, 1]} : vector<2x32xf32> to vector<2x16xf32>
    %546 = vector.extract_strided_slice %542 {offsets = [0, 0], sizes = [2, 16], strides = [1, 1]} : vector<2x48xf32> to vector<2x16xf32>
    %547 = vector.extract_strided_slice %544 {offsets = [0, 0], sizes = [2, 16], strides = [1, 1]} : vector<2x48xf32> to vector<2x16xf32>
    %548 = arith.addf %546, %547 : vector<2x16xf32>
    %549 = arith.negf %548 : vector<2x16xf32>
    %550 = math.exp %549 : vector<2x16xf32>
    %cst_82 = arith.constant 1.000000e+00 : f32
    %551 = vector.broadcast %cst_82 : f32 to vector<2x16xf32>
    %552 = arith.addf %551, %550 : vector<2x16xf32>
    %553 = arith.divf %551, %552 : vector<2x16xf32>
    %554 = vector.extract_strided_slice %542 {offsets = [0, 16], sizes = [2, 16], strides = [1, 1]} : vector<2x48xf32> to vector<2x16xf32>
    %555 = vector.extract_strided_slice %544 {offsets = [0, 16], sizes = [2, 16], strides = [1, 1]} : vector<2x48xf32> to vector<2x16xf32>
    %556 = arith.addf %554, %555 : vector<2x16xf32>
    %557 = arith.negf %556 : vector<2x16xf32>
    %558 = math.exp %557 : vector<2x16xf32>
    %cst_83 = arith.constant 1.000000e+00 : f32
    %559 = vector.broadcast %cst_83 : f32 to vector<2x16xf32>
    %560 = arith.addf %559, %558 : vector<2x16xf32>
    %561 = arith.divf %559, %560 : vector<2x16xf32>
    %562 = vector.extract_strided_slice %542 {offsets = [0, 32], sizes = [2, 16], strides = [1, 1]} : vector<2x48xf32> to vector<2x16xf32>
    %563 = vector.extract_strided_slice %544 {offsets = [0, 32], sizes = [2, 16], strides = [1, 1]} : vector<2x48xf32> to vector<2x16xf32>
    %564 = arith.mulf %553, %563 : vector<2x16xf32>
    %565 = arith.addf %562, %564 : vector<2x16xf32>
    %566 = math.tanh %565 : vector<2x16xf32>
    %cst_84 = arith.constant 1.000000e+00 : f32
    %567 = vector.broadcast %cst_84 : f32 to vector<2x16xf32>
    %568 = arith.subf %567, %561 : vector<2x16xf32>
    %569 = arith.mulf %568, %566 : vector<2x16xf32>
    %570 = arith.mulf %561, %545 : vector<2x16xf32>
    %571 = arith.addf %569, %570 : vector<2x16xf32>
    %572 = vector.extract_strided_slice %541 {offsets = [0, 48], sizes = [2, 48], strides = [1, 1]} : vector<2x96xf32> to vector<2x48xf32>
    %573 = vector.extract_strided_slice %538 {offsets = [0, 16], sizes = [2, 16], strides = [1, 1]} : vector<2x32xf32> to vector<2x16xf32>
    %574 = vector.extract_strided_slice %543 {offsets = [0, 0], sizes = [2, 16], strides = [1, 1]} : vector<2x48xf32> to vector<2x16xf32>
    %575 = vector.extract_strided_slice %572 {offsets = [0, 0], sizes = [2, 16], strides = [1, 1]} : vector<2x48xf32> to vector<2x16xf32>
    %576 = arith.addf %574, %575 : vector<2x16xf32>
    %577 = arith.negf %576 : vector<2x16xf32>
    %578 = math.exp %577 : vector<2x16xf32>
    %cst_85 = arith.constant 1.000000e+00 : f32
    %579 = vector.broadcast %cst_85 : f32 to vector<2x16xf32>
    %580 = arith.addf %579, %578 : vector<2x16xf32>
    %581 = arith.divf %579, %580 : vector<2x16xf32>
    %582 = vector.extract_strided_slice %543 {offsets = [0, 16], sizes = [2, 16], strides = [1, 1]} : vector<2x48xf32> to vector<2x16xf32>
    %583 = vector.extract_strided_slice %572 {offsets = [0, 16], sizes = [2, 16], strides = [1, 1]} : vector<2x48xf32> to vector<2x16xf32>
    %584 = arith.addf %582, %583 : vector<2x16xf32>
    %585 = arith.negf %584 : vector<2x16xf32>
    %586 = math.exp %585 : vector<2x16xf32>
    %cst_86 = arith.constant 1.000000e+00 : f32
    %587 = vector.broadcast %cst_86 : f32 to vector<2x16xf32>
    %588 = arith.addf %587, %586 : vector<2x16xf32>
    %589 = arith.divf %587, %588 : vector<2x16xf32>
    %590 = vector.extract_strided_slice %543 {offsets = [0, 32], sizes = [2, 16], strides = [1, 1]} : vector<2x48xf32> to vector<2x16xf32>
    %591 = vector.extract_strided_slice %572 {offsets = [0, 32], sizes = [2, 16], strides = [1, 1]} : vector<2x48xf32> to vector<2x16xf32>
    %592 = arith.mulf %581, %591 : vector<2x16xf32>
    %593 = arith.addf %590, %592 : vector<2x16xf32>
    %594 = math.tanh %593 : vector<2x16xf32>
    %cst_87 = arith.constant 1.000000e+00 : f32
    %595 = vector.broadcast %cst_87 : f32 to vector<2x16xf32>
    %596 = arith.subf %595, %589 : vector<2x16xf32>
    %597 = arith.mulf %596, %594 : vector<2x16xf32>
    %598 = arith.mulf %589, %573 : vector<2x16xf32>
    %599 = arith.addf %597, %598 : vector<2x16xf32>
    %600 = tpu.concatenate %571, %599 in 1 : vector<2x16xf32>, vector<2x16xf32> -> vector<2x32xf32>
    %cst_88 = arith.constant dense<0.000000e+00> : vector<2x96xf32>
    %601 = tpu.matmul %600, %533, %cst_88 {dimension_numbers = #tpu.dot_dimension_numbers<[1], [0], [0], [1], [0, 0, 1, 1], [], []>} : vector<2x32xf32>, vector<32x96xf32>, vector<2x96xf32> -> vector<2x96xf32>
    %602 = vector.broadcast %534 : vector<1x96xf32> to vector<2x96xf32>
    %603 = arith.addf %601, %602 : vector<2x96xf32>
    %604 = vector.extract_strided_slice %537 {offsets = [2, 0], sizes = [2, 48], strides = [1, 1]} : vector<16x96xf32> to vector<2x48xf32>
    %605 = vector.extract_strided_slice %537 {offsets = [12, 48], sizes = [2, 48], strides = [1, 1]} : vector<16x96xf32> to vector<2x48xf32>
    %606 = vector.extract_strided_slice %603 {offsets = [0, 0], sizes = [2, 48], strides = [1, 1]} : vector<2x96xf32> to vector<2x48xf32>
    %607 = vector.extract_strided_slice %600 {offsets = [0, 0], sizes = [2, 16], strides = [1, 1]} : vector<2x32xf32> to vector<2x16xf32>
    %608 = vector.extract_strided_slice %604 {offsets = [0, 0], sizes = [2, 16], strides = [1, 1]} : vector<2x48xf32> to vector<2x16xf32>
    %609 = vector.extract_strided_slice %606 {offsets = [0, 0], sizes = [2, 16], strides = [1, 1]} : vector<2x48xf32> to vector<2x16xf32>
    %610 = arith.addf %608, %609 : vector<2x16xf32>
    %611 = arith.negf %610 : vector<2x16xf32>
    %612 = math.exp %611 : vector<2x16xf32>
    %cst_89 = arith.constant 1.000000e+00 : f32
    %613 = vector.broadcast %cst_89 : f32 to vector<2x16xf32>
    %614 = arith.addf %613, %612 : vector<2x16xf32>
    %615 = arith.divf %613, %614 : vector<2x16xf32>
    %616 = vector.extract_strided_slice %604 {offsets = [0, 16], sizes = [2, 16], strides = [1, 1]} : vector<2x48xf32> to vector<2x16xf32>
    %617 = vector.extract_strided_slice %606 {offsets = [0, 16], sizes = [2, 16], strides = [1, 1]} : vector<2x48xf32> to vector<2x16xf32>
    %618 = arith.addf %616, %617 : vector<2x16xf32>
    %619 = arith.negf %618 : vector<2x16xf32>
    %620 = math.exp %619 : vector<2x16xf32>
    %cst_90 = arith.constant 1.000000e+00 : f32
    %621 = vector.broadcast %cst_90 : f32 to vector<2x16xf32>
    %622 = arith.addf %621, %620 : vector<2x16xf32>
    %623 = arith.divf %621, %622 : vector<2x16xf32>
    %624 = vector.extract_strided_slice %604 {offsets = [0, 32], sizes = [2, 16], strides = [1, 1]} : vector<2x48xf32> to vector<2x16xf32>
    %625 = vector.extract_strided_slice %606 {offsets = [0, 32], sizes = [2, 16], strides = [1, 1]} : vector<2x48xf32> to vector<2x16xf32>
    %626 = arith.mulf %615, %625 : vector<2x16xf32>
    %627 = arith.addf %624, %626 : vector<2x16xf32>
    %628 = math.tanh %627 : vector<2x16xf32>
    %cst_91 = arith.constant 1.000000e+00 : f32
    %629 = vector.broadcast %cst_91 : f32 to vector<2x16xf32>
    %630 = arith.subf %629, %623 : vector<2x16xf32>
    %631 = arith.mulf %630, %628 : vector<2x16xf32>
    %632 = arith.mulf %623, %607 : vector<2x16xf32>
    %633 = arith.addf %631, %632 : vector<2x16xf32>
    %634 = vector.extract_strided_slice %603 {offsets = [0, 48], sizes = [2, 48], strides = [1, 1]} : vector<2x96xf32> to vector<2x48xf32>
    %635 = vector.extract_strided_slice %600 {offsets = [0, 16], sizes = [2, 16], strides = [1, 1]} : vector<2x32xf32> to vector<2x16xf32>
    %636 = vector.extract_strided_slice %605 {offsets = [0, 0], sizes = [2, 16], strides = [1, 1]} : vector<2x48xf32> to vector<2x16xf32>
    %637 = vector.extract_strided_slice %634 {offsets = [0, 0], sizes = [2, 16], strides = [1, 1]} : vector<2x48xf32> to vector<2x16xf32>
    %638 = arith.addf %636, %637 : vector<2x16xf32>
    %639 = arith.negf %638 : vector<2x16xf32>
    %640 = math.exp %639 : vector<2x16xf32>
    %cst_92 = arith.constant 1.000000e+00 : f32
    %641 = vector.broadcast %cst_92 : f32 to vector<2x16xf32>
    %642 = arith.addf %641, %640 : vector<2x16xf32>
    %643 = arith.divf %641, %642 : vector<2x16xf32>
    %644 = vector.extract_strided_slice %605 {offsets = [0, 16], sizes = [2, 16], strides = [1, 1]} : vector<2x48xf32> to vector<2x16xf32>
    %645 = vector.extract_strided_slice %634 {offsets = [0, 16], sizes = [2, 16], strides = [1, 1]} : vector<2x48xf32> to vector<2x16xf32>
    %646 = arith.addf %644, %645 : vector<2x16xf32>
    %647 = arith.negf %646 : vector<2x16xf32>
    %648 = math.exp %647 : vector<2x16xf32>
    %cst_93 = arith.constant 1.000000e+00 : f32
    %649 = vector.broadcast %cst_93 : f32 to vector<2x16xf32>
    %650 = arith.addf %649, %648 : vector<2x16xf32>
    %651 = arith.divf %649, %650 : vector<2x16xf32>
    %652 = vector.extract_strided_slice %605 {offsets = [0, 32], sizes = [2, 16], strides = [1, 1]} : vector<2x48xf32> to vector<2x16xf32>
    %653 = vector.extract_strided_slice %634 {offsets = [0, 32], sizes = [2, 16], strides = [1, 1]} : vector<2x48xf32> to vector<2x16xf32>
    %654 = arith.mulf %643, %653 : vector<2x16xf32>
    %655 = arith.addf %652, %654 : vector<2x16xf32>
    %656 = math.tanh %655 : vector<2x16xf32>
    %cst_94 = arith.constant 1.000000e+00 : f32
    %657 = vector.broadcast %cst_94 : f32 to vector<2x16xf32>
    %658 = arith.subf %657, %651 : vector<2x16xf32>
    %659 = arith.mulf %658, %656 : vector<2x16xf32>
    %660 = arith.mulf %651, %635 : vector<2x16xf32>
    %661 = arith.addf %659, %660 : vector<2x16xf32>
    %662 = tpu.concatenate %633, %661 in 1 : vector<2x16xf32>, vector<2x16xf32> -> vector<2x32xf32>
    %cst_95 = arith.constant dense<0.000000e+00> : vector<2x96xf32>
    %663 = tpu.matmul %662, %533, %cst_95 {dimension_numbers = #tpu.dot_dimension_numbers<[1], [0], [0], [1], [0, 0, 1, 1], [], []>} : vector<2x32xf32>, vector<32x96xf32>, vector<2x96xf32> -> vector<2x96xf32>
    %664 = vector.broadcast %534 : vector<1x96xf32> to vector<2x96xf32>
    %665 = arith.addf %663, %664 : vector<2x96xf32>
    %666 = vector.extract_strided_slice %537 {offsets = [4, 0], sizes = [2, 48], strides = [1, 1]} : vector<16x96xf32> to vector<2x48xf32>
    %667 = vector.extract_strided_slice %537 {offsets = [10, 48], sizes = [2, 48], strides = [1, 1]} : vector<16x96xf32> to vector<2x48xf32>
    %668 = vector.extract_strided_slice %665 {offsets = [0, 0], sizes = [2, 48], strides = [1, 1]} : vector<2x96xf32> to vector<2x48xf32>
    %669 = vector.extract_strided_slice %662 {offsets = [0, 0], sizes = [2, 16], strides = [1, 1]} : vector<2x32xf32> to vector<2x16xf32>
    %670 = vector.extract_strided_slice %666 {offsets = [0, 0], sizes = [2, 16], strides = [1, 1]} : vector<2x48xf32> to vector<2x16xf32>
    %671 = vector.extract_strided_slice %668 {offsets = [0, 0], sizes = [2, 16], strides = [1, 1]} : vector<2x48xf32> to vector<2x16xf32>
    %672 = arith.addf %670, %671 : vector<2x16xf32>
    %673 = arith.negf %672 : vector<2x16xf32>
    %674 = math.exp %673 : vector<2x16xf32>
    %cst_96 = arith.constant 1.000000e+00 : f32
    %675 = vector.broadcast %cst_96 : f32 to vector<2x16xf32>
    %676 = arith.addf %675, %674 : vector<2x16xf32>
    %677 = arith.divf %675, %676 : vector<2x16xf32>
    %678 = vector.extract_strided_slice %666 {offsets = [0, 16], sizes = [2, 16], strides = [1, 1]} : vector<2x48xf32> to vector<2x16xf32>
    %679 = vector.extract_strided_slice %668 {offsets = [0, 16], sizes = [2, 16], strides = [1, 1]} : vector<2x48xf32> to vector<2x16xf32>
    %680 = arith.addf %678, %679 : vector<2x16xf32>
    %681 = arith.negf %680 : vector<2x16xf32>
    %682 = math.exp %681 : vector<2x16xf32>
    %cst_97 = arith.constant 1.000000e+00 : f32
    %683 = vector.broadcast %cst_97 : f32 to vector<2x16xf32>
    %684 = arith.addf %683, %682 : vector<2x16xf32>
    %685 = arith.divf %683, %684 : vector<2x16xf32>
    %686 = vector.extract_strided_slice %666 {offsets = [0, 32], sizes = [2, 16], strides = [1, 1]} : vector<2x48xf32> to vector<2x16xf32>
    %687 = vector.extract_strided_slice %668 {offsets = [0, 32], sizes = [2, 16], strides = [1, 1]} : vector<2x48xf32> to vector<2x16xf32>
    %688 = arith.mulf %677, %687 : vector<2x16xf32>
    %689 = arith.addf %686, %688 : vector<2x16xf32>
    %690 = math.tanh %689 : vector<2x16xf32>
    %cst_98 = arith.constant 1.000000e+00 : f32
    %691 = vector.broadcast %cst_98 : f32 to vector<2x16xf32>
    %692 = arith.subf %691, %685 : vector<2x16xf32>
    %693 = arith.mulf %692, %690 : vector<2x16xf32>
    %694 = arith.mulf %685, %669 : vector<2x16xf32>
    %695 = arith.addf %693, %694 : vector<2x16xf32>
    %696 = vector.extract_strided_slice %665 {offsets = [0, 48], sizes = [2, 48], strides = [1, 1]} : vector<2x96xf32> to vector<2x48xf32>
    %697 = vector.extract_strided_slice %662 {offsets = [0, 16], sizes = [2, 16], strides = [1, 1]} : vector<2x32xf32> to vector<2x16xf32>
    %698 = vector.extract_strided_slice %667 {offsets = [0, 0], sizes = [2, 16], strides = [1, 1]} : vector<2x48xf32> to vector<2x16xf32>
    %699 = vector.extract_strided_slice %696 {offsets = [0, 0], sizes = [2, 16], strides = [1, 1]} : vector<2x48xf32> to vector<2x16xf32>
    %700 = arith.addf %698, %699 : vector<2x16xf32>
    %701 = arith.negf %700 : vector<2x16xf32>
    %702 = math.exp %701 : vector<2x16xf32>
    %cst_99 = arith.constant 1.000000e+00 : f32
    %703 = vector.broadcast %cst_99 : f32 to vector<2x16xf32>
    %704 = arith.addf %703, %702 : vector<2x16xf32>
    %705 = arith.divf %703, %704 : vector<2x16xf32>
    %706 = vector.extract_strided_slice %667 {offsets = [0, 16], sizes = [2, 16], strides = [1, 1]} : vector<2x48xf32> to vector<2x16xf32>
    %707 = vector.extract_strided_slice %696 {offsets = [0, 16], sizes = [2, 16], strides = [1, 1]} : vector<2x48xf32> to vector<2x16xf32>
    %708 = arith.addf %706, %707 : vector<2x16xf32>
    %709 = arith.negf %708 : vector<2x16xf32>
    %710 = math.exp %709 : vector<2x16xf32>
    %cst_100 = arith.constant 1.000000e+00 : f32
    %711 = vector.broadcast %cst_100 : f32 to vector<2x16xf32>
    %712 = arith.addf %711, %710 : vector<2x16xf32>
    %713 = arith.divf %711, %712 : vector<2x16xf32>
    %714 = vector.extract_strided_slice %667 {offsets = [0, 32], sizes = [2, 16], strides = [1, 1]} : vector<2x48xf32> to vector<2x16xf32>
    %715 = vector.extract_strided_slice %696 {offsets = [0, 32], sizes = [2, 16], strides = [1, 1]} : vector<2x48xf32> to vector<2x16xf32>
    %716 = arith.mulf %705, %715 : vector<2x16xf32>
    %717 = arith.addf %714, %716 : vector<2x16xf32>
    %718 = math.tanh %717 : vector<2x16xf32>
    %cst_101 = arith.constant 1.000000e+00 : f32
    %719 = vector.broadcast %cst_101 : f32 to vector<2x16xf32>
    %720 = arith.subf %719, %713 : vector<2x16xf32>
    %721 = arith.mulf %720, %718 : vector<2x16xf32>
    %722 = arith.mulf %713, %697 : vector<2x16xf32>
    %723 = arith.addf %721, %722 : vector<2x16xf32>
    %724 = tpu.concatenate %695, %723 in 1 : vector<2x16xf32>, vector<2x16xf32> -> vector<2x32xf32>
    %cst_102 = arith.constant dense<0.000000e+00> : vector<2x96xf32>
    %725 = tpu.matmul %724, %533, %cst_102 {dimension_numbers = #tpu.dot_dimension_numbers<[1], [0], [0], [1], [0, 0, 1, 1], [], []>} : vector<2x32xf32>, vector<32x96xf32>, vector<2x96xf32> -> vector<2x96xf32>
    %726 = vector.broadcast %534 : vector<1x96xf32> to vector<2x96xf32>
    %727 = arith.addf %725, %726 : vector<2x96xf32>
    %728 = vector.extract_strided_slice %537 {offsets = [6, 0], sizes = [2, 48], strides = [1, 1]} : vector<16x96xf32> to vector<2x48xf32>
    %729 = vector.extract_strided_slice %537 {offsets = [8, 48], sizes = [2, 48], strides = [1, 1]} : vector<16x96xf32> to vector<2x48xf32>
    %730 = vector.extract_strided_slice %727 {offsets = [0, 0], sizes = [2, 48], strides = [1, 1]} : vector<2x96xf32> to vector<2x48xf32>
    %731 = vector.extract_strided_slice %724 {offsets = [0, 0], sizes = [2, 16], strides = [1, 1]} : vector<2x32xf32> to vector<2x16xf32>
    %732 = vector.extract_strided_slice %728 {offsets = [0, 0], sizes = [2, 16], strides = [1, 1]} : vector<2x48xf32> to vector<2x16xf32>
    %733 = vector.extract_strided_slice %730 {offsets = [0, 0], sizes = [2, 16], strides = [1, 1]} : vector<2x48xf32> to vector<2x16xf32>
    %734 = arith.addf %732, %733 : vector<2x16xf32>
    %735 = arith.negf %734 : vector<2x16xf32>
    %736 = math.exp %735 : vector<2x16xf32>
    %cst_103 = arith.constant 1.000000e+00 : f32
    %737 = vector.broadcast %cst_103 : f32 to vector<2x16xf32>
    %738 = arith.addf %737, %736 : vector<2x16xf32>
    %739 = arith.divf %737, %738 : vector<2x16xf32>
    %740 = vector.extract_strided_slice %728 {offsets = [0, 16], sizes = [2, 16], strides = [1, 1]} : vector<2x48xf32> to vector<2x16xf32>
    %741 = vector.extract_strided_slice %730 {offsets = [0, 16], sizes = [2, 16], strides = [1, 1]} : vector<2x48xf32> to vector<2x16xf32>
    %742 = arith.addf %740, %741 : vector<2x16xf32>
    %743 = arith.negf %742 : vector<2x16xf32>
    %744 = math.exp %743 : vector<2x16xf32>
    %cst_104 = arith.constant 1.000000e+00 : f32
    %745 = vector.broadcast %cst_104 : f32 to vector<2x16xf32>
    %746 = arith.addf %745, %744 : vector<2x16xf32>
    %747 = arith.divf %745, %746 : vector<2x16xf32>
    %748 = vector.extract_strided_slice %728 {offsets = [0, 32], sizes = [2, 16], strides = [1, 1]} : vector<2x48xf32> to vector<2x16xf32>
    %749 = vector.extract_strided_slice %730 {offsets = [0, 32], sizes = [2, 16], strides = [1, 1]} : vector<2x48xf32> to vector<2x16xf32>
    %750 = arith.mulf %739, %749 : vector<2x16xf32>
    %751 = arith.addf %748, %750 : vector<2x16xf32>
    %752 = math.tanh %751 : vector<2x16xf32>
    %cst_105 = arith.constant 1.000000e+00 : f32
    %753 = vector.broadcast %cst_105 : f32 to vector<2x16xf32>
    %754 = arith.subf %753, %747 : vector<2x16xf32>
    %755 = arith.mulf %754, %752 : vector<2x16xf32>
    %756 = arith.mulf %747, %731 : vector<2x16xf32>
    %757 = arith.addf %755, %756 : vector<2x16xf32>
    %758 = vector.extract_strided_slice %727 {offsets = [0, 48], sizes = [2, 48], strides = [1, 1]} : vector<2x96xf32> to vector<2x48xf32>
    %759 = vector.extract_strided_slice %724 {offsets = [0, 16], sizes = [2, 16], strides = [1, 1]} : vector<2x32xf32> to vector<2x16xf32>
    %760 = vector.extract_strided_slice %729 {offsets = [0, 0], sizes = [2, 16], strides = [1, 1]} : vector<2x48xf32> to vector<2x16xf32>
    %761 = vector.extract_strided_slice %758 {offsets = [0, 0], sizes = [2, 16], strides = [1, 1]} : vector<2x48xf32> to vector<2x16xf32>
    %762 = arith.addf %760, %761 : vector<2x16xf32>
    %763 = arith.negf %762 : vector<2x16xf32>
    %764 = math.exp %763 : vector<2x16xf32>
    %cst_106 = arith.constant 1.000000e+00 : f32
    %765 = vector.broadcast %cst_106 : f32 to vector<2x16xf32>
    %766 = arith.addf %765, %764 : vector<2x16xf32>
    %767 = arith.divf %765, %766 : vector<2x16xf32>
    %768 = vector.extract_strided_slice %729 {offsets = [0, 16], sizes = [2, 16], strides = [1, 1]} : vector<2x48xf32> to vector<2x16xf32>
    %769 = vector.extract_strided_slice %758 {offsets = [0, 16], sizes = [2, 16], strides = [1, 1]} : vector<2x48xf32> to vector<2x16xf32>
    %770 = arith.addf %768, %769 : vector<2x16xf32>
    %771 = arith.negf %770 : vector<2x16xf32>
    %772 = math.exp %771 : vector<2x16xf32>
    %cst_107 = arith.constant 1.000000e+00 : f32
    %773 = vector.broadcast %cst_107 : f32 to vector<2x16xf32>
    %774 = arith.addf %773, %772 : vector<2x16xf32>
    %775 = arith.divf %773, %774 : vector<2x16xf32>
    %776 = vector.extract_strided_slice %729 {offsets = [0, 32], sizes = [2, 16], strides = [1, 1]} : vector<2x48xf32> to vector<2x16xf32>
    %777 = vector.extract_strided_slice %758 {offsets = [0, 32], sizes = [2, 16], strides = [1, 1]} : vector<2x48xf32> to vector<2x16xf32>
    %778 = arith.mulf %767, %777 : vector<2x16xf32>
    %779 = arith.addf %776, %778 : vector<2x16xf32>
    %780 = math.tanh %779 : vector<2x16xf32>
    %cst_108 = arith.constant 1.000000e+00 : f32
    %781 = vector.broadcast %cst_108 : f32 to vector<2x16xf32>
    %782 = arith.subf %781, %775 : vector<2x16xf32>
    %783 = arith.mulf %782, %780 : vector<2x16xf32>
    %784 = arith.mulf %775, %759 : vector<2x16xf32>
    %785 = arith.addf %783, %784 : vector<2x16xf32>
    %786 = tpu.concatenate %757, %785 in 1 : vector<2x16xf32>, vector<2x16xf32> -> vector<2x32xf32>
    %cst_109 = arith.constant dense<0.000000e+00> : vector<2x96xf32>
    %787 = tpu.matmul %786, %533, %cst_109 {dimension_numbers = #tpu.dot_dimension_numbers<[1], [0], [0], [1], [0, 0, 1, 1], [], []>} : vector<2x32xf32>, vector<32x96xf32>, vector<2x96xf32> -> vector<2x96xf32>
    %788 = vector.broadcast %534 : vector<1x96xf32> to vector<2x96xf32>
    %789 = arith.addf %787, %788 : vector<2x96xf32>
    %790 = vector.extract_strided_slice %537 {offsets = [8, 0], sizes = [2, 48], strides = [1, 1]} : vector<16x96xf32> to vector<2x48xf32>
    %791 = vector.extract_strided_slice %537 {offsets = [6, 48], sizes = [2, 48], strides = [1, 1]} : vector<16x96xf32> to vector<2x48xf32>
    %792 = vector.extract_strided_slice %789 {offsets = [0, 0], sizes = [2, 48], strides = [1, 1]} : vector<2x96xf32> to vector<2x48xf32>
    %793 = vector.extract_strided_slice %786 {offsets = [0, 0], sizes = [2, 16], strides = [1, 1]} : vector<2x32xf32> to vector<2x16xf32>
    %794 = vector.extract_strided_slice %790 {offsets = [0, 0], sizes = [2, 16], strides = [1, 1]} : vector<2x48xf32> to vector<2x16xf32>
    %795 = vector.extract_strided_slice %792 {offsets = [0, 0], sizes = [2, 16], strides = [1, 1]} : vector<2x48xf32> to vector<2x16xf32>
    %796 = arith.addf %794, %795 : vector<2x16xf32>
    %797 = arith.negf %796 : vector<2x16xf32>
    %798 = math.exp %797 : vector<2x16xf32>
    %cst_110 = arith.constant 1.000000e+00 : f32
    %799 = vector.broadcast %cst_110 : f32 to vector<2x16xf32>
    %800 = arith.addf %799, %798 : vector<2x16xf32>
    %801 = arith.divf %799, %800 : vector<2x16xf32>
    %802 = vector.extract_strided_slice %790 {offsets = [0, 16], sizes = [2, 16], strides = [1, 1]} : vector<2x48xf32> to vector<2x16xf32>
    %803 = vector.extract_strided_slice %792 {offsets = [0, 16], sizes = [2, 16], strides = [1, 1]} : vector<2x48xf32> to vector<2x16xf32>
    %804 = arith.addf %802, %803 : vector<2x16xf32>
    %805 = arith.negf %804 : vector<2x16xf32>
    %806 = math.exp %805 : vector<2x16xf32>
    %cst_111 = arith.constant 1.000000e+00 : f32
    %807 = vector.broadcast %cst_111 : f32 to vector<2x16xf32>
    %808 = arith.addf %807, %806 : vector<2x16xf32>
    %809 = arith.divf %807, %808 : vector<2x16xf32>
    %810 = vector.extract_strided_slice %790 {offsets = [0, 32], sizes = [2, 16], strides = [1, 1]} : vector<2x48xf32> to vector<2x16xf32>
    %811 = vector.extract_strided_slice %792 {offsets = [0, 32], sizes = [2, 16], strides = [1, 1]} : vector<2x48xf32> to vector<2x16xf32>
    %812 = arith.mulf %801, %811 : vector<2x16xf32>
    %813 = arith.addf %810, %812 : vector<2x16xf32>
    %814 = math.tanh %813 : vector<2x16xf32>
    %cst_112 = arith.constant 1.000000e+00 : f32
    %815 = vector.broadcast %cst_112 : f32 to vector<2x16xf32>
    %816 = arith.subf %815, %809 : vector<2x16xf32>
    %817 = arith.mulf %816, %814 : vector<2x16xf32>
    %818 = arith.mulf %809, %793 : vector<2x16xf32>
    %819 = arith.addf %817, %818 : vector<2x16xf32>
    %820 = vector.extract_strided_slice %789 {offsets = [0, 48], sizes = [2, 48], strides = [1, 1]} : vector<2x96xf32> to vector<2x48xf32>
    %821 = vector.extract_strided_slice %786 {offsets = [0, 16], sizes = [2, 16], strides = [1, 1]} : vector<2x32xf32> to vector<2x16xf32>
    %822 = vector.extract_strided_slice %791 {offsets = [0, 0], sizes = [2, 16], strides = [1, 1]} : vector<2x48xf32> to vector<2x16xf32>
    %823 = vector.extract_strided_slice %820 {offsets = [0, 0], sizes = [2, 16], strides = [1, 1]} : vector<2x48xf32> to vector<2x16xf32>
    %824 = arith.addf %822, %823 : vector<2x16xf32>
    %825 = arith.negf %824 : vector<2x16xf32>
    %826 = math.exp %825 : vector<2x16xf32>
    %cst_113 = arith.constant 1.000000e+00 : f32
    %827 = vector.broadcast %cst_113 : f32 to vector<2x16xf32>
    %828 = arith.addf %827, %826 : vector<2x16xf32>
    %829 = arith.divf %827, %828 : vector<2x16xf32>
    %830 = vector.extract_strided_slice %791 {offsets = [0, 16], sizes = [2, 16], strides = [1, 1]} : vector<2x48xf32> to vector<2x16xf32>
    %831 = vector.extract_strided_slice %820 {offsets = [0, 16], sizes = [2, 16], strides = [1, 1]} : vector<2x48xf32> to vector<2x16xf32>
    %832 = arith.addf %830, %831 : vector<2x16xf32>
    %833 = arith.negf %832 : vector<2x16xf32>
    %834 = math.exp %833 : vector<2x16xf32>
    %cst_114 = arith.constant 1.000000e+00 : f32
    %835 = vector.broadcast %cst_114 : f32 to vector<2x16xf32>
    %836 = arith.addf %835, %834 : vector<2x16xf32>
    %837 = arith.divf %835, %836 : vector<2x16xf32>
    %838 = vector.extract_strided_slice %791 {offsets = [0, 32], sizes = [2, 16], strides = [1, 1]} : vector<2x48xf32> to vector<2x16xf32>
    %839 = vector.extract_strided_slice %820 {offsets = [0, 32], sizes = [2, 16], strides = [1, 1]} : vector<2x48xf32> to vector<2x16xf32>
    %840 = arith.mulf %829, %839 : vector<2x16xf32>
    %841 = arith.addf %838, %840 : vector<2x16xf32>
    %842 = math.tanh %841 : vector<2x16xf32>
    %cst_115 = arith.constant 1.000000e+00 : f32
    %843 = vector.broadcast %cst_115 : f32 to vector<2x16xf32>
    %844 = arith.subf %843, %837 : vector<2x16xf32>
    %845 = arith.mulf %844, %842 : vector<2x16xf32>
    %846 = arith.mulf %837, %821 : vector<2x16xf32>
    %847 = arith.addf %845, %846 : vector<2x16xf32>
    %848 = tpu.concatenate %819, %847 in 1 : vector<2x16xf32>, vector<2x16xf32> -> vector<2x32xf32>
    %cst_116 = arith.constant dense<0.000000e+00> : vector<2x96xf32>
    %849 = tpu.matmul %848, %533, %cst_116 {dimension_numbers = #tpu.dot_dimension_numbers<[1], [0], [0], [1], [0, 0, 1, 1], [], []>} : vector<2x32xf32>, vector<32x96xf32>, vector<2x96xf32> -> vector<2x96xf32>
    %850 = vector.broadcast %534 : vector<1x96xf32> to vector<2x96xf32>
    %851 = arith.addf %849, %850 : vector<2x96xf32>
    %852 = vector.extract_strided_slice %537 {offsets = [10, 0], sizes = [2, 48], strides = [1, 1]} : vector<16x96xf32> to vector<2x48xf32>
    %853 = vector.extract_strided_slice %537 {offsets = [4, 48], sizes = [2, 48], strides = [1, 1]} : vector<16x96xf32> to vector<2x48xf32>
    %854 = vector.extract_strided_slice %851 {offsets = [0, 0], sizes = [2, 48], strides = [1, 1]} : vector<2x96xf32> to vector<2x48xf32>
    %855 = vector.extract_strided_slice %848 {offsets = [0, 0], sizes = [2, 16], strides = [1, 1]} : vector<2x32xf32> to vector<2x16xf32>
    %856 = vector.extract_strided_slice %852 {offsets = [0, 0], sizes = [2, 16], strides = [1, 1]} : vector<2x48xf32> to vector<2x16xf32>
    %857 = vector.extract_strided_slice %854 {offsets = [0, 0], sizes = [2, 16], strides = [1, 1]} : vector<2x48xf32> to vector<2x16xf32>
    %858 = arith.addf %856, %857 : vector<2x16xf32>
    %859 = arith.negf %858 : vector<2x16xf32>
    %860 = math.exp %859 : vector<2x16xf32>
    %cst_117 = arith.constant 1.000000e+00 : f32
    %861 = vector.broadcast %cst_117 : f32 to vector<2x16xf32>
    %862 = arith.addf %861, %860 : vector<2x16xf32>
    %863 = arith.divf %861, %862 : vector<2x16xf32>
    %864 = vector.extract_strided_slice %852 {offsets = [0, 16], sizes = [2, 16], strides = [1, 1]} : vector<2x48xf32> to vector<2x16xf32>
    %865 = vector.extract_strided_slice %854 {offsets = [0, 16], sizes = [2, 16], strides = [1, 1]} : vector<2x48xf32> to vector<2x16xf32>
    %866 = arith.addf %864, %865 : vector<2x16xf32>
    %867 = arith.negf %866 : vector<2x16xf32>
    %868 = math.exp %867 : vector<2x16xf32>
    %cst_118 = arith.constant 1.000000e+00 : f32
    %869 = vector.broadcast %cst_118 : f32 to vector<2x16xf32>
    %870 = arith.addf %869, %868 : vector<2x16xf32>
    %871 = arith.divf %869, %870 : vector<2x16xf32>
    %872 = vector.extract_strided_slice %852 {offsets = [0, 32], sizes = [2, 16], strides = [1, 1]} : vector<2x48xf32> to vector<2x16xf32>
    %873 = vector.extract_strided_slice %854 {offsets = [0, 32], sizes = [2, 16], strides = [1, 1]} : vector<2x48xf32> to vector<2x16xf32>
    %874 = arith.mulf %863, %873 : vector<2x16xf32>
    %875 = arith.addf %872, %874 : vector<2x16xf32>
    %876 = math.tanh %875 : vector<2x16xf32>
    %cst_119 = arith.constant 1.000000e+00 : f32
    %877 = vector.broadcast %cst_119 : f32 to vector<2x16xf32>
    %878 = arith.subf %877, %871 : vector<2x16xf32>
    %879 = arith.mulf %878, %876 : vector<2x16xf32>
    %880 = arith.mulf %871, %855 : vector<2x16xf32>
    %881 = arith.addf %879, %880 : vector<2x16xf32>
    %882 = vector.extract_strided_slice %851 {offsets = [0, 48], sizes = [2, 48], strides = [1, 1]} : vector<2x96xf32> to vector<2x48xf32>
    %883 = vector.extract_strided_slice %848 {offsets = [0, 16], sizes = [2, 16], strides = [1, 1]} : vector<2x32xf32> to vector<2x16xf32>
    %884 = vector.extract_strided_slice %853 {offsets = [0, 0], sizes = [2, 16], strides = [1, 1]} : vector<2x48xf32> to vector<2x16xf32>
    %885 = vector.extract_strided_slice %882 {offsets = [0, 0], sizes = [2, 16], strides = [1, 1]} : vector<2x48xf32> to vector<2x16xf32>
    %886 = arith.addf %884, %885 : vector<2x16xf32>
    %887 = arith.negf %886 : vector<2x16xf32>
    %888 = math.exp %887 : vector<2x16xf32>
    %cst_120 = arith.constant 1.000000e+00 : f32
    %889 = vector.broadcast %cst_120 : f32 to vector<2x16xf32>
    %890 = arith.addf %889, %888 : vector<2x16xf32>
    %891 = arith.divf %889, %890 : vector<2x16xf32>
    %892 = vector.extract_strided_slice %853 {offsets = [0, 16], sizes = [2, 16], strides = [1, 1]} : vector<2x48xf32> to vector<2x16xf32>
    %893 = vector.extract_strided_slice %882 {offsets = [0, 16], sizes = [2, 16], strides = [1, 1]} : vector<2x48xf32> to vector<2x16xf32>
    %894 = arith.addf %892, %893 : vector<2x16xf32>
    %895 = arith.negf %894 : vector<2x16xf32>
    %896 = math.exp %895 : vector<2x16xf32>
    %cst_121 = arith.constant 1.000000e+00 : f32
    %897 = vector.broadcast %cst_121 : f32 to vector<2x16xf32>
    %898 = arith.addf %897, %896 : vector<2x16xf32>
    %899 = arith.divf %897, %898 : vector<2x16xf32>
    %900 = vector.extract_strided_slice %853 {offsets = [0, 32], sizes = [2, 16], strides = [1, 1]} : vector<2x48xf32> to vector<2x16xf32>
    %901 = vector.extract_strided_slice %882 {offsets = [0, 32], sizes = [2, 16], strides = [1, 1]} : vector<2x48xf32> to vector<2x16xf32>
    %902 = arith.mulf %891, %901 : vector<2x16xf32>
    %903 = arith.addf %900, %902 : vector<2x16xf32>
    %904 = math.tanh %903 : vector<2x16xf32>
    %cst_122 = arith.constant 1.000000e+00 : f32
    %905 = vector.broadcast %cst_122 : f32 to vector<2x16xf32>
    %906 = arith.subf %905, %899 : vector<2x16xf32>
    %907 = arith.mulf %906, %904 : vector<2x16xf32>
    %908 = arith.mulf %899, %883 : vector<2x16xf32>
    %909 = arith.addf %907, %908 : vector<2x16xf32>
    %910 = tpu.concatenate %881, %909 in 1 : vector<2x16xf32>, vector<2x16xf32> -> vector<2x32xf32>
    %cst_123 = arith.constant dense<0.000000e+00> : vector<2x96xf32>
    %911 = tpu.matmul %910, %533, %cst_123 {dimension_numbers = #tpu.dot_dimension_numbers<[1], [0], [0], [1], [0, 0, 1, 1], [], []>} : vector<2x32xf32>, vector<32x96xf32>, vector<2x96xf32> -> vector<2x96xf32>
    %912 = vector.broadcast %534 : vector<1x96xf32> to vector<2x96xf32>
    %913 = arith.addf %911, %912 : vector<2x96xf32>
    %914 = vector.extract_strided_slice %537 {offsets = [12, 0], sizes = [2, 48], strides = [1, 1]} : vector<16x96xf32> to vector<2x48xf32>
    %915 = vector.extract_strided_slice %537 {offsets = [2, 48], sizes = [2, 48], strides = [1, 1]} : vector<16x96xf32> to vector<2x48xf32>
    %916 = vector.extract_strided_slice %913 {offsets = [0, 0], sizes = [2, 48], strides = [1, 1]} : vector<2x96xf32> to vector<2x48xf32>
    %917 = vector.extract_strided_slice %910 {offsets = [0, 0], sizes = [2, 16], strides = [1, 1]} : vector<2x32xf32> to vector<2x16xf32>
    %918 = vector.extract_strided_slice %914 {offsets = [0, 0], sizes = [2, 16], strides = [1, 1]} : vector<2x48xf32> to vector<2x16xf32>
    %919 = vector.extract_strided_slice %916 {offsets = [0, 0], sizes = [2, 16], strides = [1, 1]} : vector<2x48xf32> to vector<2x16xf32>
    %920 = arith.addf %918, %919 : vector<2x16xf32>
    %921 = arith.negf %920 : vector<2x16xf32>
    %922 = math.exp %921 : vector<2x16xf32>
    %cst_124 = arith.constant 1.000000e+00 : f32
    %923 = vector.broadcast %cst_124 : f32 to vector<2x16xf32>
    %924 = arith.addf %923, %922 : vector<2x16xf32>
    %925 = arith.divf %923, %924 : vector<2x16xf32>
    %926 = vector.extract_strided_slice %914 {offsets = [0, 16], sizes = [2, 16], strides = [1, 1]} : vector<2x48xf32> to vector<2x16xf32>
    %927 = vector.extract_strided_slice %916 {offsets = [0, 16], sizes = [2, 16], strides = [1, 1]} : vector<2x48xf32> to vector<2x16xf32>
    %928 = arith.addf %926, %927 : vector<2x16xf32>
    %929 = arith.negf %928 : vector<2x16xf32>
    %930 = math.exp %929 : vector<2x16xf32>
    %cst_125 = arith.constant 1.000000e+00 : f32
    %931 = vector.broadcast %cst_125 : f32 to vector<2x16xf32>
    %932 = arith.addf %931, %930 : vector<2x16xf32>
    %933 = arith.divf %931, %932 : vector<2x16xf32>
    %934 = vector.extract_strided_slice %914 {offsets = [0, 32], sizes = [2, 16], strides = [1, 1]} : vector<2x48xf32> to vector<2x16xf32>
    %935 = vector.extract_strided_slice %916 {offsets = [0, 32], sizes = [2, 16], strides = [1, 1]} : vector<2x48xf32> to vector<2x16xf32>
    %936 = arith.mulf %925, %935 : vector<2x16xf32>
    %937 = arith.addf %934, %936 : vector<2x16xf32>
    %938 = math.tanh %937 : vector<2x16xf32>
    %cst_126 = arith.constant 1.000000e+00 : f32
    %939 = vector.broadcast %cst_126 : f32 to vector<2x16xf32>
    %940 = arith.subf %939, %933 : vector<2x16xf32>
    %941 = arith.mulf %940, %938 : vector<2x16xf32>
    %942 = arith.mulf %933, %917 : vector<2x16xf32>
    %943 = arith.addf %941, %942 : vector<2x16xf32>
    %944 = vector.extract_strided_slice %913 {offsets = [0, 48], sizes = [2, 48], strides = [1, 1]} : vector<2x96xf32> to vector<2x48xf32>
    %945 = vector.extract_strided_slice %910 {offsets = [0, 16], sizes = [2, 16], strides = [1, 1]} : vector<2x32xf32> to vector<2x16xf32>
    %946 = vector.extract_strided_slice %915 {offsets = [0, 0], sizes = [2, 16], strides = [1, 1]} : vector<2x48xf32> to vector<2x16xf32>
    %947 = vector.extract_strided_slice %944 {offsets = [0, 0], sizes = [2, 16], strides = [1, 1]} : vector<2x48xf32> to vector<2x16xf32>
    %948 = arith.addf %946, %947 : vector<2x16xf32>
    %949 = arith.negf %948 : vector<2x16xf32>
    %950 = math.exp %949 : vector<2x16xf32>
    %cst_127 = arith.constant 1.000000e+00 : f32
    %951 = vector.broadcast %cst_127 : f32 to vector<2x16xf32>
    %952 = arith.addf %951, %950 : vector<2x16xf32>
    %953 = arith.divf %951, %952 : vector<2x16xf32>
    %954 = vector.extract_strided_slice %915 {offsets = [0, 16], sizes = [2, 16], strides = [1, 1]} : vector<2x48xf32> to vector<2x16xf32>
    %955 = vector.extract_strided_slice %944 {offsets = [0, 16], sizes = [2, 16], strides = [1, 1]} : vector<2x48xf32> to vector<2x16xf32>
    %956 = arith.addf %954, %955 : vector<2x16xf32>
    %957 = arith.negf %956 : vector<2x16xf32>
    %958 = math.exp %957 : vector<2x16xf32>
    %cst_128 = arith.constant 1.000000e+00 : f32
    %959 = vector.broadcast %cst_128 : f32 to vector<2x16xf32>
    %960 = arith.addf %959, %958 : vector<2x16xf32>
    %961 = arith.divf %959, %960 : vector<2x16xf32>
    %962 = vector.extract_strided_slice %915 {offsets = [0, 32], sizes = [2, 16], strides = [1, 1]} : vector<2x48xf32> to vector<2x16xf32>
    %963 = vector.extract_strided_slice %944 {offsets = [0, 32], sizes = [2, 16], strides = [1, 1]} : vector<2x48xf32> to vector<2x16xf32>
    %964 = arith.mulf %953, %963 : vector<2x16xf32>
    %965 = arith.addf %962, %964 : vector<2x16xf32>
    %966 = math.tanh %965 : vector<2x16xf32>
    %cst_129 = arith.constant 1.000000e+00 : f32
    %967 = vector.broadcast %cst_129 : f32 to vector<2x16xf32>
    %968 = arith.subf %967, %961 : vector<2x16xf32>
    %969 = arith.mulf %968, %966 : vector<2x16xf32>
    %970 = arith.mulf %961, %945 : vector<2x16xf32>
    %971 = arith.addf %969, %970 : vector<2x16xf32>
    %972 = tpu.concatenate %943, %971 in 1 : vector<2x16xf32>, vector<2x16xf32> -> vector<2x32xf32>
    %cst_130 = arith.constant dense<0.000000e+00> : vector<2x96xf32>
    %973 = tpu.matmul %972, %533, %cst_130 {dimension_numbers = #tpu.dot_dimension_numbers<[1], [0], [0], [1], [0, 0, 1, 1], [], []>} : vector<2x32xf32>, vector<32x96xf32>, vector<2x96xf32> -> vector<2x96xf32>
    %974 = vector.broadcast %534 : vector<1x96xf32> to vector<2x96xf32>
    %975 = arith.addf %973, %974 : vector<2x96xf32>
    %976 = vector.extract_strided_slice %537 {offsets = [14, 0], sizes = [2, 48], strides = [1, 1]} : vector<16x96xf32> to vector<2x48xf32>
    %977 = vector.extract_strided_slice %537 {offsets = [0, 48], sizes = [2, 48], strides = [1, 1]} : vector<16x96xf32> to vector<2x48xf32>
    %978 = vector.extract_strided_slice %975 {offsets = [0, 0], sizes = [2, 48], strides = [1, 1]} : vector<2x96xf32> to vector<2x48xf32>
    %979 = vector.extract_strided_slice %972 {offsets = [0, 0], sizes = [2, 16], strides = [1, 1]} : vector<2x32xf32> to vector<2x16xf32>
    %980 = vector.extract_strided_slice %976 {offsets = [0, 0], sizes = [2, 16], strides = [1, 1]} : vector<2x48xf32> to vector<2x16xf32>
    %981 = vector.extract_strided_slice %978 {offsets = [0, 0], sizes = [2, 16], strides = [1, 1]} : vector<2x48xf32> to vector<2x16xf32>
    %982 = arith.addf %980, %981 : vector<2x16xf32>
    %983 = arith.negf %982 : vector<2x16xf32>
    %984 = math.exp %983 : vector<2x16xf32>
    %cst_131 = arith.constant 1.000000e+00 : f32
    %985 = vector.broadcast %cst_131 : f32 to vector<2x16xf32>
    %986 = arith.addf %985, %984 : vector<2x16xf32>
    %987 = arith.divf %985, %986 : vector<2x16xf32>
    %988 = vector.extract_strided_slice %976 {offsets = [0, 16], sizes = [2, 16], strides = [1, 1]} : vector<2x48xf32> to vector<2x16xf32>
    %989 = vector.extract_strided_slice %978 {offsets = [0, 16], sizes = [2, 16], strides = [1, 1]} : vector<2x48xf32> to vector<2x16xf32>
    %990 = arith.addf %988, %989 : vector<2x16xf32>
    %991 = arith.negf %990 : vector<2x16xf32>
    %992 = math.exp %991 : vector<2x16xf32>
    %cst_132 = arith.constant 1.000000e+00 : f32
    %993 = vector.broadcast %cst_132 : f32 to vector<2x16xf32>
    %994 = arith.addf %993, %992 : vector<2x16xf32>
    %995 = arith.divf %993, %994 : vector<2x16xf32>
    %996 = vector.extract_strided_slice %976 {offsets = [0, 32], sizes = [2, 16], strides = [1, 1]} : vector<2x48xf32> to vector<2x16xf32>
    %997 = vector.extract_strided_slice %978 {offsets = [0, 32], sizes = [2, 16], strides = [1, 1]} : vector<2x48xf32> to vector<2x16xf32>
    %998 = arith.mulf %987, %997 : vector<2x16xf32>
    %999 = arith.addf %996, %998 : vector<2x16xf32>
    %1000 = math.tanh %999 : vector<2x16xf32>
    %cst_133 = arith.constant 1.000000e+00 : f32
    %1001 = vector.broadcast %cst_133 : f32 to vector<2x16xf32>
    %1002 = arith.subf %1001, %995 : vector<2x16xf32>
    %1003 = arith.mulf %1002, %1000 : vector<2x16xf32>
    %1004 = arith.mulf %995, %979 : vector<2x16xf32>
    %1005 = arith.addf %1003, %1004 : vector<2x16xf32>
    %1006 = vector.extract_strided_slice %975 {offsets = [0, 48], sizes = [2, 48], strides = [1, 1]} : vector<2x96xf32> to vector<2x48xf32>
    %1007 = vector.extract_strided_slice %972 {offsets = [0, 16], sizes = [2, 16], strides = [1, 1]} : vector<2x32xf32> to vector<2x16xf32>
    %1008 = vector.extract_strided_slice %977 {offsets = [0, 0], sizes = [2, 16], strides = [1, 1]} : vector<2x48xf32> to vector<2x16xf32>
    %1009 = vector.extract_strided_slice %1006 {offsets = [0, 0], sizes = [2, 16], strides = [1, 1]} : vector<2x48xf32> to vector<2x16xf32>
    %1010 = arith.addf %1008, %1009 : vector<2x16xf32>
    %1011 = arith.negf %1010 : vector<2x16xf32>
    %1012 = math.exp %1011 : vector<2x16xf32>
    %cst_134 = arith.constant 1.000000e+00 : f32
    %1013 = vector.broadcast %cst_134 : f32 to vector<2x16xf32>
    %1014 = arith.addf %1013, %1012 : vector<2x16xf32>
    %1015 = arith.divf %1013, %1014 : vector<2x16xf32>
    %1016 = vector.extract_strided_slice %977 {offsets = [0, 16], sizes = [2, 16], strides = [1, 1]} : vector<2x48xf32> to vector<2x16xf32>
    %1017 = vector.extract_strided_slice %1006 {offsets = [0, 16], sizes = [2, 16], strides = [1, 1]} : vector<2x48xf32> to vector<2x16xf32>
    %1018 = arith.addf %1016, %1017 : vector<2x16xf32>
    %1019 = arith.negf %1018 : vector<2x16xf32>
    %1020 = math.exp %1019 : vector<2x16xf32>
    %cst_135 = arith.constant 1.000000e+00 : f32
    %1021 = vector.broadcast %cst_135 : f32 to vector<2x16xf32>
    %1022 = arith.addf %1021, %1020 : vector<2x16xf32>
    %1023 = arith.divf %1021, %1022 : vector<2x16xf32>
    %1024 = vector.extract_strided_slice %977 {offsets = [0, 32], sizes = [2, 16], strides = [1, 1]} : vector<2x48xf32> to vector<2x16xf32>
    %1025 = vector.extract_strided_slice %1006 {offsets = [0, 32], sizes = [2, 16], strides = [1, 1]} : vector<2x48xf32> to vector<2x16xf32>
    %1026 = arith.mulf %1015, %1025 : vector<2x16xf32>
    %1027 = arith.addf %1024, %1026 : vector<2x16xf32>
    %1028 = math.tanh %1027 : vector<2x16xf32>
    %cst_136 = arith.constant 1.000000e+00 : f32
    %1029 = vector.broadcast %cst_136 : f32 to vector<2x16xf32>
    %1030 = arith.subf %1029, %1023 : vector<2x16xf32>
    %1031 = arith.mulf %1030, %1028 : vector<2x16xf32>
    %1032 = arith.mulf %1023, %1007 : vector<2x16xf32>
    %1033 = arith.addf %1031, %1032 : vector<2x16xf32>
    %1034 = tpu.concatenate %1005, %1033 in 1 : vector<2x16xf32>, vector<2x16xf32> -> vector<2x32xf32>
    %cst_137 = arith.constant dense<0.000000e+00> : vector<2xf32>
    %1035 = vector.multi_reduction <add>, %1034, %cst_137 [1] : vector<2x32xf32> to vector<2xf32>
    %1036 = vector.shape_cast %1035 : vector<2xf32> to vector<2x1xf32>
    %cst_138 = arith.constant 3.200000e+01 : f32
    %1037 = vector.broadcast %cst_138 : f32 to vector<2x1xf32>
    %1038 = arith.divf %1036, %1037 : vector<2x1xf32>
    %1039 = vector.broadcast %1038 : vector<2x1xf32> to vector<2x32xf32>
    %1040 = arith.subf %1034, %1039 : vector<2x32xf32>
    %1041 = arith.mulf %1040, %1040 : vector<2x32xf32>
    %cst_139 = arith.constant dense<0.000000e+00> : vector<2xf32>
    %1042 = vector.multi_reduction <add>, %1041, %cst_139 [1] : vector<2x32xf32> to vector<2xf32>
    %1043 = vector.shape_cast %1042 : vector<2xf32> to vector<2x1xf32>
    %cst_140 = arith.constant 3.200000e+01 : f32
    %1044 = vector.broadcast %cst_140 : f32 to vector<2x1xf32>
    %1045 = arith.divf %1043, %1044 : vector<2x1xf32>
    %1046 = vector.broadcast %1038 : vector<2x1xf32> to vector<2x32xf32>
    %1047 = arith.subf %1034, %1046 : vector<2x32xf32>
    %cst_141 = arith.constant 9.99999974E-6 : f32
    %1048 = vector.broadcast %cst_141 : f32 to vector<2x1xf32>
    %1049 = arith.addf %1045, %1048 : vector<2x1xf32>
    %1050 = math.rsqrt %1049 : vector<2x1xf32>
    %1051 = vector.broadcast %1050 : vector<2x1xf32> to vector<2x32xf32>
    %1052 = arith.mulf %1047, %1051 : vector<2x32xf32>
    %c0_142 = arith.constant 0 : index
    %c0_143 = arith.constant 0 : index
    %1053 = vector.load %arg9[%c0_142, %c0_143] : memref<1x32xf32, #tpu.memory_space<vmem>>, vector<1x32xf32>
    %1054 = vector.broadcast %1053 : vector<1x32xf32> to vector<2x32xf32>
    %1055 = arith.mulf %1052, %1054 : vector<2x32xf32>
    %c0_144 = arith.constant 0 : index
    %c0_145 = arith.constant 0 : index
    %1056 = vector.load %arg10[%c0_144, %c0_145] : memref<1x32xf32, #tpu.memory_space<vmem>>, vector<1x32xf32>
    %1057 = vector.broadcast %1056 : vector<1x32xf32> to vector<2x32xf32>
    %1058 = arith.addf %1055, %1057 : vector<2x32xf32>
    %c0_146 = arith.constant 0 : index
    %c0_147 = arith.constant 0 : index
    %1059 = vector.load %arg11[%c0_146, %c0_147] : memref<32x8xf32, #tpu.memory_space<vmem>>, vector<32x8xf32>
    %cst_148 = arith.constant dense<0.000000e+00> : vector<2x8xf32>
    %1060 = tpu.matmul %1058, %1059, %cst_148 {dimension_numbers = #tpu.dot_dimension_numbers<[1], [0], [0], [1], [0, 0, 1, 1], [], []>} : vector<2x32xf32>, vector<32x8xf32>, vector<2x8xf32> -> vector<2x8xf32>
    %c0_149 = arith.constant 0 : index
    %c0_150 = arith.constant 0 : index
    %1061 = vector.load %arg12[%c0_149, %c0_150] : memref<1x8xf32, #tpu.memory_space<vmem>>, vector<1x8xf32>
    %1062 = vector.broadcast %1061 : vector<1x8xf32> to vector<2x8xf32>
    %1063 = arith.addf %1060, %1062 : vector<2x8xf32>
    %c0_151 = arith.constant 0 : index
    %c0_152 = arith.constant 0 : index
    %1064 = vector.load %arg13[%c0_151, %c0_152] : memref<2x8xf32, #tpu.memory_space<vmem>>, vector<2x8xf32>
    tpu.vector_store %arg13[%c0_151, %c0_152], %1063 {strides = array<i32>} : memref<2x8xf32, #tpu.memory_space<vmem>>, vector<2x8xf32>,
    return
  }
}

</mosaic_0001>

<bundles_post_ra>
// kernel: seq_classifier_forward.1
= control target key start
LH: loop header
LB: loop body
LE: loop exit
PB: predicated region body
PF: predicated region fallthrough
CT: control target
= control target key end

     0   :  { %vm47_vm0 = vcmask 130048   ;;  %s3113_s0 = inlined_call_operand.vmem [shape: f32[16,16], index: 0, kind: input, shape index: {}]   ;;  %s3114_s1 = inlined_call_operand.vmem [shape: f32[16,96], index: 1, kind: input, shape index: {}]   ;;  %s3115_s2 = inlined_call_operand.vmem [shape: f32[1,96], index: 2, kind: input, shape index: {}]   ;;  %s3116_s3 = inlined_call_operand.vmem [shape: f32[32,96], index: 3, kind: input, shape index: {}]   ;;  %s3117_s4 = inlined_call_operand.vmem [shape: f32[1,96], index: 4, kind: input, shape index: {}]   ;;  %s3118_s5 = inlined_call_operand.vmem [shape: f32[32,96], index: 5, kind: input, shape index: {}]   ;;  %s3119_s6 = inlined_call_operand.vmem [shape: f32[1,96], index: 6, kind: input, shape index: {}]   ;;  %s3120_s7 = inlined_call_operand.vmem [shape: f32[32,96], index: 7, kind: input, shape index: {}]   ;;  %s3121_s8 = inlined_call_operand.vmem [shape: f32[1,96], index: 8, kind: input, shape index: {}]   ;;  %s3122_s9 = inlined_call_operand.vmem [shape: f32[1,32], index: 9, kind: input, shape index: {}]   ;;  %s3123_s10 = inlined_call_operand.vmem [shape: f32[1,32], index: 10, kind: input, shape index: {}]   ;;  %s3124_s11 = inlined_call_operand.vmem [shape: f32[32,8], index: 11, kind: input, shape index: {}]   ;;  %s3125_s12 = inlined_call_operand.vmem [shape: f32[1,8], index: 12, kind: input, shape index: {}]   ;;  %s3126_s13 = inlined_call_operand.hbm [shape: f32[2,8], index: 13, kind: output, shape index: {}]  }
   0x1   :  { %v45_v0 = vld [vmem:[%s3113_s0] sm:$0xff] }
   0x2   :  { %v48_v1 = vsel %vm47_vm0, %v45_v0, 0.0 }
   0x3   :  { %49 = vadd.xlane.f32.xlu0 %v48_v1 }
   0x4   :  { %18 = vsyncpa [#allocation3], 0  ;;  %v46_v2 = vld [vmem:[%s3113_s0 + $0x8] sm:$0xff]  ;;  %v2527_v4 = vmov 16.0   ;;  %v105_v7 = vld [vmem:[%s3116_s3 + $0x18] sm:$0xff]  ;;  %v2528_v13 = vmov 0.0  }
   0x5   :  { %v51_v3 = vsel %vm47_vm0, %v46_v2, 0.0  ;;  %2297 = vrcp.f32 %v2527_v4  ;;  %v104_v8 = vld [vmem:[%s3116_s3 + $0x10] sm:$0xff]  ;;  %158 = vmatpush.msra.mxu1 %v105_v7  ;;  %270 = vmatpush.msra.mxu2 %v105_v7  ;;  %v103_v10 = vld [vmem:[%s3116_s3 + $0x8] sm:$0xff]  ;;  %v102_v11 = vld [vmem:[%s3116_s3] sm:$0xff]  ;;  %s2529_s24 = smov 96   ;;  %s2531_s26 = smov 112  }
   0x6   :  { %393 = vmatpush.msra.mxu3 %v105_v7  ;;  %v100_v26 = vld [vmem:[%s3114_s1 + $0x8] sm:$0xff]  ;;  %v99_v27 = vld [vmem:[%s3114_s1] sm:$0xff]  ;;  %s2532_s27 = smov 80   ;;  %s2533_s28 = smov 48  }
   0x7   :  { %159 = vmatpush.msra.mxu1 %v104_v8  ;;  %271 = vmatpush.msra.mxu2 %v104_v8  ;;  %v2639_v30 = vld [vmem:[%s3117_s4] ss:$0 sm:$0xff]  ;;  %s2534_s29 = smov 16   ;;  %s2536_s20 = smov [#allocation2]  }
   0x8   :  { %394 = vmatpush.msra.mxu3 %v104_v8  ;;  %130 = vmatpush.msra.mxu0 %v100_v26  ;;  %v2291_v54 = vld [vmem:[%s3115_s2] ss:$0 sm:$0xff]  ;;  %s2530_s2 = smov 32   ;;  %s2218_s21 = sshll.u32 %s2536_s20, 4  ;;  %s2219_s21 = int_to_ptr.vmem [resolvable:$true] %s2218_s21 }
   0x9   :  { %160 = vmatpush.msra.mxu1 %v103_v10  ;;  %272 = vmatpush.msra.mxu2 %v103_v10  ;;  %s2220_s23 = sshll.u32 %s3126_s13, 4  ;;  %s2221_s23 = int_to_ptr.hbm [resolvable:$true] %s2220_s23 }
   0xa   :  { %395 = vmatpush.msra.mxu3 %v103_v10  ;;  %131 = vmatpush.msra.mxu0 %v99_v27 }
   0xb   :  { %52 = vadd.xlane.f32.xlu0 %v51_v3  ;;  %v2298_v5 = vpop.eup %2297  ;;  %161 = vmatpush.msra.mxu1 %v102_v11 }
   0xc   :  { %v55_v6 = vmul.f32 16.0, %v2298_v5  ;;  %273 = vmatpush.msra.mxu2 %v102_v11  ;;  %162 = vmatmul.f32.vlgmr.msra.gmra.mxu1 %v2528_v13  ;;  %vm59_vm1 = vweird.f32 %v2298_v5 }
   0xd   :  { %396 = vmatpush.msra.mxu3 %v102_v11  ;;  %515 = vmatpush.msrb.mxu1 %v105_v7 }
   0xe   :  { %v56_v9 = vsub.f32 1.0, %v55_v6  ;;  %635 = vmatpush.msrb.mxu2 %v105_v7  ;;  %876 = vmatpush.msrb.mxu0 %v105_v7 }
   0xf   :  { %753 = vmatpush.msrb.mxu3 %v105_v7  ;;  %516 = vmatpush.msrb.mxu1 %v104_v8 }
  0x10   :  { %v57_v12 = vmul.f32 %v2298_v5, %v56_v9  ;;  %636 = vmatpush.msrb.mxu2 %v104_v8  ;;  %877 = vmatpush.msrb.mxu0 %v104_v8 }
  0x11   :  { %754 = vmatpush.msrb.mxu3 %v104_v8  ;;  %517 = vmatpush.msrb.mxu1 %v103_v10 }
  0x12   :  { %v58_v14 = vadd.f32 %v2298_v5, %v57_v12  ;;  %637 = vmatpush.msrb.mxu2 %v103_v10  ;;  %878 = vmatpush.msrb.mxu0 %v103_v10 }
  0x13   :  { %755 = vmatpush.msrb.mxu3 %v103_v10  ;;  %518 = vmatpush.msrb.mxu1 %v102_v11 }
  0x14   :  { %v60_v15 = vsel %vm59_vm1, %v2298_v5, %v58_v14  ;;  %638 = vmatpush.msrb.mxu2 %v102_v11  ;;  %879 = vmatpush.msrb.mxu0 %v102_v11  ;;  %vm142_vm1 = vcmask 261120  }
  0x15   :  { %756 = vmatpush.msrb.mxu3 %v102_v11  ;;  %998 = vmatpush.msra.mxu1 %v105_v7 }
  0x17   :  { %999 = vmatpush.msra.mxu1 %v104_v8 }
  0x19   :  { %1000 = vmatpush.msra.mxu1 %v103_v10 }
  0x1b   :  { %1001 = vmatpush.msra.mxu1 %v102_v11 }
  0x76   :  { %v50_v16 = vpop.xlane.xlu0 %49 }
  0x77   :  { %v61_v17 = vmul.f32 %v60_v15, %v50_v16 }
  0x79   :  { %v63_v18 = vsub.f32 %v45_v0, %v61_v17 }
  0x7b   :  { %v65_v19 = vmul.f32 %v63_v18, %v63_v18 }
  0x7d   :  { %v67_v20 = vsel %vm47_vm0, %v65_v19, 0.0 }
  0x7e   :  { %68 = vadd.xlane.f32.xlu1 %v67_v20  ;;  %v53_v21 = vpop.xlane.xlu0 %52 }
  0x7f   :  { %v62_v22 = vmul.f32 %v60_v15, %v53_v21 }
  0x81   :  { %v64_v23 = vsub.f32 %v46_v2, %v62_v22 }
  0x83   :  { %v66_v24 = vmul.f32 %v64_v23, %v64_v23 }
  0x85   :  { %v70_v25 = vsel %vm47_vm0, %v66_v24, 0.0 }
  0x86   :  { %71 = vadd.xlane.f32.xlu1 %v70_v25 }
  0x89   :  { %v163_v31 = vpop.f32.mrf.mxu1 }
  0x8a   :  { %v164_v33 = vadd.f32 %v2639_v30, %v163_v31 }
  0x8c   :  { %v205_v34 = vrot.slane %v164_v33, 2 }
  0x8e   :  { %227 = vrot.lane.b32.xlu2 %v205_v34, %s2529_s24 }
  0x96   :  { %187 = vrot.lane.b32.xlu2 %v164_v33, %s2529_s24 }
  0xe8   :  { %v228_v1 = vpop.permute.xlu2 %227 }
  0xf0   :  { %v188_v12 = vpop.permute.xlu2 %187 }
  0xf1   :  { %v69_v28 = vpop.xlane.xlu1 %68 }
  0xf2   :  { %v73_v29 = vmul.f32 %v69_v28, %v60_v15 }
  0xf4   :  { %v75_v32 = vadd.f32 1e-05, %v73_v29 }
  0xf6   :  { %2299 = vrsqrt.f32 %v75_v32  ;;  %vm83_vm3 = vweird.f32 %v75_v32 }
  0xf9   :  { %v72_v35 = vpop.xlane.xlu1 %71 }
  0xfa   :  { %v74_v36 = vmul.f32 %v72_v35, %v60_v15 }
  0xfc   :  { %v2300_v37 = vpop.eup %2299  ;;  %v76_v38 = vadd.f32 1e-05, %v74_v36 }
  0xfd   :  { %v78_v39 = vmul.f32 %v2300_v37, %v75_v32  ;;  %vm84_vm2 = vweird.f32 %v2300_v37 }
  0xfe   :  { %2301 = vrsqrt.f32 %v76_v38  ;;  %vm85_vm4 = vmor %vm83_vm3, %vm84_vm2  ;;  %vm93_vm6 = vweird.f32 %v76_v38 }
  0xff   :  { %v79_v40 = vmul.f32 %v2300_v37, %v78_v39 }
 0x101   :  { %v80_v41 = vmul.f32 0.5, %v79_v40 }
 0x103   :  { %v81_v42 = vsub.f32 1.5, %v80_v41 }
 0x104   :  { %v2302_v43 = vpop.eup %2301 }
 0x105   :  { %v88_v44 = vmul.f32 %v2302_v43, %v76_v38  ;;  %v82_v45 = vmul.f32 %v2300_v37, %v81_v42  ;;  %vm94_vm5 = vweird.f32 %v2302_v43 }
 0x106   :  { %vm95_vm7 = vmor %vm93_vm6, %vm94_vm5 }
 0x107   :  { %v89_v46 = vmul.f32 %v2302_v43, %v88_v44  ;;  %v86_v47 = vsel %vm85_vm4, %v2300_v37, %v82_v45 }
 0x108   :  { %v97_v48 = vmul.f32 %v86_v47, %v63_v18 }
 0x109   :  { %v90_v49 = vmul.f32 0.5, %v89_v46 }
 0x10a   :  { %2229 = vmatmul.msk.f32.vlgmr.msra.gmra.mxu0 %vm47_vm0, %v97_v48 }
 0x10b   :  { %v91_v50 = vsub.f32 1.5, %v90_v49 }
 0x10d   :  { %v92_v51 = vmul.f32 %v2302_v43, %v91_v50 }
 0x10f   :  { %v96_v52 = vsel %vm95_vm7, %v2302_v43, %v92_v51 }
 0x110   :  { %v98_v53 = vmul.f32 %v96_v52, %v64_v23 }
 0x112   :  { %2230 = vmatmul.msk.f32.gmra.mxu0 %vm47_vm0, %v98_v53 }
 0x187   :  { %v133_v55 = vpop.f32.mrf.mxu0 }
 0x188   :  { %v2649_v56 = vadd.f32 %v2291_v54, %v133_v55 }
 0x18a   :  { %v166_v57 = vadd.f32 %v164_v33, %v2649_v56 }
 0x18c   :  { %v2231_v58 = vmul.f32 -1.442695, %v166_v57 }
 0x18e   :  { %2303 = vpow2.f32 %v2231_v58 }
 0x18f   :  { %v136_v59 = vpop.f32.mrf.mxu0 }
 0x190   :  { %v2652_v60 = vadd.f32 %v2291_v54, %v136_v59 }
 0x192   :  { %v207_v61 = vadd.f32 %v205_v34, %v2652_v60 }
 0x194   :  { %v2304_v62 = vpop.eup %2303  ;;  %v2232_v63 = vmul.f32 -1.442695, %v207_v61 }
 0x195   :  { %v170_v0 = vadd.f32 1.0, %v2304_v62 }
 0x196   :  { %2305 = vpow2.f32 %v2232_v63 }
 0x197   :  { %2307 = vrcp.f32 %v170_v0  ;;  %v182_v7 = vand.u32 2147483648, %v170_v0  ;;  %v180_v9 = vand.u32 2147483647, %v170_v0  ;;  %vm176_vm9 = vweird.f32 %v170_v0 }
 0x199   :  { %v183_v14 = vor.u32 1.1754944e-38, %v182_v7  ;;  %vm181_vm11 = vcmp.eq.f32.partialorder %v180_v9, 8.507059e+37 }
 0x19c   :  { %v2306_v2 = vpop.eup %2305 }
 0x19d   :  { %v2308_v3 = vpop.eup %2307  ;;  %v211_v4 = vadd.f32 1.0, %v2306_v2 }
 0x19e   :  { %v172_v5 = vmul.f32 %v2308_v3, %v170_v0  ;;  %vm177_vm8 = vweird.f32 %v2308_v3 }
 0x19f   :  { %2309 = vrcp.f32 %v211_v4  ;;  %vm178_vm10 = vmor %vm176_vm9, %vm177_vm8  ;;  %v223_v20 = vand.u32 2147483648, %v211_v4  ;;  %v221_v22 = vand.u32 2147483647, %v211_v4  ;;  %vm217_vm13 = vweird.f32 %v211_v4 }
 0x1a0   :  { %v173_v6 = vsub.f32 1.0, %v172_v5 }
 0x1a1   :  { %v224_v24 = vor.u32 1.1754944e-38, %v223_v20  ;;  %vm222_vm15 = vcmp.eq.f32.partialorder %v221_v22, 8.507059e+37 }
 0x1a2   :  { %v174_v8 = vmul.f32 %v2308_v3, %v173_v6 }
 0x1a4   :  { %v175_v10 = vadd.f32 %v2308_v3, %v174_v8 }
 0x1a5   :  { %v2310_v11 = vpop.eup %2309 }
 0x1a6   :  { %v213_v15 = vmul.f32 %v2310_v11, %v211_v4  ;;  %v179_v16 = vsel %vm178_vm10, %v2308_v3, %v175_v10  ;;  %vm218_vm12 = vweird.f32 %v2310_v11 }
 0x1a7   :  { %v184_v17 = vsel %vm181_vm11, %v183_v14, %v179_v16  ;;  %vm219_vm14 = vmor %vm217_vm13, %vm218_vm12 }
 0x1a8   :  { %v214_v18 = vsub.f32 1.0, %v213_v15  ;;  %v190_v19 = vmul.f32 %v188_v12, %v184_v17  ;;  %v197_v41 = vsub.f32 1.0, %v184_v17  ;;  %v203_v43 = vmul.f32 0.0, %v184_v17 }
 0x1aa   :  { %v215_v21 = vmul.f32 %v2310_v11, %v214_v18  ;;  %192 = vrot.lane.b32.xlu1 %v190_v19, %s2530_s2 }
 0x1ac   :  { %v216_v23 = vadd.f32 %v2310_v11, %v215_v21 }
 0x1ae   :  { %v220_v25 = vsel %vm219_vm14, %v2310_v11, %v216_v23 }
 0x1af   :  { %v225_v26 = vsel %vm222_vm15, %v224_v24, %v220_v25 }
 0x1b0   :  { %v230_v27 = vmul.f32 %v228_v1, %v225_v26  ;;  %v237_v35 = vsub.f32 1.0, %v225_v26  ;;  %v243_v37 = vmul.f32 0.0, %v225_v26 }
 0x1b2   :  { %232 = vrot.lane.b32.xlu0 %v230_v27, %s2530_s2 }
 0x21c   :  { %v193_v31 = vpop.permute.xlu1 %192 }
 0x21d   :  { %v195_v32 = vadd.f32 %v193_v31, %v2649_v56 }
 0x224   :  { %v233_v28 = vpop.permute.xlu0 %232 }
 0x225   :  { %v235_v29 = vadd.f32 %v233_v28, %v2652_v60 }
 0x227   :  { %2311 = vtanh.f32 %v235_v29 }
 0x228   :  { %2313 = vtanh.f32 %v195_v32 }
 0x22d   :  { %v2312_v33 = vpop.eup %2311 }
 0x22e   :  { %239 = vrot.lane.b32.xlu2 %v2312_v33, %s2531_s26  ;;  %v2314_v34 = vpop.eup %2313 }
 0x236   :  { %199 = vrot.lane.b32.xlu2 %v2314_v34, %s2531_s26 }
 0x288   :  { %v240_v36 = vpop.permute.xlu2 %239 }
 0x289   :  { %v242_v38 = vmul.f32 %v240_v36, %v237_v35 }
 0x28b   :  { %v2661_v39 = vadd.f32 %v243_v37, %v242_v38 }
 0x28d   :  { %v250_v40 = vrot.slane %v2661_v39, 6 }
 0x28f   :  { %251 = vrot.lane.b32.xlu0 %v250_v40, %s2532_s27 }
 0x290   :  { %v200_v42 = vpop.permute.xlu2 %199 }
 0x291   :  { %v202_v44 = vmul.f32 %v200_v42, %v197_v41 }
 0x293   :  { %v204_v45 = vadd.f32 %v203_v43, %v202_v44 }
 0x295   :  { %246 = vrot.lane.b32.xlu2 %v204_v45, %s2531_s26 }
 0x2ef   :  { %v2666_v46 = vpop.permute.xlu2 %246 }
 0x301   :  { %v252_v47 = vpop.permute.xlu0 %251 }
 0x302   :  { %v2670_v48 = vsel %vm47_vm0, %v2666_v46, %v252_v47 }
 0x303   :  { %2233 = vmatmul.msk.f32.vlgmr.msra.gmra.mxu2 %vm142_vm1, %v2670_v48  ;;  %v361_v14 = vrot.slane %v2670_v48, 4  ;;  %v317_v32 = vrot.slane %v2670_v48, 6 }
 0x386   :  { %v275_v49 = vpop.f32.mrf.mxu2 }
 0x387   :  { %v276_v50 = vadd.f32 %v2639_v30, %v275_v49 }
 0x389   :  { %v279_v51 = vrot.slane %v276_v50, 6  ;;  %v323_v52 = vrot.slane %v276_v50, 4 }
 0x38b   :  { %345 = vrot.lane.b32.xlu2 %v323_v52, %s2529_s24  ;;  %301 = vrot.lane.b32.xlu1 %v279_v51, %s2529_s24  ;;  %v325_v53 = vadd.f32 %v323_v52, %v2652_v60  ;;  %v281_v58 = vadd.f32 %v279_v51, %v2649_v56 }
 0x38d   :  { %v2235_v54 = vmul.f32 -1.442695, %v325_v53  ;;  %v2234_v61 = vmul.f32 -1.442695, %v281_v58 }
 0x38f   :  { %2315 = vpow2.f32 %v2235_v54 }
 0x395   :  { %v2316_v55 = vpop.eup %2315 }
 0x396   :  { %v329_v57 = vadd.f32 1.0, %v2316_v55 }
 0x398   :  { %2317 = vrcp.f32 %v329_v57  ;;  %v341_v4 = vand.u32 2147483648, %v329_v57  ;;  %vm335_vm3 = vweird.f32 %v329_v57  ;;  %v339_v5 = vand.u32 2147483647, %v329_v57 }
 0x399   :  { %2319 = vpow2.f32 %v2234_v61 }
 0x39a   :  { %v342_v7 = vor.u32 1.1754944e-38, %v341_v4  ;;  %vm340_vm5 = vcmp.eq.f32.partialorder %v339_v5, 8.507059e+37 }
 0x39e   :  { %v2318_v59 = vpop.eup %2317 }
 0x39f   :  { %v331_v62 = vmul.f32 %v2318_v59, %v329_v57  ;;  %v2320_v0 = vpop.eup %2319  ;;  %vm336_vm2 = vweird.f32 %v2318_v59 }
 0x3a0   :  { %v285_v2 = vadd.f32 1.0, %v2320_v0  ;;  %vm337_vm4 = vmor %vm335_vm3, %vm336_vm2 }
 0x3a1   :  { %v332_v63 = vsub.f32 1.0, %v331_v62 }
 0x3a2   :  { %2321 = vrcp.f32 %v285_v2  ;;  %v297_v18 = vand.u32 2147483648, %v285_v2  ;;  %vm291_vm7 = vweird.f32 %v285_v2  ;;  %v295_v19 = vand.u32 2147483647, %v285_v2 }
 0x3a3   :  { %v333_v1 = vmul.f32 %v2318_v59, %v332_v63 }
 0x3a4   :  { %v298_v21 = vor.u32 1.1754944e-38, %v297_v18  ;;  %vm296_vm9 = vcmp.eq.f32.partialorder %v295_v19, 8.507059e+37 }
 0x3a5   :  { %v334_v3 = vadd.f32 %v2318_v59, %v333_v1 }
 0x3a7   :  { %v338_v6 = vsel %vm337_vm4, %v2318_v59, %v334_v3 }
 0x3a8   :  { %v343_v9 = vsel %vm340_vm5, %v342_v7, %v338_v6  ;;  %v2322_v11 = vpop.eup %2321 }
 0x3a9   :  { %v287_v12 = vmul.f32 %v2322_v11, %v285_v2  ;;  %vm292_vm6 = vweird.f32 %v2322_v11  ;;  %v355_v34 = vsub.f32 1.0, %v343_v9 }
 0x3aa   :  { %vm293_vm8 = vmor %vm291_vm7, %vm292_vm6 }
 0x3ab   :  { %v288_v15 = vsub.f32 1.0, %v287_v12 }
 0x3ad   :  { %v289_v16 = vmul.f32 %v2322_v11, %v288_v15 }
 0x3af   :  { %v290_v17 = vadd.f32 %v2322_v11, %v289_v16 }
 0x3b1   :  { %v294_v20 = vsel %vm293_vm8, %v2322_v11, %v290_v17 }
 0x3b2   :  { %v299_v23 = vsel %vm296_vm9, %v298_v21, %v294_v20 }
 0x3b3   :  { %v311_v42 = vsub.f32 1.0, %v299_v23 }
 0x3e5   :  { %v346_v8 = vpop.permute.xlu2 %345 }
 0x3e6   :  { %v348_v10 = vmul.f32 %v346_v8, %v343_v9 }
 0x3e8   :  { %350 = vrot.lane.b32.xlu0 %v348_v10, %s2530_s2 }
 0x3f0   :  { %362 = vrot.lane.b32.xlu0 %v361_v14, %s2533_s28 }
 0x3fd   :  { %v302_v22 = vpop.permute.xlu1 %301 }
 0x3fe   :  { %v304_v24 = vmul.f32 %v302_v22, %v299_v23 }
 0x400   :  { %306 = vrot.lane.b32.xlu2 %v304_v24, %s2530_s2 }
 0x45a   :  { %v351_v25 = vpop.permute.xlu0 %350  ;;  %v307_v26 = vpop.permute.xlu2 %306 }
 0x45b   :  { %v353_v27 = vadd.f32 %v351_v25, %v2652_v60  ;;  %v309_v28 = vadd.f32 %v307_v26, %v2649_v56 }
 0x45d   :  { %2323 = vtanh.f32 %v353_v27 }
 0x45e   :  { %2325 = vtanh.f32 %v309_v28 }
 0x462   :  { %v363_v33 = vpop.permute.xlu0 %362 }
 0x463   :  { %v2324_v29 = vpop.eup %2323  ;;  %v365_v36 = vmul.f32 %v363_v33, %v343_v9 }
 0x464   :  { %v2326_v31 = vpop.eup %2325  ;;  %357 = vrot.lane.b32.xlu1 %v2324_v29, %s2531_s26 }
 0x465   :  { %313 = vrot.lane.b32.xlu2 %v2326_v31, %s2531_s26 }
 0x46c   :  { %318 = vrot.lane.b32.xlu1 %v317_v32, %s2534_s29 }
 0x4bf   :  { %v314_v41 = vpop.permute.xlu2 %313 }
 0x4c0   :  { %v316_v44 = vmul.f32 %v314_v41, %v311_v42 }
 0x4d6   :  { %v358_v35 = vpop.permute.xlu1 %357 }
 0x4d7   :  { %v360_v37 = vmul.f32 %v358_v35, %v355_v34 }
 0x4d9   :  { %v2689_v38 = vadd.f32 %v365_v36, %v360_v37 }
 0x4db   :  { %v372_v40 = vrot.slane %v2689_v38, 2 }
 0x4dd   :  { %373 = vrot.lane.b32.xlu2 %v372_v40, %s2532_s27 }
 0x4de   :  { %v319_v43 = vpop.permute.xlu1 %318 }
 0x4df   :  { %v321_v45 = vmul.f32 %v319_v43, %v299_v23 }
 0x4e1   :  { %v322_v47 = vadd.f32 %v321_v45, %v316_v44 }
 0x4e3   :  { %368 = vrot.lane.b32.xlu0 %v322_v47, %s2531_s26 }
 0x537   :  { %v374_v48 = vpop.permute.xlu2 %373 }
 0x555   :  { %v2694_v49 = vpop.permute.xlu0 %368 }
 0x556   :  { %v376_v50 = vsel %vm47_vm0, %v2694_v49, %v374_v48 }
 0x557   :  { %v378_v51 = vrot.slane %v376_v50, 2  ;;  %v440_v31 = vrot.slane %v376_v50, 6 }
 0x559   :  { %2236 = vmatmul.msk.f32.vlgmr.msra.gmra.mxu3 %vm142_vm1, %v378_v51 }
 0x5dc   :  { %v398_v52 = vpop.f32.mrf.mxu3 }
 0x5dd   :  { %v399_v53 = vadd.f32 %v2639_v30, %v398_v52 }
 0x5df   :  { %v402_v54 = vrot.slane %v399_v53, 4  ;;  %v446_v55 = vrot.slane %v399_v53, 6 }
 0x5e1   :  { %468 = vrot.lane.b32.xlu1 %v446_v55, %s2529_s24  ;;  %424 = vrot.lane.b32.xlu0 %v402_v54, %s2529_s24  ;;  %v404_v57 = vadd.f32 %v402_v54, %v2649_v56  ;;  %v448_v58 = vadd.f32 %v446_v55, %v2652_v60 }
 0x5e3   :  { %v2237_v59 = vmul.f32 -1.442695, %v404_v57  ;;  %v2238_v61 = vmul.f32 -1.442695, %v448_v58 }
 0x5e5   :  { %2327 = vpow2.f32 %v2237_v59 }
 0x5e6   :  { %2329 = vpow2.f32 %v2238_v61 }
 0x5eb   :  { %v2328_v62 = vpop.eup %2327 }
 0x5ec   :  { %v2330_v63 = vpop.eup %2329  ;;  %v408_v0 = vadd.f32 1.0, %v2328_v62 }
 0x5ed   :  { %v452_v1 = vadd.f32 1.0, %v2330_v63 }
 0x5ee   :  { %2331 = vrcp.f32 %v408_v0  ;;  %vm414_vm12 = vweird.f32 %v408_v0  ;;  %v420_v14 = vand.u32 2147483648, %v408_v0  ;;  %v418_v16 = vand.u32 2147483647, %v408_v0 }
 0x5ef   :  { %2333 = vrcp.f32 %v452_v1  ;;  %v464_v12 = vand.u32 2147483648, %v452_v1  ;;  %vm458_vm13 = vweird.f32 %v452_v1  ;;  %v462_v15 = vand.u32 2147483647, %v452_v1 }
 0x5f0   :  { %v421_v20 = vor.u32 1.1754944e-38, %v420_v14  ;;  %vm419_vm3 = vcmp.eq.f32.partialorder %v418_v16, 8.507059e+37 }
 0x5f1   :  { %v465_v19 = vor.u32 1.1754944e-38, %v464_v12  ;;  %vm463_vm2 = vcmp.eq.f32.partialorder %v462_v15, 8.507059e+37 }
 0x5f4   :  { %v2332_v2 = vpop.eup %2331 }
 0x5f5   :  { %v2334_v3 = vpop.eup %2333  ;;  %v410_v5 = vmul.f32 %v2332_v2, %v408_v0  ;;  %vm415_vm10 = vweird.f32 %v2332_v2 }
 0x5f6   :  { %v454_v4 = vmul.f32 %v2334_v3, %v452_v1  ;;  %vm459_vm11 = vweird.f32 %v2334_v3  ;;  %vm416_vm14 = vmor %vm414_vm12, %vm415_vm10 }
 0x5f7   :  { %v411_v7 = vsub.f32 1.0, %v410_v5  ;;  %vm460_vm15 = vmor %vm458_vm13, %vm459_vm11 }
 0x5f8   :  { %v455_v6 = vsub.f32 1.0, %v454_v4 }
 0x5f9   :  { %v412_v9 = vmul.f32 %v2332_v2, %v411_v7 }
 0x5fa   :  { %v456_v8 = vmul.f32 %v2334_v3, %v455_v6 }
 0x5fb   :  { %v413_v11 = vadd.f32 %v2332_v2, %v412_v9 }
 0x5fc   :  { %v457_v10 = vadd.f32 %v2334_v3, %v456_v8 }
 0x5fd   :  { %v417_v18 = vsel %vm416_vm14, %v2332_v2, %v413_v11 }
 0x5fe   :  { %v461_v17 = vsel %vm460_vm15, %v2334_v3, %v457_v10  ;;  %v422_v24 = vsel %vm419_vm3, %v421_v20, %v417_v18 }
 0x5ff   :  { %v466_v22 = vsel %vm463_vm2, %v465_v19, %v461_v17  ;;  %v434_v45 = vsub.f32 1.0, %v422_v24 }
 0x600   :  { %v478_v36 = vsub.f32 1.0, %v466_v22 }
 0x653   :  { %v469_v21 = vpop.permute.xlu1 %468  ;;  %v425_v23 = vpop.permute.xlu0 %424 }
 0x654   :  { %v471_v25 = vmul.f32 %v469_v21, %v466_v22  ;;  %v427_v26 = vmul.f32 %v425_v23, %v422_v24 }
 0x656   :  { %473 = vrot.lane.b32.xlu2 %v471_v25, %s2530_s2  ;;  %429 = vrot.lane.b32.xlu1 %v427_v26, %s2530_s2 }
 0x65e   :  { %484 = vrot.lane.b32.xlu2 %v376_v50, %s2533_s28 }
 0x6b0   :  { %v474_v27 = vpop.permute.xlu2 %473 }
 0x6b1   :  { %v476_v28 = vadd.f32 %v474_v27, %v2652_v60 }
 0x6b3   :  { %2335 = vtanh.f32 %v476_v28 }
 0x6b8   :  { %v485_v35 = vpop.permute.xlu2 %484 }
 0x6b9   :  { %v2336_v29 = vpop.eup %2335  ;;  %v487_v40 = vmul.f32 %v485_v35, %v466_v22 }
 0x6ba   :  { %480 = vrot.lane.b32.xlu0 %v2336_v29, %s2531_s26 }
 0x6c2   :  { %441 = vrot.lane.b32.xlu0 %v440_v31, %s2534_s29 }
 0x6c8   :  { %v430_v32 = vpop.permute.xlu1 %429 }
 0x6c9   :  { %v432_v33 = vadd.f32 %v430_v32, %v2649_v56 }
 0x6cb   :  { %2337 = vtanh.f32 %v432_v33 }
 0x6d1   :  { %v2338_v34 = vpop.eup %2337 }
 0x6d2   :  { %436 = vrot.lane.b32.xlu1 %v2338_v34, %s2531_s26 }
 0x72c   :  { %v481_v37 = vpop.permute.xlu0 %480 }
 0x72d   :  { %v483_v41 = vmul.f32 %v481_v37, %v478_v36 }
 0x72f   :  { %v2712_v42 = vadd.f32 %v487_v40, %v483_v41 }
 0x731   :  { %v494_v43 = vrot.slane %v2712_v42, 6 }
 0x733   :  { %495 = vrot.lane.b32.xlu1 %v494_v43, %s2532_s27 }
 0x734   :  { %v442_v44 = vpop.permute.xlu0 %441 }
 0x735   :  { %v444_v48 = vmul.f32 %v442_v44, %v422_v24 }
 0x744   :  { %v437_v47 = vpop.permute.xlu1 %436 }
 0x745   :  { %v439_v50 = vmul.f32 %v437_v47, %v434_v45 }
 0x747   :  { %v445_v51 = vadd.f32 %v444_v48, %v439_v50 }
 0x749   :  { %490 = vrot.lane.b32.xlu2 %v445_v51, %s2531_s26 }
 0x7a3   :  { %v2717_v52 = vpop.permute.xlu2 %490 }
 0x7a5   :  { %v496_v53 = vpop.permute.xlu1 %495 }
 0x7a6   :  { %v2721_v54 = vsel %vm47_vm0, %v2717_v52, %v496_v53 }
 0x7a7   :  { %v500_v55 = vrot.slane %v2721_v54, 4  ;;  %v562_v37 = vrot.slane %v2721_v54, 6 }
 0x7a9   :  { %2239 = vmatmul.msk.f32.vlgmr.msrb.gmra.mxu1 %vm142_vm1, %v500_v55 }
 0x826   :  { %v520_v57 = vpop.f32.mrf.mxu1 }
 0x827   :  { %v521_v58 = vadd.f32 %v2639_v30, %v520_v57 }
 0x829   :  { %588 = vrot.lane.b32.xlu0 %v521_v58, %s2529_s24  ;;  %v524_v59 = vrot.slane %v521_v58, 2  ;;  %v568_v1 = vadd.f32 %v521_v58, %v2652_v60 }
 0x82b   :  { %546 = vrot.lane.b32.xlu2 %v524_v59, %s2529_s24  ;;  %v526_v61 = vadd.f32 %v524_v59, %v2649_v56  ;;  %v2241_v2 = vmul.f32 -1.442695, %v568_v1 }
 0x82d   :  { %v2240_v62 = vmul.f32 -1.442695, %v526_v61 }
 0x82f   :  { %2339 = vpow2.f32 %v2240_v62 }
 0x835   :  { %v2340_v63 = vpop.eup %2339 }
 0x836   :  { %v530_v0 = vadd.f32 1.0, %v2340_v63 }
 0x838   :  { %2341 = vrcp.f32 %v530_v0  ;;  %v542_v10 = vand.u32 2147483648, %v530_v0  ;;  %vm536_vm5 = vweird.f32 %v530_v0  ;;  %v540_v11 = vand.u32 2147483647, %v530_v0 }
 0x839   :  { %2343 = vpow2.f32 %v2241_v2 }
 0x83a   :  { %v543_v14 = vor.u32 1.1754944e-38, %v542_v10  ;;  %vm541_vm7 = vcmp.eq.f32.partialorder %v540_v11, 8.507059e+37 }
 0x83e   :  { %v2342_v3 = vpop.eup %2341 }
 0x83f   :  { %v532_v4 = vmul.f32 %v2342_v3, %v530_v0  ;;  %v2344_v6 = vpop.eup %2343  ;;  %vm537_vm4 = vweird.f32 %v2342_v3 }
 0x840   :  { %v572_v8 = vadd.f32 1.0, %v2344_v6  ;;  %vm538_vm6 = vmor %vm536_vm5, %vm537_vm4 }
 0x841   :  { %v533_v5 = vsub.f32 1.0, %v532_v4 }
 0x842   :  { %2345 = vrcp.f32 %v572_v8  ;;  %v584_v23 = vand.u32 2147483648, %v572_v8  ;;  %vm578_vm9 = vweird.f32 %v572_v8  ;;  %v582_v24 = vand.u32 2147483647, %v572_v8 }
 0x843   :  { %v534_v7 = vmul.f32 %v2342_v3, %v533_v5 }
 0x844   :  { %v585_v26 = vor.u32 1.1754944e-38, %v584_v23  ;;  %vm583_vm11 = vcmp.eq.f32.partialorder %v582_v24, 8.507059e+37 }
 0x845   :  { %v535_v9 = vadd.f32 %v2342_v3, %v534_v7 }
 0x847   :  { %v539_v12 = vsel %vm538_vm6, %v2342_v3, %v535_v9 }
 0x848   :  { %v2346_v15 = vpop.eup %2345  ;;  %v544_v17 = vsel %vm541_vm7, %v543_v14, %v539_v12 }
 0x849   :  { %v574_v19 = vmul.f32 %v2346_v15, %v572_v8  ;;  %vm579_vm8 = vweird.f32 %v2346_v15  ;;  %v556_v51 = vsub.f32 1.0, %v544_v17 }
 0x84a   :  { %vm580_vm10 = vmor %vm578_vm9, %vm579_vm8 }
 0x84b   :  { %v575_v20 = vsub.f32 1.0, %v574_v19 }
 0x84d   :  { %v576_v21 = vmul.f32 %v2346_v15, %v575_v20 }
 0x84f   :  { %v577_v22 = vadd.f32 %v2346_v15, %v576_v21 }
 0x851   :  { %v581_v25 = vsel %vm580_vm10, %v2346_v15, %v577_v22 }
 0x852   :  { %v586_v28 = vsel %vm583_vm11, %v585_v26, %v581_v25 }
 0x853   :  { %v598_v41 = vsub.f32 1.0, %v586_v28 }
 0x885   :  { %v547_v16 = vpop.permute.xlu2 %546 }
 0x886   :  { %v549_v18 = vmul.f32 %v547_v16, %v544_v17 }
 0x888   :  { %551 = vrot.lane.b32.xlu0 %v549_v18, %s2530_s2 }
 0x89b   :  { %v589_v27 = vpop.permute.xlu0 %588 }
 0x89c   :  { %v591_v29 = vmul.f32 %v589_v27, %v586_v28 }
 0x89e   :  { %593 = vrot.lane.b32.xlu1 %v591_v29, %s2530_s2 }
 0x8a6   :  { %604 = vrot.lane.b32.xlu1 %v500_v55, %s2533_s28 }
 0x8fa   :  { %v552_v31 = vpop.permute.xlu0 %551 }
 0x8fb   :  { %v554_v32 = vadd.f32 %v552_v31, %v2649_v56 }
 0x8fd   :  { %2347 = vtanh.f32 %v554_v32 }
 0x903   :  { %v2348_v33 = vpop.eup %2347 }
 0x904   :  { %558 = vrot.lane.b32.xlu0 %v2348_v33, %s2531_s26 }
 0x910   :  { %v594_v34 = vpop.permute.xlu1 %593 }
 0x911   :  { %v596_v35 = vadd.f32 %v594_v34, %v2652_v60 }
 0x913   :  { %2349 = vtanh.f32 %v596_v35 }
 0x918   :  { %v605_v40 = vpop.permute.xlu1 %604 }
 0x919   :  { %v2350_v36 = vpop.eup %2349  ;;  %v607_v44 = vmul.f32 %v605_v40, %v586_v28 }
 0x91a   :  { %600 = vrot.lane.b32.xlu2 %v2350_v36, %s2531_s26 }
 0x922   :  { %563 = vrot.lane.b32.xlu2 %v562_v37, %s2534_s29 }
 0x974   :  { %v601_v43 = vpop.permute.xlu2 %600 }
 0x975   :  { %v603_v45 = vmul.f32 %v601_v43, %v598_v41 }
 0x976   :  { %v559_v50 = vpop.permute.xlu0 %558 }
 0x977   :  { %v2739_v47 = vadd.f32 %v607_v44, %v603_v45  ;;  %v561_v55 = vmul.f32 %v559_v50, %v556_v51 }
 0x979   :  { %v614_v48 = vrot.slane %v2739_v47, 2 }
 0x97b   :  { %615 = vrot.lane.b32.xlu0 %v614_v48, %s2532_s27 }
 0x97c   :  { %v564_v53 = vpop.permute.xlu2 %563 }
 0x97d   :  { %v566_v57 = vmul.f32 %v564_v53, %v544_v17 }
 0x97f   :  { %v567_v58 = vadd.f32 %v566_v57, %v561_v55 }
 0x981   :  { %610 = vrot.lane.b32.xlu1 %v567_v58, %s2531_s26 }
 0x9ed   :  { %v616_v54 = vpop.permute.xlu0 %615 }
 0x9f3   :  { %v2744_v59 = vpop.permute.xlu1 %610 }
 0x9f4   :  { %v2748_v61 = vsel %vm47_vm0, %v2744_v59, %v616_v54 }
 0x9f5   :  { %v620_v62 = vrot.slane %v2748_v61, 6 }
 0x9f7   :  { %2242 = vmatmul.msk.f32.vlgmr.msrb.gmra.mxu2 %vm142_vm1, %v620_v62 }
 0xa7a   :  { %v640_v63 = vpop.f32.mrf.mxu2 }
 0xa7b   :  { %v641_v0 = vadd.f32 %v2639_v30, %v640_v63 }
 0xa7d   :  { %664 = vrot.lane.b32.xlu1 %v641_v0, %s2529_s24  ;;  %v685_v1 = vrot.slane %v641_v0, 2  ;;  %v643_v6 = vadd.f32 %v641_v0, %v2652_v60 }
 0xa7f   :  { %707 = vrot.lane.b32.xlu2 %v685_v1, %s2529_s24  ;;  %v687_v2 = vadd.f32 %v685_v1, %v2649_v56  ;;  %v2243_v7 = vmul.f32 -1.442695, %v643_v6 }
 0xa81   :  { %v2244_v3 = vmul.f32 -1.442695, %v687_v2 }
 0xa83   :  { %2351 = vpow2.f32 %v2244_v3 }
 0xa89   :  { %v2352_v4 = vpop.eup %2351 }
 0xa8a   :  { %v691_v5 = vadd.f32 1.0, %v2352_v4 }
 0xa8c   :  { %2353 = vrcp.f32 %v691_v5  ;;  %v703_v16 = vand.u32 2147483648, %v691_v5  ;;  %vm697_vm13 = vweird.f32 %v691_v5  ;;  %v701_v17 = vand.u32 2147483647, %v691_v5 }
 0xa8d   :  { %2355 = vpow2.f32 %v2243_v7 }
 0xa8e   :  { %v704_v19 = vor.u32 1.1754944e-38, %v703_v16  ;;  %vm702_vm15 = vcmp.eq.f32.partialorder %v701_v17, 8.507059e+37 }
 0xa92   :  { %v2354_v8 = vpop.eup %2353 }
 0xa93   :  { %v693_v9 = vmul.f32 %v2354_v8, %v691_v5  ;;  %v2356_v11 = vpop.eup %2355  ;;  %vm698_vm12 = vweird.f32 %v2354_v8 }
 0xa94   :  { %v647_v14 = vadd.f32 1.0, %v2356_v11  ;;  %vm699_vm14 = vmor %vm697_vm13, %vm698_vm12 }
 0xa95   :  { %v694_v10 = vsub.f32 1.0, %v693_v9 }
 0xa96   :  { %2357 = vrcp.f32 %v647_v14  ;;  %v659_v28 = vand.u32 2147483648, %v647_v14  ;;  %vm653_vm3 = vweird.f32 %v647_v14  ;;  %v657_v29 = vand.u32 2147483647, %v647_v14 }
 0xa97   :  { %v695_v12 = vmul.f32 %v2354_v8, %v694_v10 }
 0xa98   :  { %v660_v32 = vor.u32 1.1754944e-38, %v659_v28  ;;  %vm658_vm5 = vcmp.eq.f32.partialorder %v657_v29, 8.507059e+37 }
 0xa99   :  { %v696_v15 = vadd.f32 %v2354_v8, %v695_v12 }
 0xa9b   :  { %v700_v18 = vsel %vm699_vm14, %v2354_v8, %v696_v15 }
 0xa9c   :  { %v2358_v20 = vpop.eup %2357  ;;  %v705_v22 = vsel %vm702_vm15, %v704_v19, %v700_v18 }
 0xa9d   :  { %v649_v24 = vmul.f32 %v2358_v20, %v647_v14  ;;  %vm654_vm2 = vweird.f32 %v2358_v20  ;;  %v717_v48 = vsub.f32 1.0, %v705_v22 }
 0xa9e   :  { %vm655_vm4 = vmor %vm653_vm3, %vm654_vm2 }
 0xa9f   :  { %v650_v25 = vsub.f32 1.0, %v649_v24 }
 0xaa1   :  { %v651_v26 = vmul.f32 %v2358_v20, %v650_v25 }
 0xaa3   :  { %v652_v27 = vadd.f32 %v2358_v20, %v651_v26 }
 0xaa5   :  { %v656_v31 = vsel %vm655_vm4, %v2358_v20, %v652_v27 }
 0xaa6   :  { %v661_v34 = vsel %vm658_vm5, %v660_v32, %v656_v31 }
 0xaa7   :  { %v674_v54 = vsub.f32 1.0, %v661_v34 }
 0xad9   :  { %v708_v21 = vpop.permute.xlu2 %707 }
 0xada   :  { %v710_v23 = vmul.f32 %v708_v21, %v705_v22 }
 0xadc   :  { %712 = vrot.lane.b32.xlu0 %v710_v23, %s2530_s2 }
 0xae4   :  { %723 = vrot.lane.b32.xlu0 %v2748_v61, %s2533_s28 }
 0xaef   :  { %v665_v33 = vpop.permute.xlu1 %664 }
 0xaf0   :  { %v667_v35 = vmul.f32 %v665_v33, %v661_v34 }
 0xaf2   :  { %669 = vrot.lane.b32.xlu2 %v667_v35, %s2530_s2 }
 0xb4c   :  { %v670_v36 = vpop.permute.xlu2 %669 }
 0xb4d   :  { %v672_v37 = vadd.f32 %v670_v36, %v2652_v60 }
 0xb4e   :  { %v713_v40 = vpop.permute.xlu0 %712 }
 0xb4f   :  { %2359 = vtanh.f32 %v672_v37  ;;  %v715_v41 = vadd.f32 %v713_v40, %v2649_v56 }
 0xb51   :  { %2361 = vtanh.f32 %v715_v41 }
 0xb55   :  { %v2360_v43 = vpop.eup %2359 }
 0xb56   :  { %676 = vrot.lane.b32.xlu2 %v2360_v43, %s2531_s26  ;;  %v724_v45 = vpop.permute.xlu0 %723 }
 0xb57   :  { %v2362_v44 = vpop.eup %2361  ;;  %v726_v51 = vmul.f32 %v724_v45, %v705_v22 }
 0xb58   :  { %719 = vrot.lane.b32.xlu1 %v2362_v44, %s2531_s26 }
 0xb60   :  { %680 = vrot.lane.b32.xlu1 %v620_v62, %s2534_s29 }
 0xbb0   :  { %v677_v58 = vpop.permute.xlu2 %676 }
 0xbb1   :  { %v679_v0 = vmul.f32 %v677_v58, %v674_v54 }
 0xbca   :  { %v720_v50 = vpop.permute.xlu1 %719 }
 0xbcb   :  { %v722_v53 = vmul.f32 %v720_v50, %v717_v48 }
 0xbcd   :  { %v2770_v55 = vadd.f32 %v726_v51, %v722_v53 }
 0xbcf   :  { %v733_v57 = vrot.slane %v2770_v55, 6 }
 0xbd1   :  { %734 = vrot.lane.b32.xlu2 %v733_v57, %s2532_s27 }
 0xbd2   :  { %v681_v63 = vpop.permute.xlu1 %680 }
 0xbd3   :  { %v683_v1 = vmul.f32 %v681_v63, %v661_v34 }
 0xbd5   :  { %v684_v2 = vadd.f32 %v683_v1, %v679_v0 }
 0xbd7   :  { %729 = vrot.lane.b32.xlu0 %v684_v2, %s2531_s26 }
 0xc2b   :  { %v735_v61 = vpop.permute.xlu2 %734 }
 0xc49   :  { %v2775_v62 = vpop.permute.xlu0 %729 }
 0xc4a   :  { %v737_v3 = vsel %vm47_vm0, %v2775_v62, %v735_v61 }
 0xc4b   :  { %2245 = vmatmul.msk.f32.vlgmr.msrb.gmra.mxu3 %vm142_vm1, %v737_v3  ;;  %v844_v44 = vrot.slane %v737_v3, 4  ;;  %v800_v51 = vrot.slane %v737_v3, 6 }
 0xcce   :  { %v758_v4 = vpop.f32.mrf.mxu3 }
 0xccf   :  { %v759_v5 = vadd.f32 %v2639_v30, %v758_v4 }
 0xcd1   :  { %v762_v6 = vrot.slane %v759_v5, 6  ;;  %v806_v7 = vrot.slane %v759_v5, 4 }
 0xcd3   :  { %828 = vrot.lane.b32.xlu1 %v806_v7, %s2529_s24  ;;  %784 = vrot.lane.b32.xlu0 %v762_v6, %s2529_s24  ;;  %v764_v8 = vadd.f32 %v762_v6, %v2652_v60  ;;  %v808_v9 = vadd.f32 %v806_v7, %v2649_v56 }
 0xcd5   :  { %v2246_v10 = vmul.f32 -1.442695, %v764_v8  ;;  %v2247_v11 = vmul.f32 -1.442695, %v808_v9 }
 0xcd7   :  { %2363 = vpow2.f32 %v2246_v10 }
 0xcd8   :  { %2365 = vpow2.f32 %v2247_v11 }
 0xcdd   :  { %v2364_v12 = vpop.eup %2363 }
 0xcde   :  { %v2366_v14 = vpop.eup %2365  ;;  %v768_v15 = vadd.f32 1.0, %v2364_v12 }
 0xcdf   :  { %v812_v16 = vadd.f32 1.0, %v2366_v14 }
 0xce0   :  { %2367 = vrcp.f32 %v768_v15  ;;  %vm774_vm8 = vweird.f32 %v768_v15  ;;  %v780_v27 = vand.u32 2147483648, %v768_v15  ;;  %v778_v29 = vand.u32 2147483647, %v768_v15 }
 0xce1   :  { %2369 = vrcp.f32 %v812_v16  ;;  %v824_v26 = vand.u32 2147483648, %v812_v16  ;;  %vm818_vm9 = vweird.f32 %v812_v16  ;;  %v822_v28 = vand.u32 2147483647, %v812_v16 }
 0xce2   :  { %v781_v34 = vor.u32 1.1754944e-38, %v780_v27  ;;  %vm779_vm13 = vcmp.eq.f32.partialorder %v778_v29, 8.507059e+37 }
 0xce3   :  { %v825_v33 = vor.u32 1.1754944e-38, %v824_v26  ;;  %vm823_vm12 = vcmp.eq.f32.partialorder %v822_v28, 8.507059e+37 }
 0xce6   :  { %v2368_v30 = vpop.eup %2367 }
 0xce7   :  { %v2370_v17 = vpop.eup %2369  ;;  %v770_v19 = vmul.f32 %v2368_v30, %v768_v15  ;;  %vm775_vm6 = vweird.f32 %v2368_v30 }
 0xce8   :  { %v814_v18 = vmul.f32 %v2370_v17, %v812_v16  ;;  %vm819_vm7 = vweird.f32 %v2370_v17  ;;  %vm776_vm10 = vmor %vm774_vm8, %vm775_vm6  ;;  %v2809_v16 = vld [vmem:[%s3117_s4] ss:$0 sm:$0xff] }
 0xce9   :  { %v771_v21 = vsub.f32 1.0, %v770_v19  ;;  %vm820_vm11 = vmor %vm818_vm9, %vm819_vm7 }
 0xcea   :  { %v815_v20 = vsub.f32 1.0, %v814_v18 }
 0xceb   :  { %v772_v23 = vmul.f32 %v2368_v30, %v771_v21 }
 0xcec   :  { %v816_v22 = vmul.f32 %v2370_v17, %v815_v20 }
 0xced   :  { %v773_v25 = vadd.f32 %v2368_v30, %v772_v23 }
 0xcee   :  { %v817_v24 = vadd.f32 %v2370_v17, %v816_v22 }
 0xcef   :  { %v777_v32 = vsel %vm776_vm10, %v2368_v30, %v773_v25 }
 0xcf0   :  { %v821_v31 = vsel %vm820_vm11, %v2370_v17, %v817_v24  ;;  %v782_v40 = vsel %vm779_vm13, %v781_v34, %v777_v32 }
 0xcf1   :  { %v826_v36 = vsel %vm823_vm12, %v825_v33, %v821_v31  ;;  %v794_v5 = vsub.f32 1.0, %v782_v40 }
 0xcf2   :  { %v838_v63 = vsub.f32 1.0, %v826_v36 }
 0xd45   :  { %v829_v35 = vpop.permute.xlu1 %828  ;;  %v785_v37 = vpop.permute.xlu0 %784 }
 0xd46   :  { %v831_v41 = vmul.f32 %v829_v35, %v826_v36  ;;  %v787_v43 = vmul.f32 %v785_v37, %v782_v40 }
 0xd48   :  { %833 = vrot.lane.b32.xlu2 %v831_v41, %s2530_s2  ;;  %789 = vrot.lane.b32.xlu1 %v787_v43, %s2530_s2 }
 0xd50   :  { %845 = vrot.lane.b32.xlu2 %v844_v44, %s2533_s28 }
 0xda2   :  { %v834_v45 = vpop.permute.xlu2 %833 }
 0xda3   :  { %v836_v48 = vadd.f32 %v834_v45, %v2649_v56 }
 0xda5   :  { %2371 = vtanh.f32 %v836_v48 }
 0xdaa   :  { %v846_v54 = vpop.permute.xlu2 %845 }
 0xdab   :  { %v2372_v50 = vpop.eup %2371  ;;  %v848_v1 = vmul.f32 %v846_v54, %v826_v36 }
 0xdac   :  { %840 = vrot.lane.b32.xlu0 %v2372_v50, %s2531_s26 }
 0xdb4   :  { %801 = vrot.lane.b32.xlu0 %v800_v51, %s2534_s29 }
 0xdba   :  { %v790_v53 = vpop.permute.xlu1 %789 }
 0xdbb   :  { %v792_v57 = vadd.f32 %v790_v53, %v2652_v60 }
 0xdbd   :  { %2373 = vtanh.f32 %v792_v57 }
 0xdc3   :  { %v2374_v58 = vpop.eup %2373 }
 0xdc4   :  { %796 = vrot.lane.b32.xlu1 %v2374_v58, %s2531_s26 }
 0xe1e   :  { %v841_v0 = vpop.permute.xlu0 %840 }
 0xe1f   :  { %v843_v2 = vmul.f32 %v841_v0, %v838_v63 }
 0xe21   :  { %v2793_v61 = vadd.f32 %v848_v1, %v843_v2 }
 0xe23   :  { %v855_v4 = vrot.slane %v2793_v61, 2 }
 0xe25   :  { %856 = vrot.lane.b32.xlu1 %v855_v4, %s2532_s27 }
 0xe26   :  { %v802_v3 = vpop.permute.xlu0 %801 }
 0xe27   :  { %v804_v7 = vmul.f32 %v802_v3, %v782_v40 }
 0xe36   :  { %v797_v6 = vpop.permute.xlu1 %796 }
 0xe37   :  { %v799_v8 = vmul.f32 %v797_v6, %v794_v5 }
 0xe39   :  { %v805_v9 = vadd.f32 %v804_v7, %v799_v8 }
 0xe3b   :  { %851 = vrot.lane.b32.xlu2 %v805_v9, %s2531_s26 }
 0xe95   :  { %v2798_v10 = vpop.permute.xlu2 %851 }
 0xe97   :  { %v857_v11 = vpop.permute.xlu1 %856 }
 0xe98   :  { %v2802_v12 = vsel %vm47_vm0, %v2798_v10, %v857_v11 }
 0xe99   :  { %v861_v14 = vrot.slane %v2802_v12, 2  ;;  %v923_v7 = vrot.slane %v2802_v12, 6 }
 0xe9b   :  { %2248 = vmatmul.msk.f32.vlgmr.msrb.gmra.mxu0 %vm142_vm1, %v861_v14 }
 0xf18   :  { %v881_v15 = vpop.f32.mrf.mxu0 }
 0xf19   :  { %v882_v30 = vadd.f32 %v2809_v16, %v881_v15 }
 0xf1b   :  { %v885_v17 = vrot.slane %v882_v30, 4  ;;  %v929_v18 = vrot.slane %v882_v30, 6 }
 0xf1d   :  { %951 = vrot.lane.b32.xlu0 %v929_v18, %s2529_s24  ;;  %907 = vrot.lane.b32.xlu2 %v885_v17, %s2529_s24  ;;  %v887_v19 = vadd.f32 %v885_v17, %v2652_v60  ;;  %v931_v23 = vadd.f32 %v929_v18, %v2649_v56 }
 0xf1f   :  { %v2249_v20 = vmul.f32 -1.442695, %v887_v19  ;;  %v2250_v25 = vmul.f32 -1.442695, %v931_v23 }
 0xf21   :  { %2375 = vpow2.f32 %v2249_v20 }
 0xf27   :  { %v2376_v21 = vpop.eup %2375 }
 0xf28   :  { %v891_v22 = vadd.f32 1.0, %v2376_v21 }
 0xf2a   :  { %2377 = vrcp.f32 %v891_v22  ;;  %v903_v33 = vand.u32 2147483648, %v891_v22  ;;  %vm897_vm15 = vweird.f32 %v891_v22  ;;  %v901_v34 = vand.u32 2147483647, %v891_v22 }
 0xf2b   :  { %2379 = vpow2.f32 %v2250_v25 }
 0xf2c   :  { %v904_v36 = vor.u32 1.1754944e-38, %v903_v33  ;;  %vm902_vm3 = vcmp.eq.f32.partialorder %v901_v34, 8.507059e+37 }
 0xf30   :  { %v2378_v24 = vpop.eup %2377 }
 0xf31   :  { %v893_v26 = vmul.f32 %v2378_v24, %v891_v22  ;;  %v2380_v28 = vpop.eup %2379  ;;  %vm898_vm14 = vweird.f32 %v2378_v24 }
 0xf32   :  { %v935_v31 = vadd.f32 1.0, %v2380_v28  ;;  %vm899_vm2 = vmor %vm897_vm15, %vm898_vm14 }
 0xf33   :  { %v894_v27 = vsub.f32 1.0, %v893_v26 }
 0xf34   :  { %2381 = vrcp.f32 %v935_v31  ;;  %v947_v51 = vand.u32 2147483648, %v935_v31  ;;  %vm941_vm5 = vweird.f32 %v935_v31  ;;  %v945_v53 = vand.u32 2147483647, %v935_v31 }
 0xf35   :  { %v895_v29 = vmul.f32 %v2378_v24, %v894_v27 }
 0xf36   :  { %v948_v58 = vor.u32 1.1754944e-38, %v947_v51  ;;  %vm946_vm7 = vcmp.eq.f32.partialorder %v945_v53, 8.507059e+37 }
 0xf37   :  { %v896_v32 = vadd.f32 %v2378_v24, %v895_v29 }
 0xf39   :  { %v900_v35 = vsel %vm899_vm2, %v2378_v24, %v896_v32  ;;  %vm1129_vm2 = vcmask 1041408  }
 0xf3a   :  { %v905_v40 = vsel %vm902_vm3, %v904_v36, %v900_v35  ;;  %v2382_v43 = vpop.eup %2381  ;;  %vm1131_vm3 = vcmask 1043456  }
 0xf3b   :  { %v937_v44 = vmul.f32 %v2382_v43, %v935_v31  ;;  %vm942_vm4 = vweird.f32 %v2382_v43  ;;  %v917_v19 = vsub.f32 1.0, %v905_v40 }
 0xf3c   :  { %vm943_vm6 = vmor %vm941_vm5, %vm942_vm4  ;;  %vm1133_vm4 = vcmask 1045504  }
 0xf3d   :  { %v938_v45 = vsub.f32 1.0, %v937_v44 }
 0xf3f   :  { %v939_v48 = vmul.f32 %v2382_v43, %v938_v45 }
 0xf41   :  { %v940_v50 = vadd.f32 %v2382_v43, %v939_v48 }
 0xf43   :  { %v944_v57 = vsel %vm943_vm6, %v2382_v43, %v940_v50 }
 0xf44   :  { %v949_v63 = vsel %vm946_vm7, %v948_v58, %v944_v57 }
 0xf45   :  { %v961_v9 = vsub.f32 1.0, %v949_v63 }
 0xf77   :  { %v908_v37 = vpop.permute.xlu2 %907 }
 0xf78   :  { %v910_v41 = vmul.f32 %v908_v37, %v905_v40 }
 0xf7a   :  { %912 = vrot.lane.b32.xlu0 %v910_v41, %s2530_s2 }
 0xf8f   :  { %v952_v54 = vpop.permute.xlu0 %951 }
 0xf90   :  { %v954_v0 = vmul.f32 %v952_v54, %v949_v63 }
 0xf92   :  { %956 = vrot.lane.b32.xlu1 %v954_v0, %s2530_s2 }
 0xf9a   :  { %967 = vrot.lane.b32.xlu1 %v2802_v12, %s2533_s28 }
 0xfec   :  { %v913_v1 = vpop.permute.xlu0 %912 }
 0xfed   :  { %v915_v2 = vadd.f32 %v913_v1, %v2652_v60 }
 0xfef   :  { %2383 = vtanh.f32 %v915_v2 }
 0xff5   :  { %v2384_v4 = vpop.eup %2383 }
 0xff6   :  { %919 = vrot.lane.b32.xlu0 %v2384_v4, %s2531_s26 }
0x1004   :  { %v957_v3 = vpop.permute.xlu1 %956 }
0x1005   :  { %v959_v5 = vadd.f32 %v957_v3, %v2649_v56 }
0x1007   :  { %2385 = vtanh.f32 %v959_v5 }
0x100c   :  { %v968_v8 = vpop.permute.xlu1 %967 }
0x100d   :  { %v2386_v6 = vpop.eup %2385  ;;  %v970_v14 = vmul.f32 %v968_v8, %v949_v63 }
0x100e   :  { %963 = vrot.lane.b32.xlu2 %v2386_v6, %s2531_s26 }
0x1016   :  { %924 = vrot.lane.b32.xlu2 %v923_v7, %s2534_s29 }
0x1068   :  { %v964_v11 = vpop.permute.xlu2 %963  ;;  %v920_v18 = vpop.permute.xlu0 %919 }
0x1069   :  { %v966_v15 = vmul.f32 %v964_v11, %v961_v9  ;;  %v922_v21 = vmul.f32 %v920_v18, %v917_v19 }
0x106b   :  { %v2826_v30 = vadd.f32 %v970_v14, %v966_v15 }
0x106d   :  { %v977_v17 = vrot.slane %v2826_v30, 6 }
0x106f   :  { %978 = vrot.lane.b32.xlu0 %v977_v17, %s2532_s27 }
0x1070   :  { %v925_v20 = vpop.permute.xlu2 %924 }
0x1071   :  { %v927_v22 = vmul.f32 %v925_v20, %v905_v40 }
0x1073   :  { %v928_v23 = vadd.f32 %v927_v22, %v922_v21 }
0x1075   :  { %973 = vrot.lane.b32.xlu1 %v928_v23, %s2531_s26  ;;  %v1146_v23 = vld [vmem:[%s3120_s7 + $0x18] sm:$0xff] }
0x1076   :  { %1195 = vmatpush.msra.mxu3 %v1146_v23  ;;  %1307 = vmatpush.msra.mxu0 %v1146_v23 }
0x1077   :  { %1430 = vmatpush.msrb.mxu1 %v1146_v23 }
0x10e1   :  { %v979_v12 = vpop.permute.xlu0 %978 }
0x10e7   :  { %v2831_v24 = vpop.permute.xlu1 %973 }
0x10e8   :  { %v2835_v25 = vsel %vm47_vm0, %v2831_v24, %v979_v12 }
0x10e9   :  { %v983_v26 = vrot.slane %v2835_v25, 4  ;;  %v1045_v21 = vrot.slane %v2835_v25, 6 }
0x10eb   :  { %2251 = vmatmul.msk.f32.vlgmr.msra.gmra.mxu1 %vm142_vm1, %v983_v26 }
0x1168   :  { %v1003_v27 = vpop.f32.mrf.mxu1 }
0x1169   :  { %v1004_v28 = vadd.f32 %v2809_v16, %v1003_v27 }
0x116b   :  { %1071 = vrot.lane.b32.xlu2 %v1004_v28, %s2529_s24  ;;  %v1007_v29 = vrot.slane %v1004_v28, 2  ;;  %v1051_v31 = vadd.f32 %v1004_v28, %v2649_v56 }
0x116d   :  { %1029 = vrot.lane.b32.xlu1 %v1007_v29, %s2529_s24  ;;  %v2253_v32 = vmul.f32 -1.442695, %v1051_v31  ;;  %v1009_v35 = vadd.f32 %v1007_v29, %v2652_v60 }
0x116f   :  { %2387 = vpow2.f32 %v2253_v32  ;;  %v2252_v37 = vmul.f32 -1.442695, %v1009_v35  ;;  %v1139_v32 = vld [vmem:[%s3118_s5 + $0x8] sm:$0xff] }
0x1175   :  { %v2388_v33 = vpop.eup %2387 }
0x1176   :  { %v1055_v34 = vadd.f32 1.0, %v2388_v33 }
0x1178   :  { %2389 = vrcp.f32 %v1055_v34  ;;  %v1067_v48 = vand.u32 2147483648, %v1055_v34  ;;  %vm1061_vm9 = vweird.f32 %v1055_v34  ;;  %v1065_v50 = vand.u32 2147483647, %v1055_v34 }
0x1179   :  { %2391 = vpow2.f32 %v2252_v37 }
0x117a   :  { %v1068_v53 = vor.u32 1.1754944e-38, %v1067_v48  ;;  %vm1066_vm11 = vcmp.eq.f32.partialorder %v1065_v50, 8.507059e+37 }
0x117e   :  { %v2390_v36 = vpop.eup %2389 }
0x117f   :  { %v1057_v40 = vmul.f32 %v2390_v36, %v1055_v34  ;;  %v2392_v43 = vpop.eup %2391  ;;  %vm1062_vm8 = vweird.f32 %v2390_v36 }
0x1180   :  { %v1013_v45 = vadd.f32 1.0, %v2392_v43  ;;  %vm1063_vm10 = vmor %vm1061_vm9, %vm1062_vm8 }
0x1181   :  { %v1058_v41 = vsub.f32 1.0, %v1057_v40 }
0x1182   :  { %2393 = vrcp.f32 %v1013_v45  ;;  %v1025_v3 = vand.u32 2147483648, %v1013_v45  ;;  %vm1019_vm13 = vweird.f32 %v1013_v45  ;;  %v1023_v5 = vand.u32 2147483647, %v1013_v45 }
0x1183   :  { %v1059_v16 = vmul.f32 %v2390_v36, %v1058_v41 }
0x1184   :  { %v1026_v7 = vor.u32 1.1754944e-38, %v1025_v3  ;;  %vm1024_vm15 = vcmp.eq.f32.partialorder %v1023_v5, 8.507059e+37 }
0x1185   :  { %v1060_v44 = vadd.f32 %v2390_v36, %v1059_v16 }
0x1187   :  { %v1064_v51 = vsel %vm1063_vm10, %v2390_v36, %v1060_v44 }
0x1188   :  { %v1069_v58 = vsel %vm1066_vm11, %v1068_v53, %v1064_v51  ;;  %v2394_v63 = vpop.eup %2393 }
0x1189   :  { %v1015_v0 = vmul.f32 %v2394_v63, %v1013_v45  ;;  %vm1020_vm12 = vweird.f32 %v2394_v63 }
0x118a   :  { %vm1021_vm14 = vmor %vm1019_vm13, %vm1020_vm12 }
0x118b   :  { %v1016_v1 = vsub.f32 1.0, %v1015_v0 }
0x118d   :  { %v1017_v2 = vmul.f32 %v2394_v63, %v1016_v1 }
0x118f   :  { %v1018_v4 = vadd.f32 %v2394_v63, %v1017_v2 }
0x1191   :  { %v1022_v6 = vsel %vm1021_vm14, %v2394_v63, %v1018_v4 }
0x1192   :  { %v1027_v9 = vsel %vm1024_vm15, %v1026_v7, %v1022_v6 }
0x11c5   :  { %v1072_v57 = vpop.permute.xlu2 %1071 }
0x11c6   :  { %v1074_v54 = vmul.f32 %v1072_v57, %v1069_v58 }
0x11c8   :  { %1076 = vrot.lane.b32.xlu0 %v1074_v54, %s2530_s2 }
0x11d0   :  { %1087 = vrot.lane.b32.xlu0 %v983_v26, %s2533_s28  ;;  %v1039_v26 = vsub.f32 1.0, %v1027_v9 }
0x11df   :  { %v1030_v8 = vpop.permute.xlu1 %1029 }
0x11e0   :  { %v1032_v11 = vmul.f32 %v1030_v8, %v1027_v9 }
0x11e2   :  { %1034 = vrot.lane.b32.xlu2 %v1032_v11, %s2530_s2 }
0x123a   :  { %v1077_v14 = vpop.permute.xlu0 %1076 }
0x123b   :  { %v1079_v15 = vadd.f32 %v1077_v14, %v2649_v56 }
0x123c   :  { %v1035_v17 = vpop.permute.xlu2 %1034 }
0x123d   :  { %2395 = vtanh.f32 %v1079_v15  ;;  %v1037_v18 = vadd.f32 %v1035_v17, %v2652_v60  ;;  %v1081_v60 = vsub.f32 1.0, %v1069_v58 }
0x123f   :  { %2397 = vtanh.f32 %v1037_v18 }
0x1242   :  { %v1088_v56 = vpop.permute.xlu0 %1087 }
0x1243   :  { %v2396_v19 = vpop.eup %2395 }
0x1244   :  { %1083 = vrot.lane.b32.xlu1 %v2396_v19, %s2531_s26 }
0x1245   :  { %v2398_v20 = vpop.eup %2397 }
0x1246   :  { %1041 = vrot.lane.b32.xlu2 %v2398_v20, %s2531_s26 }
0x124c   :  { %1046 = vrot.lane.b32.xlu1 %v1045_v21, %s2534_s29 }
0x124e   :  { %1097 = vrot.lane.b32.xlu2 %v2826_v30, %s2532_s27  ;;  %v1090_v30 = vmul.f32 %v1088_v56, %v1069_v58  ;;  %v2916_v58 = vld [vmem:[%s3121_s8] ss:$0 sm:$0xff] }
0x1254   :  { %1101 = vrot.lane.b32.xlu1 %v2793_v61, %s2532_s27  ;;  %v1145_v61 = vld [vmem:[%s3120_s7 + $0x10] sm:$0xff] }
0x1255   :  { %1196 = vmatpush.msra.mxu3 %v1145_v61  ;;  %1308 = vmatpush.msra.mxu0 %v1145_v61 }
0x1256   :  { %1109 = vrot.lane.b32.xlu2 %v2739_v47, %s2532_s27  ;;  %v1143_v47 = vld [vmem:[%s3120_s7] sm:$0xff]  ;;  %1431 = vmatpush.msrb.mxu1 %v1145_v61 }
0x125c   :  { %1113 = vrot.lane.b32.xlu1 %v2712_v42, %s2532_s27  ;;  %v1144_v42 = vld [vmem:[%s3120_s7 + $0x8] sm:$0xff] }
0x125d   :  { %1197 = vmatpush.msra.mxu3 %v1144_v42  ;;  %1309 = vmatpush.msra.mxu0 %v1144_v42 }
0x125e   :  { %1432 = vmatpush.msrb.mxu1 %v1144_v42 }
0x125f   :  { %1198 = vmatpush.msra.mxu3 %v1143_v47  ;;  %1310 = vmatpush.msra.mxu0 %v1143_v47 }
0x1260   :  { %1199 = vmatmul.f32.vlgmr.msra.gmra.mxu3 %v2528_v13  ;;  %1433 = vmatpush.msrb.mxu1 %v1143_v47  ;;  %v1141_v13 = vld [vmem:[%s3118_s5 + $0x18] sm:$0xff] }
0x1261   :  { %1552 = vmatpush.msrb.mxu3 %v1146_v23  ;;  %1672 = vmatpush.msrb.mxu0 %v1146_v23 }
0x1262   :  { %1790 = vmatpush.msra.mxu1 %v1146_v23  ;;  %1169 = vmatpush.msra.mxu2 %v1141_v13 }
0x1263   :  { %1553 = vmatpush.msrb.mxu3 %v1145_v61  ;;  %1673 = vmatpush.msrb.mxu0 %v1145_v61 }
0x1264   :  { %1125 = vrot.lane.b32.xlu1 %v2661_v39, %s2532_s27  ;;  %1791 = vmatpush.msra.mxu1 %v1145_v61 }
0x1265   :  { %1554 = vmatpush.msrb.mxu3 %v1144_v42  ;;  %1674 = vmatpush.msrb.mxu0 %v1144_v42 }
0x1266   :  { %1792 = vmatpush.msra.mxu1 %v1144_v42 }
0x1267   :  { %1555 = vmatpush.msrb.mxu3 %v1143_v47  ;;  %1675 = vmatpush.msrb.mxu0 %v1143_v47 }
0x1268   :  { %1793 = vmatpush.msra.mxu1 %v1143_v47 }
0x1269   :  { %2035 = vmatpush.msra.mxu3 %v1146_v23 }
0x126b   :  { %2036 = vmatpush.msra.mxu3 %v1145_v61 }
0x126d   :  { %2037 = vmatpush.msra.mxu3 %v1144_v42 }
0x126f   :  { %2038 = vmatpush.msra.mxu3 %v1143_v47 }
0x12a0   :  { %v1042_v25 = vpop.permute.xlu2 %1041 }
0x12a1   :  { %v1044_v28 = vmul.f32 %v1042_v25, %v1039_v26 }
0x12a8   :  { %v1098_v33 = vpop.permute.xlu2 %1097 }
0x12a9   :  { %v1100_v37 = vsel %vm47_vm0, %v2694_v49, %v1098_v33 }
0x12b0   :  { %v1110_v41 = vpop.permute.xlu2 %1109 }
0x12b1   :  { %v1112_v51 = vsel %vm47_vm0, %v2775_v62, %v1110_v41 }
0x12b6   :  { %v1084_v22 = vpop.permute.xlu1 %1083 }
0x12b7   :  { %v1086_v12 = vmul.f32 %v1084_v22, %v1081_v60 }
0x12b9   :  { %v1091_v39 = vadd.f32 %v1090_v30, %v1086_v12 }
0x12bb   :  { %1093 = vrot.lane.b32.xlu0 %v1091_v39, %s2532_s27 }
0x12be   :  { %v1047_v27 = vpop.permute.xlu1 %1046 }
0x12bf   :  { %v1049_v29 = vmul.f32 %v1047_v27, %v1027_v9 }
0x12c1   :  { %v1050_v31 = vadd.f32 %v1049_v29, %v1044_v28 }
0x12c3   :  { %1105 = vrot.lane.b32.xlu0 %v2770_v55, %s2532_s27  ;;  %1122 = vrot.lane.b32.xlu2 %v1050_v31, %s2531_s26  ;;  %v1140_v55 = vld [vmem:[%s3118_s5 + $0x10] sm:$0xff] }
0x12c4   :  { %1170 = vmatpush.msra.mxu2 %v1140_v55 }
0x12c6   :  { %1171 = vmatpush.msra.mxu2 %v1139_v32  ;;  %v1102_v34 = vpop.permute.xlu1 %1101 }
0x12c7   :  { %v1104_v43 = vsel %vm47_vm0, %v2717_v52, %v1102_v34 }
0x12cb   :  { %1117 = vrot.lane.b32.xlu0 %v2689_v38, %s2532_s27  ;;  %v1138_v38 = vld [vmem:[%s3118_s5] sm:$0xff] }
0x12cc   :  { %1172 = vmatpush.msra.mxu2 %v1138_v38 }
0x12ce   :  { %1913 = vmatpush.msrb.mxu2 %v1146_v23  ;;  %v1114_v16 = vpop.permute.xlu1 %1113 }
0x12cf   :  { %v1116_v49 = vsel %vm47_vm0, %v2798_v10, %v1114_v16 }
0x12d0   :  { %1914 = vmatpush.msrb.mxu2 %v1145_v61  ;;  %v1135_v52 = vsel %vm1129_vm2, %v1112_v51, %v1116_v49 }
0x12d2   :  { %1915 = vmatpush.msrb.mxu2 %v1144_v42 }
0x12d4   :  { %1916 = vmatpush.msrb.mxu2 %v1143_v47 }
0x12d6   :  { %v1126_v57 = vpop.permute.xlu1 %1125 }
0x12e3   :  { %v1200_v62 = vpop.f32.mrf.mxu3 }
0x12e4   :  { %v1201_v0 = vadd.f32 %v2916_v58, %v1200_v62 }
0x12e6   :  { %v1242_v1 = vrot.slane %v1201_v0, 2  ;;  %1224 = vrot.lane.b32.xlu2 %v1201_v0, %s2529_s24 }
0x12e8   :  { %1264 = vrot.lane.b32.xlu0 %v1242_v1, %s2529_s24 }
0x131d   :  { %v1123_v50 = vpop.permute.xlu2 %1122 }
0x131e   :  { %v1128_v54 = vsel %vm47_vm0, %v1123_v50, %v1126_v57 }
0x132d   :  { %v1094_v35 = vpop.permute.xlu0 %1093 }
0x132e   :  { %v1096_v36 = vsel %vm47_vm0, %v2666_v46, %v1094_v35 }
0x132f   :  { %v1130_v40 = vsel %vm1129_vm2, %v1096_v36, %v1100_v37 }
0x1330   :  { %v1132_v48 = vsel %vm1131_vm3, %v1130_v40, %v1104_v43 }
0x1335   :  { %v1106_v44 = vpop.permute.xlu0 %1105 }
0x1336   :  { %v1108_v45 = vsel %vm47_vm0, %v2744_v59, %v1106_v44 }
0x1337   :  { %v1134_v46 = vsel %vm1133_vm4, %v1132_v48, %v1108_v45 }
0x1338   :  { %2254 = vmatmul.msk.f32.vlgmr.msra.gmra.mxu2 %vm142_vm1, %v1134_v46 }
0x133d   :  { %v1118_v53 = vpop.permute.xlu0 %1117 }
0x133e   :  { %v1120_v59 = vsel %vm47_vm0, %v2831_v24, %v1118_v53  ;;  %v2293_v24 = vld [vmem:[%s3119_s6] ss:$0 sm:$0xff] }
0x133f   :  { %v1136_v10 = vsel %vm1131_vm3, %v1135_v52, %v1120_v59 }
0x1340   :  { %v1137_v63 = vsel %vm1133_vm4, %v1136_v10, %v1128_v54  ;;  %v1225_v61 = vpop.permute.xlu2 %1224 }
0x1341   :  { %2255 = vmatmul.msk.f32.gmra.mxu2 %vm142_vm1, %v1137_v63 }
0x135a   :  { %v1265_v31 = vpop.permute.xlu0 %1264 }
0x13bb   :  { %v1174_v2 = vpop.f32.mrf.mxu2 }
0x13bc   :  { %v2928_v4 = vadd.f32 %v2293_v24, %v1174_v2 }
0x13be   :  { %v1203_v3 = vadd.f32 %v1201_v0, %v2928_v4 }
0x13c0   :  { %v2256_v5 = vmul.f32 -1.442695, %v1203_v3 }
0x13c2   :  { %2399 = vpow2.f32 %v2256_v5 }
0x13c4   :  { %v1177_v6 = vpop.f32.mrf.mxu2 }
0x13c5   :  { %v2931_v7 = vadd.f32 %v2293_v24, %v1177_v6 }
0x13c7   :  { %v1244_v8 = vadd.f32 %v1242_v1, %v2931_v7 }
0x13c8   :  { %v2400_v9 = vpop.eup %2399 }
0x13c9   :  { %v1207_v11 = vadd.f32 1.0, %v2400_v9  ;;  %v2257_v14 = vmul.f32 -1.442695, %v1244_v8 }
0x13cb   :  { %2401 = vrcp.f32 %v1207_v11  ;;  %v1219_v21 = vand.u32 2147483648, %v1207_v11  ;;  %v1217_v60 = vand.u32 2147483647, %v1207_v11  ;;  %vm1213_vm6 = vweird.f32 %v1207_v11 }
0x13cc   :  { %2403 = vpow2.f32 %v2257_v14 }
0x13cd   :  { %v1220_v23 = vor.u32 1.1754944e-38, %v1219_v21  ;;  %vm1218_vm8 = vcmp.eq.f32.partialorder %v1217_v60, 8.507059e+37 }
0x13d1   :  { %v2402_v15 = vpop.eup %2401 }
0x13d2   :  { %v2404_v17 = vpop.eup %2403  ;;  %v1209_v18 = vmul.f32 %v2402_v15, %v1207_v11  ;;  %vm1214_vm5 = vweird.f32 %v2402_v15 }
0x13d3   :  { %v1248_v19 = vadd.f32 1.0, %v2404_v17  ;;  %vm1215_vm7 = vmor %vm1213_vm6, %vm1214_vm5 }
0x13d4   :  { %v1210_v20 = vsub.f32 1.0, %v1209_v18 }
0x13d5   :  { %2405 = vrcp.f32 %v1248_v19  ;;  %v1260_v26 = vand.u32 2147483648, %v1248_v19  ;;  %v1258_v28 = vand.u32 2147483647, %v1248_v19  ;;  %vm1254_vm10 = vweird.f32 %v1248_v19 }
0x13d6   :  { %v1211_v56 = vmul.f32 %v2402_v15, %v1210_v20 }
0x13d7   :  { %v1261_v13 = vor.u32 1.1754944e-38, %v1260_v26  ;;  %vm1259_vm12 = vcmp.eq.f32.partialorder %v1258_v28, 8.507059e+37 }
0x13d8   :  { %v1212_v22 = vadd.f32 %v2402_v15, %v1211_v56 }
0x13da   :  { %v1216_v30 = vsel %vm1215_vm7, %v2402_v15, %v1212_v22 }
0x13db   :  { %v2406_v12 = vpop.eup %2405  ;;  %v1221_v42 = vsel %vm1218_vm8, %v1220_v23, %v1216_v30 }
0x13dc   :  { %v1227_v39 = vmul.f32 %v1225_v61, %v1221_v42  ;;  %v1250_v47 = vmul.f32 %v2406_v12, %v1248_v19  ;;  %vm1255_vm9 = vweird.f32 %v2406_v12  ;;  %v1234_v46 = vsub.f32 1.0, %v1221_v42 }
0x13dd   :  { %vm1256_vm11 = vmor %vm1254_vm10, %vm1255_vm9  ;;  %v1240_v50 = vmul.f32 0.0, %v1221_v42 }
0x13de   :  { %1229 = vrot.lane.b32.xlu0 %v1227_v39, %s2530_s2  ;;  %v1251_v25 = vsub.f32 1.0, %v1250_v47 }
0x13e0   :  { %v1252_v27 = vmul.f32 %v2406_v12, %v1251_v25 }
0x13e2   :  { %v1253_v29 = vadd.f32 %v2406_v12, %v1252_v27 }
0x13e4   :  { %v1257_v55 = vsel %vm1256_vm11, %v2406_v12, %v1253_v29 }
0x13e5   :  { %v1262_v32 = vsel %vm1259_vm12, %v1261_v13, %v1257_v55 }
0x13e6   :  { %v1267_v38 = vmul.f32 %v1265_v31, %v1262_v32  ;;  %v1274_v41 = vsub.f32 1.0, %v1262_v32  ;;  %v1280_v43 = vmul.f32 0.0, %v1262_v32 }
0x13e8   :  { %1269 = vrot.lane.b32.xlu1 %v1267_v38, %s2530_s2 }
0x1450   :  { %v1230_v33 = vpop.permute.xlu0 %1229 }
0x1451   :  { %v1232_v34 = vadd.f32 %v1230_v33, %v2928_v4 }
0x1453   :  { %2407 = vtanh.f32 %v1232_v34 }
0x1459   :  { %v2408_v35 = vpop.eup %2407 }
0x145a   :  { %v1270_v36 = vpop.permute.xlu1 %1269  ;;  %1236 = vrot.lane.b32.xlu1 %v2408_v35, %s2531_s26 }
0x145b   :  { %v1272_v37 = vadd.f32 %v1270_v36, %v2931_v7 }
0x145d   :  { %2409 = vtanh.f32 %v1272_v37 }
0x1463   :  { %v2410_v40 = vpop.eup %2409 }
0x1464   :  { %1276 = vrot.lane.b32.xlu2 %v2410_v40, %s2531_s26 }
0x14be   :  { %v1277_v16 = vpop.permute.xlu2 %1276 }
0x14bf   :  { %v1279_v44 = vmul.f32 %v1277_v16, %v1274_v41 }
0x14c1   :  { %v1281_v45 = vadd.f32 %v1280_v43, %v1279_v44 }
0x14c3   :  { %v1287_v48 = vrot.slane %v1281_v45, 6 }
0x14c5   :  { %1288 = vrot.lane.b32.xlu2 %v1287_v48, %s2532_s27 }
0x14cc   :  { %v1237_v49 = vpop.permute.xlu1 %1236 }
0x14cd   :  { %v1239_v51 = vmul.f32 %v1237_v49, %v1234_v46 }
0x14cf   :  { %v1241_v53 = vadd.f32 %v1240_v50, %v1239_v51 }
0x14d1   :  { %1283 = vrot.lane.b32.xlu0 %v1241_v53, %s2531_s26 }
0x151f   :  { %v1289_v52 = vpop.permute.xlu2 %1288 }
0x1543   :  { %v1284_v57 = vpop.permute.xlu0 %1283 }
0x1544   :  { %v1291_v59 = vsel %vm47_vm0, %v1284_v57, %v1289_v52 }
0x1545   :  { %2258 = vmatmul.msk.f32.vlgmr.msra.gmra.mxu0 %vm142_vm1, %v1291_v59  ;;  %v1398_v31 = vrot.slane %v1291_v59, 4  ;;  %v1354_v38 = vrot.slane %v1291_v59, 6 }
0x15c2   :  { %v1312_v54 = vpop.f32.mrf.mxu0 }
0x15c3   :  { %v1313_v10 = vadd.f32 %v2916_v58, %v1312_v54 }
0x15c5   :  { %v1316_v63 = vrot.slane %v1313_v10, 6  ;;  %v1360_v62 = vrot.slane %v1313_v10, 4 }
0x15c7   :  { %1382 = vrot.lane.b32.xlu1 %v1360_v62, %s2529_s24  ;;  %1338 = vrot.lane.b32.xlu0 %v1316_v63, %s2529_s24  ;;  %v1318_v0 = vadd.f32 %v1316_v63, %v2928_v4  ;;  %v1362_v1 = vadd.f32 %v1360_v62, %v2931_v7 }
0x15c9   :  { %v2259_v24 = vmul.f32 -1.442695, %v1318_v0  ;;  %v2260_v2 = vmul.f32 -1.442695, %v1362_v1 }
0x15cb   :  { %2411 = vpow2.f32 %v2259_v24 }
0x15cc   :  { %2413 = vpow2.f32 %v2260_v2 }
0x15d1   :  { %v2412_v3 = vpop.eup %2411 }
0x15d2   :  { %v2414_v5 = vpop.eup %2413  ;;  %v1322_v6 = vadd.f32 1.0, %v2412_v3 }
0x15d3   :  { %v1366_v8 = vadd.f32 1.0, %v2414_v5 }
0x15d4   :  { %2415 = vrcp.f32 %v1322_v6  ;;  %vm1328_vm15 = vweird.f32 %v1322_v6  ;;  %v1334_v22 = vand.u32 2147483648, %v1322_v6  ;;  %v1332_v61 = vand.u32 2147483647, %v1322_v6 }
0x15d5   :  { %2417 = vrcp.f32 %v1366_v8  ;;  %v1378_v60 = vand.u32 2147483648, %v1366_v8  ;;  %vm1372_vm2 = vweird.f32 %v1366_v8  ;;  %v1376_v23 = vand.u32 2147483647, %v1366_v8 }
0x15d6   :  { %v1335_v39 = vor.u32 1.1754944e-38, %v1334_v22  ;;  %vm1333_vm6 = vcmp.eq.f32.partialorder %v1332_v61, 8.507059e+37 }
0x15d7   :  { %v1379_v42 = vor.u32 1.1754944e-38, %v1378_v60  ;;  %vm1377_vm5 = vcmp.eq.f32.partialorder %v1376_v23, 8.507059e+37 }
0x15da   :  { %v2416_v9 = vpop.eup %2415 }
0x15db   :  { %v2418_v11 = vpop.eup %2417  ;;  %v1324_v15 = vmul.f32 %v2416_v9, %v1322_v6  ;;  %vm1329_vm13 = vweird.f32 %v2416_v9 }
0x15dc   :  { %v1368_v14 = vmul.f32 %v2418_v11, %v1366_v8  ;;  %vm1373_vm14 = vweird.f32 %v2418_v11  ;;  %vm1330_vm3 = vmor %vm1328_vm15, %vm1329_vm13 }
0x15dd   :  { %v1325_v18 = vsub.f32 1.0, %v1324_v15  ;;  %vm1374_vm4 = vmor %vm1372_vm2, %vm1373_vm14 }
0x15de   :  { %v1369_v17 = vsub.f32 1.0, %v1368_v14 }
0x15df   :  { %v1326_v20 = vmul.f32 %v2416_v9, %v1325_v18 }
0x15e0   :  { %v1370_v19 = vmul.f32 %v2418_v11, %v1369_v17 }
0x15e1   :  { %v1327_v56 = vadd.f32 %v2416_v9, %v1326_v20 }
0x15e2   :  { %v1371_v21 = vadd.f32 %v2418_v11, %v1370_v19 }
0x15e3   :  { %v1331_v12 = vsel %vm1330_vm3, %v2416_v9, %v1327_v56 }
0x15e4   :  { %v1375_v30 = vsel %vm1374_vm4, %v2418_v11, %v1371_v21  ;;  %v1336_v27 = vsel %vm1333_vm6, %v1335_v39, %v1331_v12 }
0x15e5   :  { %v1380_v25 = vsel %vm1377_vm5, %v1379_v42, %v1375_v30  ;;  %v1348_v48 = vsub.f32 1.0, %v1336_v27 }
0x15e6   :  { %v1392_v37 = vsub.f32 1.0, %v1380_v25 }
0x1639   :  { %v1383_v47 = vpop.permute.xlu1 %1382  ;;  %v1339_v26 = vpop.permute.xlu0 %1338 }
0x163a   :  { %v1385_v28 = vmul.f32 %v1383_v47, %v1380_v25  ;;  %v1341_v29 = vmul.f32 %v1339_v26, %v1336_v27 }
0x163c   :  { %1387 = vrot.lane.b32.xlu2 %v1385_v28, %s2530_s2  ;;  %1343 = vrot.lane.b32.xlu1 %v1341_v29, %s2530_s2 }
0x1644   :  { %1399 = vrot.lane.b32.xlu2 %v1398_v31, %s2533_s28 }
0x1696   :  { %v1388_v13 = vpop.permute.xlu2 %1387 }
0x1697   :  { %v1390_v55 = vadd.f32 %v1388_v13, %v2931_v7 }
0x1699   :  { %2419 = vtanh.f32 %v1390_v55 }
0x169e   :  { %v1400_v36 = vpop.permute.xlu2 %1399 }
0x169f   :  { %v2420_v32 = vpop.eup %2419  ;;  %v1402_v41 = vmul.f32 %v1400_v36, %v1380_v25 }
0x16a0   :  { %1394 = vrot.lane.b32.xlu0 %v2420_v32, %s2531_s26 }
0x16a8   :  { %1355 = vrot.lane.b32.xlu0 %v1354_v38, %s2534_s29 }
0x16ae   :  { %v1344_v33 = vpop.permute.xlu1 %1343 }
0x16af   :  { %v1346_v34 = vadd.f32 %v1344_v33, %v2928_v4 }
0x16b1   :  { %2421 = vtanh.f32 %v1346_v34 }
0x16b7   :  { %v2422_v35 = vpop.eup %2421 }
0x16b8   :  { %1350 = vrot.lane.b32.xlu1 %v2422_v35, %s2531_s26 }
0x1712   :  { %v1395_v40 = vpop.permute.xlu0 %1394 }
0x1713   :  { %v1397_v16 = vmul.f32 %v1395_v40, %v1392_v37 }
0x1715   :  { %v1403_v43 = vadd.f32 %v1402_v41, %v1397_v16 }
0x1717   :  { %v1409_v44 = vrot.slane %v1403_v43, 2 }
0x1719   :  { %1410 = vrot.lane.b32.xlu1 %v1409_v44, %s2532_s27 }
0x171a   :  { %v1356_v45 = vpop.permute.xlu0 %1355 }
0x171b   :  { %v1358_v49 = vmul.f32 %v1356_v45, %v1336_v27 }
0x172a   :  { %v1351_v46 = vpop.permute.xlu1 %1350 }
0x172b   :  { %v1353_v50 = vmul.f32 %v1351_v46, %v1348_v48 }
0x172d   :  { %v1359_v51 = vadd.f32 %v1358_v49, %v1353_v50 }
0x172f   :  { %1405 = vrot.lane.b32.xlu2 %v1359_v51, %s2531_s26 }
0x1789   :  { %v1406_v53 = vpop.permute.xlu2 %1405 }
0x178b   :  { %v1411_v52 = vpop.permute.xlu1 %1410 }
0x178c   :  { %v2960_v57 = vsel %vm47_vm0, %v1406_v53, %v1411_v52 }
0x178d   :  { %v1415_v59 = vrot.slane %v2960_v57, 2  ;;  %v1477_v34 = vrot.slane %v2960_v57, 6 }
0x178f   :  { %2261 = vmatmul.msk.f32.vlgmr.msrb.gmra.mxu1 %vm142_vm1, %v1415_v59 }
0x180c   :  { %v1435_v54 = vpop.f32.mrf.mxu1 }
0x180d   :  { %v1436_v10 = vadd.f32 %v2916_v58, %v1435_v54 }
0x180f   :  { %v1439_v63 = vrot.slane %v1436_v10, 4  ;;  %v1483_v62 = vrot.slane %v1436_v10, 6 }
0x1811   :  { %1505 = vrot.lane.b32.xlu0 %v1483_v62, %s2529_s24  ;;  %1461 = vrot.lane.b32.xlu2 %v1439_v63, %s2529_s24  ;;  %v1441_v0 = vadd.f32 %v1439_v63, %v2928_v4  ;;  %v1485_v3 = vadd.f32 %v1483_v62, %v2931_v7 }
0x1813   :  { %v2262_v1 = vmul.f32 -1.442695, %v1441_v0  ;;  %v2263_v6 = vmul.f32 -1.442695, %v1485_v3 }
0x1815   :  { %2423 = vpow2.f32 %v2262_v1 }
0x181b   :  { %v2424_v24 = vpop.eup %2423 }
0x181c   :  { %v1445_v2 = vadd.f32 1.0, %v2424_v24 }
0x181e   :  { %2425 = vrcp.f32 %v1445_v2  ;;  %v1457_v18 = vand.u32 2147483648, %v1445_v2  ;;  %vm1451_vm8 = vweird.f32 %v1445_v2  ;;  %v1455_v19 = vand.u32 2147483647, %v1445_v2 }
0x181f   :  { %2427 = vpow2.f32 %v2263_v6 }
0x1820   :  { %v1458_v21 = vor.u32 1.1754944e-38, %v1457_v18  ;;  %vm1456_vm10 = vcmp.eq.f32.partialorder %v1455_v19, 8.507059e+37 }
0x1824   :  { %v2426_v5 = vpop.eup %2425 }
0x1825   :  { %v1447_v8 = vmul.f32 %v2426_v5, %v1445_v2  ;;  %v2428_v11 = vpop.eup %2427  ;;  %vm1452_vm7 = vweird.f32 %v2426_v5 }
0x1826   :  { %v1489_v15 = vadd.f32 1.0, %v2428_v11  ;;  %vm1453_vm9 = vmor %vm1451_vm8, %vm1452_vm7 }
0x1827   :  { %v1448_v9 = vsub.f32 1.0, %v1447_v8 }
0x1828   :  { %2429 = vrcp.f32 %v1489_v15  ;;  %v1501_v39 = vand.u32 2147483648, %v1489_v15  ;;  %vm1495_vm12 = vweird.f32 %v1489_v15  ;;  %v1499_v47 = vand.u32 2147483647, %v1489_v15 }
0x1829   :  { %v1449_v14 = vmul.f32 %v2426_v5, %v1448_v9 }
0x182a   :  { %v1502_v26 = vor.u32 1.1754944e-38, %v1501_v39  ;;  %vm1500_vm14 = vcmp.eq.f32.partialorder %v1499_v47, 8.507059e+37 }
0x182b   :  { %v1450_v17 = vadd.f32 %v2426_v5, %v1449_v14 }
0x182d   :  { %v1454_v20 = vsel %vm1453_vm9, %v2426_v5, %v1450_v17 }
0x182e   :  { %v1459_v60 = vsel %vm1456_vm10, %v1458_v21, %v1454_v20  ;;  %v2430_v23 = vpop.eup %2429 }
0x182f   :  { %v1491_v61 = vmul.f32 %v2430_v23, %v1489_v15  ;;  %vm1496_vm11 = vweird.f32 %v2430_v23  ;;  %v1471_v45 = vsub.f32 1.0, %v1459_v60 }
0x1830   :  { %vm1497_vm13 = vmor %vm1495_vm12, %vm1496_vm11 }
0x1831   :  { %v1492_v30 = vsub.f32 1.0, %v1491_v61 }
0x1833   :  { %v1493_v12 = vmul.f32 %v2430_v23, %v1492_v30 }
0x1835   :  { %v1494_v42 = vadd.f32 %v2430_v23, %v1493_v12 }
0x1837   :  { %v1498_v25 = vsel %vm1497_vm13, %v2430_v23, %v1494_v42 }
0x1838   :  { %v1503_v28 = vsel %vm1500_vm14, %v1502_v26, %v1498_v25 }
0x1839   :  { %v1515_v36 = vsub.f32 1.0, %v1503_v28 }
0x186b   :  { %v1462_v56 = vpop.permute.xlu2 %1461 }
0x186c   :  { %v1464_v22 = vmul.f32 %v1462_v56, %v1459_v60 }
0x186e   :  { %1466 = vrot.lane.b32.xlu0 %v1464_v22, %s2530_s2 }
0x1883   :  { %v1506_v27 = vpop.permute.xlu0 %1505 }
0x1884   :  { %v1508_v29 = vmul.f32 %v1506_v27, %v1503_v28 }
0x1886   :  { %1510 = vrot.lane.b32.xlu1 %v1508_v29, %s2530_s2 }
0x188e   :  { %1521 = vrot.lane.b32.xlu1 %v2960_v57, %s2533_s28 }
0x18e0   :  { %v1467_v31 = vpop.permute.xlu0 %1466 }
0x18e1   :  { %v1469_v13 = vadd.f32 %v1467_v31, %v2928_v4 }
0x18e3   :  { %2431 = vtanh.f32 %v1469_v13 }
0x18e9   :  { %v2432_v55 = vpop.eup %2431 }
0x18ea   :  { %1473 = vrot.lane.b32.xlu0 %v2432_v55, %s2531_s26 }
0x18f8   :  { %v1511_v32 = vpop.permute.xlu1 %1510 }
0x18f9   :  { %v1513_v38 = vadd.f32 %v1511_v32, %v2931_v7 }
0x18fb   :  { %2433 = vtanh.f32 %v1513_v38 }
0x1900   :  { %v1522_v35 = vpop.permute.xlu1 %1521 }
0x1901   :  { %v2434_v33 = vpop.eup %2433  ;;  %v1524_v40 = vmul.f32 %v1522_v35, %v1503_v28 }
0x1902   :  { %1517 = vrot.lane.b32.xlu2 %v2434_v33, %s2531_s26 }
0x190a   :  { %1478 = vrot.lane.b32.xlu2 %v1477_v34, %s2534_s29 }
0x195c   :  { %v1518_v37 = vpop.permute.xlu2 %1517  ;;  %v1474_v44 = vpop.permute.xlu0 %1473 }
0x195d   :  { %v1520_v41 = vmul.f32 %v1518_v37, %v1515_v36  ;;  %v1476_v46 = vmul.f32 %v1474_v44, %v1471_v45 }
0x195f   :  { %v1525_v16 = vadd.f32 %v1524_v40, %v1520_v41 }
0x1961   :  { %v1531_v43 = vrot.slane %v1525_v16, 6 }
0x1963   :  { %1532 = vrot.lane.b32.xlu0 %v1531_v43, %s2532_s27 }
0x1964   :  { %v1479_v48 = vpop.permute.xlu2 %1478 }
0x1965   :  { %v1481_v49 = vmul.f32 %v1479_v48, %v1459_v60 }
0x1967   :  { %v1482_v50 = vadd.f32 %v1481_v49, %v1476_v46 }
0x1969   :  { %1527 = vrot.lane.b32.xlu1 %v1482_v50, %s2531_s26 }
0x19d5   :  { %v1533_v51 = vpop.permute.xlu0 %1532 }
0x19db   :  { %v1528_v53 = vpop.permute.xlu1 %1527 }
0x19dc   :  { %v2982_v52 = vsel %vm47_vm0, %v1528_v53, %v1533_v51 }
0x19dd   :  { %v1537_v57 = vrot.slane %v2982_v52, 4  ;;  %v1599_v38 = vrot.slane %v2982_v52, 6 }
0x19df   :  { %2264 = vmatmul.msk.f32.vlgmr.msrb.gmra.mxu3 %vm142_vm1, %v1537_v57 }
0x1a62   :  { %v1557_v59 = vpop.f32.mrf.mxu3 }
0x1a63   :  { %v1558_v54 = vadd.f32 %v2916_v58, %v1557_v59 }
0x1a65   :  { %1625 = vrot.lane.b32.xlu2 %v1558_v54, %s2529_s24  ;;  %v1561_v10 = vrot.slane %v1558_v54, 2  ;;  %v1605_v63 = vadd.f32 %v1558_v54, %v2931_v7 }
0x1a67   :  { %1583 = vrot.lane.b32.xlu1 %v1561_v10, %s2529_s24  ;;  %v2266_v62 = vmul.f32 -1.442695, %v1605_v63  ;;  %v1563_v24 = vadd.f32 %v1561_v10, %v2928_v4 }
0x1a69   :  { %2435 = vpow2.f32 %v2266_v62  ;;  %v2265_v3 = vmul.f32 -1.442695, %v1563_v24 }
0x1a6f   :  { %v2436_v0 = vpop.eup %2435 }
0x1a70   :  { %v1609_v1 = vadd.f32 1.0, %v2436_v0 }
0x1a72   :  { %2437 = vrcp.f32 %v1609_v1  ;;  %v1621_v15 = vand.u32 2147483648, %v1609_v1  ;;  %vm1615_vm2 = vweird.f32 %v1609_v1  ;;  %v1619_v17 = vand.u32 2147483647, %v1609_v1 }
0x1a73   :  { %2439 = vpow2.f32 %v2265_v3 }
0x1a74   :  { %v1622_v19 = vor.u32 1.1754944e-38, %v1621_v15  ;;  %vm1620_vm4 = vcmp.eq.f32.partialorder %v1619_v17, 8.507059e+37 }
0x1a78   :  { %v2438_v2 = vpop.eup %2437 }
0x1a79   :  { %v1611_v5 = vmul.f32 %v2438_v2, %v1609_v1  ;;  %v2440_v9 = vpop.eup %2439  ;;  %vm1616_vm15 = vweird.f32 %v2438_v2 }
0x1a7a   :  { %v1567_v14 = vadd.f32 1.0, %v2440_v9  ;;  %vm1617_vm3 = vmor %vm1615_vm2, %vm1616_vm15 }
0x1a7b   :  { %v1612_v6 = vsub.f32 1.0, %v1611_v5 }
0x1a7c   :  { %2441 = vrcp.f32 %v1567_v14  ;;  %v1579_v12 = vand.u32 2147483648, %v1567_v14  ;;  %vm1573_vm6 = vweird.f32 %v1567_v14  ;;  %v1577_v42 = vand.u32 2147483647, %v1567_v14 }
0x1a7d   :  { %v1613_v8 = vmul.f32 %v2438_v2, %v1612_v6 }
0x1a7e   :  { %v1580_v47 = vor.u32 1.1754944e-38, %v1579_v12  ;;  %vm1578_vm8 = vcmp.eq.f32.partialorder %v1577_v42, 8.507059e+37 }
0x1a7f   :  { %v1614_v11 = vadd.f32 %v2438_v2, %v1613_v8 }
0x1a81   :  { %v1618_v18 = vsel %vm1617_vm3, %v2438_v2, %v1614_v11 }
0x1a82   :  { %v1623_v21 = vsel %vm1620_vm4, %v1622_v19, %v1618_v18  ;;  %v2442_v60 = vpop.eup %2441 }
0x1a83   :  { %v1569_v22 = vmul.f32 %v2442_v60, %v1567_v14  ;;  %vm1574_vm5 = vweird.f32 %v2442_v60  ;;  %v1635_v34 = vsub.f32 1.0, %v1623_v21 }
0x1a84   :  { %vm1575_vm7 = vmor %vm1573_vm6, %vm1574_vm5 }
0x1a85   :  { %v1570_v23 = vsub.f32 1.0, %v1569_v22 }
0x1a87   :  { %v1571_v61 = vmul.f32 %v2442_v60, %v1570_v23 }
0x1a89   :  { %v1572_v30 = vadd.f32 %v2442_v60, %v1571_v61 }
0x1a8b   :  { %v1576_v39 = vsel %vm1575_vm7, %v2442_v60, %v1572_v30 }
0x1a8c   :  { %v1581_v26 = vsel %vm1578_vm8, %v1580_v47, %v1576_v39 }
0x1a8d   :  { %v1593_v43 = vsub.f32 1.0, %v1581_v26 }
0x1abf   :  { %v1626_v20 = vpop.permute.xlu2 %1625 }
0x1ac0   :  { %v1628_v56 = vmul.f32 %v1626_v20, %v1623_v21 }
0x1ac2   :  { %1630 = vrot.lane.b32.xlu0 %v1628_v56, %s2530_s2 }
0x1aca   :  { %1641 = vrot.lane.b32.xlu0 %v1537_v57, %s2533_s28 }
0x1ad9   :  { %v1584_v25 = vpop.permute.xlu1 %1583 }
0x1ada   :  { %v1586_v27 = vmul.f32 %v1584_v25, %v1581_v26 }
0x1adc   :  { %1588 = vrot.lane.b32.xlu2 %v1586_v27, %s2530_s2 }
0x1b34   :  { %v1631_v28 = vpop.permute.xlu0 %1630 }
0x1b35   :  { %v1633_v29 = vadd.f32 %v1631_v28, %v2931_v7 }
0x1b36   :  { %v1589_v31 = vpop.permute.xlu2 %1588 }
0x1b37   :  { %2443 = vtanh.f32 %v1633_v29  ;;  %v1591_v13 = vadd.f32 %v1589_v31, %v2928_v4 }
0x1b39   :  { %2445 = vtanh.f32 %v1591_v13 }
0x1b3c   :  { %v1642_v33 = vpop.permute.xlu0 %1641 }
0x1b3d   :  { %v2444_v55 = vpop.eup %2443  ;;  %v1644_v36 = vmul.f32 %v1642_v33, %v1623_v21 }
0x1b3e   :  { %1637 = vrot.lane.b32.xlu1 %v2444_v55, %s2531_s26 }
0x1b3f   :  { %v2446_v32 = vpop.eup %2445 }
0x1b40   :  { %1595 = vrot.lane.b32.xlu2 %v2446_v32, %s2531_s26 }
0x1b46   :  { %1600 = vrot.lane.b32.xlu1 %v1599_v38, %s2534_s29 }
0x1b9a   :  { %v1596_v16 = vpop.permute.xlu2 %1595 }
0x1b9b   :  { %v1598_v45 = vmul.f32 %v1596_v16, %v1593_v43 }
0x1bb0   :  { %v1638_v35 = vpop.permute.xlu1 %1637 }
0x1bb1   :  { %v1640_v37 = vmul.f32 %v1638_v35, %v1635_v34 }
0x1bb3   :  { %v1645_v40 = vadd.f32 %v1644_v36, %v1640_v37 }
0x1bb5   :  { %v1651_v41 = vrot.slane %v1645_v40, 2 }
0x1bb7   :  { %1652 = vrot.lane.b32.xlu2 %v1651_v41, %s2532_s27 }
0x1bb8   :  { %v1601_v44 = vpop.permute.xlu1 %1600 }
0x1bb9   :  { %v1603_v48 = vmul.f32 %v1601_v44, %v1581_v26 }
0x1bbb   :  { %v1604_v46 = vadd.f32 %v1603_v48, %v1598_v45 }
0x1bbd   :  { %1647 = vrot.lane.b32.xlu0 %v1604_v46, %s2531_s26 }
0x1c11   :  { %v1653_v49 = vpop.permute.xlu2 %1652 }
0x1c2f   :  { %v1648_v50 = vpop.permute.xlu0 %1647 }
0x1c30   :  { %v1655_v51 = vsel %vm47_vm0, %v1648_v50, %v1653_v49 }
0x1c31   :  { %v1657_v53 = vrot.slane %v1655_v51, 6 }
0x1c33   :  { %2267 = vmatmul.msk.f32.vlgmr.msrb.gmra.mxu0 %vm142_vm1, %v1657_v53 }
0x1cb0   :  { %v1677_v52 = vpop.f32.mrf.mxu0 }
0x1cb1   :  { %v1678_v57 = vadd.f32 %v2916_v58, %v1677_v52 }
0x1cb3   :  { %1701 = vrot.lane.b32.xlu0 %v1678_v57, %s2529_s24  ;;  %v1722_v59 = vrot.slane %v1678_v57, 2  ;;  %v1680_v54 = vadd.f32 %v1678_v57, %v2931_v7 }
0x1cb5   :  { %1744 = vrot.lane.b32.xlu1 %v1722_v59, %s2529_s24  ;;  %v1724_v10 = vadd.f32 %v1722_v59, %v2928_v4  ;;  %v2268_v63 = vmul.f32 -1.442695, %v1680_v54 }
0x1cb7   :  { %v2269_v62 = vmul.f32 -1.442695, %v1724_v10  ;;  %2447 = vpow2.f32 %v2268_v63 }
0x1cb9   :  { %2449 = vpow2.f32 %v2269_v62 }
0x1cbd   :  { %v2448_v0 = vpop.eup %2447 }
0x1cbe   :  { %v1684_v24 = vadd.f32 1.0, %v2448_v0 }
0x1cbf   :  { %v2450_v1 = vpop.eup %2449 }
0x1cc0   :  { %v1728_v2 = vadd.f32 1.0, %v2450_v1  ;;  %2451 = vrcp.f32 %v1684_v24  ;;  %v1696_v18 = vand.u32 2147483648, %v1684_v24  ;;  %vm1690_vm10 = vweird.f32 %v1684_v24 }
0x1cc1   :  { %v1694_v19 = vand.u32 2147483647, %v1684_v24 }
0x1cc2   :  { %2453 = vrcp.f32 %v1728_v2  ;;  %v1740_v21 = vand.u32 2147483648, %v1728_v2  ;;  %vm1734_vm13 = vweird.f32 %v1728_v2  ;;  %v1738_v60 = vand.u32 2147483647, %v1728_v2 }
0x1cc3   :  { %v1697_v22 = vor.u32 1.1754944e-38, %v1696_v18  ;;  %vm1695_vm15 = vcmp.eq.f32.partialorder %v1694_v19, 8.507059e+37 }
0x1cc4   :  { %v1741_v12 = vor.u32 1.1754944e-38, %v1740_v21  ;;  %vm1739_vm2 = vcmp.eq.f32.partialorder %v1738_v60, 8.507059e+37 }
0x1cc6   :  { %v2452_v3 = vpop.eup %2451 }
0x1cc7   :  { %v1686_v6 = vmul.f32 %v2452_v3, %v1684_v24  ;;  %vm1691_vm9 = vweird.f32 %v2452_v3 }
0x1cc8   :  { %v2454_v5 = vpop.eup %2453  ;;  %vm1692_vm12 = vmor %vm1690_vm10, %vm1691_vm9 }
0x1cc9   :  { %v1730_v8 = vmul.f32 %v2454_v5, %v1728_v2  ;;  %v1687_v9 = vsub.f32 1.0, %v1686_v6  ;;  %vm1735_vm11 = vweird.f32 %v2454_v5 }
0x1cca   :  { %vm1736_vm14 = vmor %vm1734_vm13, %vm1735_vm11 }
0x1ccb   :  { %v1731_v11 = vsub.f32 1.0, %v1730_v8  ;;  %v1688_v14 = vmul.f32 %v2452_v3, %v1687_v9 }
0x1ccd   :  { %v1732_v15 = vmul.f32 %v2454_v5, %v1731_v11  ;;  %v1689_v17 = vadd.f32 %v2452_v3, %v1688_v14 }
0x1ccf   :  { %v1733_v20 = vadd.f32 %v2454_v5, %v1732_v15  ;;  %v1693_v56 = vsel %vm1692_vm12, %v2452_v3, %v1689_v17 }
0x1cd0   :  { %v1698_v30 = vsel %vm1695_vm15, %v1697_v22, %v1693_v56 }
0x1cd1   :  { %v1737_v23 = vsel %vm1736_vm14, %v2454_v5, %v1733_v20  ;;  %v1711_v40 = vsub.f32 1.0, %v1698_v30 }
0x1cd2   :  { %v1742_v47 = vsel %vm1739_vm2, %v1741_v12, %v1737_v23 }
0x1cd3   :  { %v1754_v32 = vsub.f32 1.0, %v1742_v47 }
0x1d25   :  { %v1702_v61 = vpop.permute.xlu0 %1701 }
0x1d26   :  { %v1704_v42 = vmul.f32 %v1702_v61, %v1698_v30 }
0x1d27   :  { %v1745_v39 = vpop.permute.xlu1 %1744 }
0x1d28   :  { %v1747_v25 = vmul.f32 %v1745_v39, %v1742_v47  ;;  %1706 = vrot.lane.b32.xlu1 %v1704_v42, %s2530_s2 }
0x1d2a   :  { %1749 = vrot.lane.b32.xlu2 %v1747_v25, %s2530_s2 }
0x1d32   :  { %1760 = vrot.lane.b32.xlu2 %v1655_v51, %s2533_s28 }
0x1d84   :  { %v1750_v26 = vpop.permute.xlu2 %1749 }
0x1d85   :  { %v1752_v27 = vadd.f32 %v1750_v26, %v2928_v4 }
0x1d87   :  { %2455 = vtanh.f32 %v1752_v27 }
0x1d8c   :  { %v1761_v55 = vpop.permute.xlu2 %1760 }
0x1d8d   :  { %v2456_v28 = vpop.eup %2455  ;;  %v1763_v33 = vmul.f32 %v1761_v55, %v1742_v47 }
0x1d8e   :  { %1756 = vrot.lane.b32.xlu0 %v2456_v28, %s2531_s26 }
0x1d96   :  { %1717 = vrot.lane.b32.xlu0 %v1657_v53, %s2534_s29 }
0x1d9a   :  { %v1707_v29 = vpop.permute.xlu1 %1706 }
0x1d9b   :  { %v1709_v31 = vadd.f32 %v1707_v29, %v2931_v7 }
0x1d9d   :  { %2457 = vtanh.f32 %v1709_v31 }
0x1da3   :  { %v2458_v13 = vpop.eup %2457 }
0x1da4   :  { %1713 = vrot.lane.b32.xlu1 %v2458_v13, %s2531_s26 }
0x1e00   :  { %v1757_v38 = vpop.permute.xlu0 %1756 }
0x1e01   :  { %v1759_v34 = vmul.f32 %v1757_v38, %v1754_v32 }
0x1e03   :  { %v1764_v35 = vadd.f32 %v1763_v33, %v1759_v34 }
0x1e05   :  { %v1770_v36 = vrot.slane %v1764_v35, 6 }
0x1e07   :  { %1771 = vrot.lane.b32.xlu1 %v1770_v36, %s2532_s27 }
0x1e08   :  { %v1718_v37 = vpop.permute.xlu0 %1717 }
0x1e09   :  { %v1720_v16 = vmul.f32 %v1718_v37, %v1698_v30 }
0x1e16   :  { %v1714_v41 = vpop.permute.xlu1 %1713 }
0x1e17   :  { %v1716_v43 = vmul.f32 %v1714_v41, %v1711_v40 }
0x1e19   :  { %v1721_v44 = vadd.f32 %v1720_v16, %v1716_v43 }
0x1e1b   :  { %1766 = vrot.lane.b32.xlu2 %v1721_v44, %s2531_s26 }
0x1e75   :  { %v1767_v45 = vpop.permute.xlu2 %1766 }
0x1e79   :  { %v1772_v48 = vpop.permute.xlu1 %1771 }
0x1e7a   :  { %v3020_v46 = vsel %vm47_vm0, %v1767_v45, %v1772_v48 }
0x1e7b   :  { %2270 = vmatmul.msk.f32.vlgmr.msra.gmra.mxu1 %vm142_vm1, %v3020_v46  ;;  %v1881_v42 = vrot.slane %v3020_v46, 4  ;;  %v1837_v29 = vrot.slane %v3020_v46, 6 }
0x1ef8   :  { %v1795_v49 = vpop.f32.mrf.mxu1 }
0x1ef9   :  { %v1796_v50 = vadd.f32 %v2916_v58, %v1795_v49  ;;  %v3049_v49 = vld [vmem:[%s3121_s8] ss:$0 sm:$0xff] }
0x1efb   :  { %v1799_v51 = vrot.slane %v1796_v50, 6  ;;  %v1843_v53 = vrot.slane %v1796_v50, 4 }
0x1efd   :  { %1865 = vrot.lane.b32.xlu0 %v1843_v53, %s2529_s24  ;;  %1821 = vrot.lane.b32.xlu2 %v1799_v51, %s2529_s24  ;;  %v1801_v52 = vadd.f32 %v1799_v51, %v2931_v7  ;;  %v1845_v10 = vadd.f32 %v1843_v53, %v2928_v4 }
0x1eff   :  { %v2271_v57 = vmul.f32 -1.442695, %v1801_v52  ;;  %v2272_v62 = vmul.f32 -1.442695, %v1845_v10 }
0x1f01   :  { %2459 = vpow2.f32 %v2271_v57 }
0x1f07   :  { %v2460_v59 = vpop.eup %2459 }
0x1f08   :  { %v1805_v54 = vadd.f32 1.0, %v2460_v59 }
0x1f0a   :  { %2461 = vrcp.f32 %v1805_v54  ;;  %v1817_v5 = vand.u32 2147483648, %v1805_v54  ;;  %vm1811_vm4 = vweird.f32 %v1805_v54  ;;  %v1815_v6 = vand.u32 2147483647, %v1805_v54 }
0x1f0b   :  { %2463 = vpow2.f32 %v2272_v62 }
0x1f0c   :  { %v1818_v9 = vor.u32 1.1754944e-38, %v1817_v5  ;;  %vm1816_vm6 = vcmp.eq.f32.partialorder %v1815_v6, 8.507059e+37 }
0x1f10   :  { %v2462_v63 = vpop.eup %2461 }
0x1f11   :  { %v1807_v0 = vmul.f32 %v2462_v63, %v1805_v54  ;;  %v2464_v1 = vpop.eup %2463  ;;  %vm1812_vm3 = vweird.f32 %v2462_v63 }
0x1f12   :  { %v1849_v2 = vadd.f32 1.0, %v2464_v1  ;;  %vm1813_vm5 = vmor %vm1811_vm4, %vm1812_vm3 }
0x1f13   :  { %v1808_v58 = vsub.f32 1.0, %v1807_v0 }
0x1f14   :  { %2465 = vrcp.f32 %v1849_v2  ;;  %v1861_v56 = vand.u32 2147483648, %v1849_v2  ;;  %vm1855_vm8 = vweird.f32 %v1849_v2  ;;  %v1859_v60 = vand.u32 2147483647, %v1849_v2 }
0x1f15   :  { %v1809_v24 = vmul.f32 %v2462_v63, %v1808_v58 }
0x1f16   :  { %v1862_v23 = vor.u32 1.1754944e-38, %v1861_v56  ;;  %vm1860_vm10 = vcmp.eq.f32.partialorder %v1859_v60, 8.507059e+37 }
0x1f17   :  { %v1810_v3 = vadd.f32 %v2462_v63, %v1809_v24 }
0x1f19   :  { %v1814_v8 = vsel %vm1813_vm5, %v2462_v63, %v1810_v3 }
0x1f1a   :  { %v1819_v14 = vsel %vm1816_vm6, %v1818_v9, %v1814_v8  ;;  %v2466_v17 = vpop.eup %2465 }
0x1f1b   :  { %v1851_v18 = vmul.f32 %v2466_v17, %v1849_v2  ;;  %vm1856_vm7 = vweird.f32 %v2466_v17  ;;  %v1831_v36 = vsub.f32 1.0, %v1819_v14 }
0x1f1c   :  { %vm1857_vm9 = vmor %vm1855_vm8, %vm1856_vm7 }
0x1f1d   :  { %v1852_v19 = vsub.f32 1.0, %v1851_v18 }
0x1f1f   :  { %v1853_v20 = vmul.f32 %v2466_v17, %v1852_v19 }
0x1f21   :  { %v1854_v21 = vadd.f32 %v2466_v17, %v1853_v20 }
0x1f23   :  { %v1858_v22 = vsel %vm1857_vm9, %v2466_v17, %v1854_v21 }
0x1f24   :  { %v1863_v30 = vsel %vm1860_vm10, %v1862_v23, %v1858_v22 }
0x1f25   :  { %v1875_v13 = vsub.f32 1.0, %v1863_v30 }
0x1f57   :  { %v1822_v11 = vpop.permute.xlu2 %1821 }
0x1f58   :  { %v1824_v15 = vmul.f32 %v1822_v11, %v1819_v14 }
0x1f5a   :  { %1826 = vrot.lane.b32.xlu0 %v1824_v15, %s2530_s2 }
0x1f6f   :  { %v1866_v61 = vpop.permute.xlu0 %1865 }
0x1f70   :  { %v1868_v12 = vmul.f32 %v1866_v61, %v1863_v30 }
0x1f72   :  { %1870 = vrot.lane.b32.xlu1 %v1868_v12, %s2530_s2 }
0x1f7a   :  { %1882 = vrot.lane.b32.xlu1 %v1881_v42, %s2533_s28 }
0x1fcc   :  { %v1827_v39 = vpop.permute.xlu0 %1826 }
0x1fcd   :  { %v1829_v47 = vadd.f32 %v1827_v39, %v2931_v7 }
0x1fcf   :  { %2467 = vtanh.f32 %v1829_v47 }
0x1fd5   :  { %v2468_v25 = vpop.eup %2467 }
0x1fd6   :  { %1833 = vrot.lane.b32.xlu0 %v2468_v25, %s2531_s26 }
0x1fe4   :  { %v1871_v26 = vpop.permute.xlu1 %1870 }
0x1fe5   :  { %v1873_v27 = vadd.f32 %v1871_v26, %v2928_v4 }
0x1fe7   :  { %2469 = vtanh.f32 %v1873_v27 }
0x1fec   :  { %v1883_v31 = vpop.permute.xlu1 %1882 }
0x1fed   :  { %v2470_v28 = vpop.eup %2469  ;;  %v1885_v32 = vmul.f32 %v1883_v31, %v1863_v30 }
0x1fee   :  { %1877 = vrot.lane.b32.xlu2 %v2470_v28, %s2531_s26 }
0x1ff6   :  { %1838 = vrot.lane.b32.xlu2 %v1837_v29, %s2534_s29 }
0x2048   :  { %v1878_v55 = vpop.permute.xlu2 %1877  ;;  %v1834_v35 = vpop.permute.xlu0 %1833 }
0x2049   :  { %v1880_v38 = vmul.f32 %v1878_v55, %v1875_v13  ;;  %v1836_v40 = vmul.f32 %v1834_v35, %v1831_v36 }
0x204b   :  { %v1886_v33 = vadd.f32 %v1885_v32, %v1880_v38 }
0x204d   :  { %v1892_v34 = vrot.slane %v1886_v33, 2 }
0x204f   :  { %1893 = vrot.lane.b32.xlu0 %v1892_v34, %s2532_s27 }
0x2050   :  { %v1839_v37 = vpop.permute.xlu2 %1838 }
0x2051   :  { %v1841_v41 = vmul.f32 %v1839_v37, %v1819_v14 }
0x2053   :  { %v1842_v16 = vadd.f32 %v1841_v41, %v1836_v40 }
0x2055   :  { %1888 = vrot.lane.b32.xlu1 %v1842_v16, %s2531_s26 }
0x20c1   :  { %v1894_v43 = vpop.permute.xlu0 %1893 }
0x20c7   :  { %v1889_v44 = vpop.permute.xlu1 %1888 }
0x20c8   :  { %v3042_v45 = vsel %vm47_vm0, %v1889_v44, %v1894_v43 }
0x20c9   :  { %v1898_v48 = vrot.slane %v3042_v45, 2  ;;  %v1960_v28 = vrot.slane %v3042_v45, 6 }
0x20cb   :  { %2273 = vmatmul.msk.f32.vlgmr.msrb.gmra.mxu2 %vm142_vm1, %v1898_v48 }
0x214e   :  { %v1918_v46 = vpop.f32.mrf.mxu2 }
0x214f   :  { %v1919_v50 = vadd.f32 %v3049_v49, %v1918_v46 }
0x2151   :  { %v1922_v51 = vrot.slane %v1919_v50, 4  ;;  %v1966_v53 = vrot.slane %v1919_v50, 6 }
0x2153   :  { %1988 = vrot.lane.b32.xlu2 %v1966_v53, %s2529_s24  ;;  %1944 = vrot.lane.b32.xlu1 %v1922_v51, %s2529_s24  ;;  %v1968_v52 = vadd.f32 %v1966_v53, %v2928_v4  ;;  %v1924_v10 = vadd.f32 %v1922_v51, %v2931_v7 }
0x2155   :  { %v2275_v57 = vmul.f32 -1.442695, %v1968_v52  ;;  %v2274_v62 = vmul.f32 -1.442695, %v1924_v10 }
0x2157   :  { %2471 = vpow2.f32 %v2275_v57 }
0x215d   :  { %v2472_v59 = vpop.eup %2471 }
0x215e   :  { %v1972_v54 = vadd.f32 1.0, %v2472_v59 }
0x2160   :  { %2473 = vrcp.f32 %v1972_v54  ;;  %v1984_v5 = vand.u32 2147483648, %v1972_v54  ;;  %vm1978_vm12 = vweird.f32 %v1972_v54  ;;  %v1982_v6 = vand.u32 2147483647, %v1972_v54 }
0x2161   :  { %2475 = vpow2.f32 %v2274_v62 }
0x2162   :  { %v1985_v9 = vor.u32 1.1754944e-38, %v1984_v5  ;;  %vm1983_vm14 = vcmp.eq.f32.partialorder %v1982_v6, 8.507059e+37 }
0x2166   :  { %v2474_v63 = vpop.eup %2473 }
0x2167   :  { %v1974_v0 = vmul.f32 %v2474_v63, %v1972_v54  ;;  %v2476_v1 = vpop.eup %2475  ;;  %vm1979_vm11 = vweird.f32 %v2474_v63 }
0x2168   :  { %v1928_v2 = vadd.f32 1.0, %v2476_v1  ;;  %vm1980_vm13 = vmor %vm1978_vm12, %vm1979_vm11 }
0x2169   :  { %v1975_v58 = vsub.f32 1.0, %v1974_v0 }
0x216a   :  { %2477 = vrcp.f32 %v1928_v2  ;;  %v1940_v56 = vand.u32 2147483648, %v1928_v2  ;;  %vm1934_vm2 = vweird.f32 %v1928_v2  ;;  %v1938_v60 = vand.u32 2147483647, %v1928_v2 }
0x216b   :  { %v1976_v24 = vmul.f32 %v2474_v63, %v1975_v58 }
0x216c   :  { %v1941_v23 = vor.u32 1.1754944e-38, %v1940_v56  ;;  %vm1939_vm4 = vcmp.eq.f32.partialorder %v1938_v60, 8.507059e+37 }
0x216d   :  { %v1977_v3 = vadd.f32 %v2474_v63, %v1976_v24 }
0x216f   :  { %v1981_v8 = vsel %vm1980_vm13, %v2474_v63, %v1977_v3  ;;  %vm2139_vm13 = vcmask 261126  }
0x2170   :  { %v1986_v14 = vsel %vm1983_vm14, %v1985_v9, %v1981_v8  ;;  %v2478_v17 = vpop.eup %2477 }
0x2171   :  { %v1930_v18 = vmul.f32 %v2478_v17, %v1928_v2  ;;  %vm1935_vm15 = vweird.f32 %v2478_v17  ;;  %v1998_v31 = vsub.f32 1.0, %v1986_v14 }
0x2172   :  { %vm1936_vm3 = vmor %vm1934_vm2, %vm1935_vm15 }
0x2173   :  { %v1931_v19 = vsub.f32 1.0, %v1930_v18 }
0x2175   :  { %v1932_v20 = vmul.f32 %v2478_v17, %v1931_v19 }
0x2177   :  { %v1933_v21 = vadd.f32 %v2478_v17, %v1932_v20 }
0x2179   :  { %v1937_v22 = vsel %vm1936_vm3, %v2478_v17, %v1933_v21  ;;  %vm2211_vm3 = vcmask 58368  }
0x217a   :  { %v1942_v30 = vsel %vm1939_vm4, %v1941_v23, %v1937_v22 }
0x217b   :  { %v1954_v35 = vsub.f32 1.0, %v1942_v30 }
0x21ad   :  { %v1989_v11 = vpop.permute.xlu2 %1988 }
0x21ae   :  { %v1991_v15 = vmul.f32 %v1989_v11, %v1986_v14 }
0x21b0   :  { %1993 = vrot.lane.b32.xlu0 %v1991_v15, %s2530_s2 }
0x21b8   :  { %2004 = vrot.lane.b32.xlu0 %v3042_v45, %s2533_s28 }
0x21c5   :  { %v1945_v61 = vpop.permute.xlu1 %1944 }
0x21c6   :  { %v1947_v12 = vmul.f32 %v1945_v61, %v1942_v30 }
0x21c8   :  { %1949 = vrot.lane.b32.xlu2 %v1947_v12, %s2530_s2 }
0x2222   :  { %v1994_v42 = vpop.permute.xlu0 %1993  ;;  %v1950_v39 = vpop.permute.xlu2 %1949 }
0x2223   :  { %v1996_v47 = vadd.f32 %v1994_v42, %v2928_v4  ;;  %v1952_v25 = vadd.f32 %v1950_v39, %v2931_v7 }
0x2225   :  { %2479 = vtanh.f32 %v1996_v47 }
0x2226   :  { %2481 = vtanh.f32 %v1952_v25 }
0x222a   :  { %v2005_v29 = vpop.permute.xlu0 %2004 }
0x222b   :  { %v2480_v26 = vpop.eup %2479  ;;  %v2007_v55 = vmul.f32 %v2005_v29, %v1986_v14 }
0x222c   :  { %v2482_v27 = vpop.eup %2481  ;;  %2000 = vrot.lane.b32.xlu1 %v2480_v26, %s2531_s26 }
0x222d   :  { %1956 = vrot.lane.b32.xlu2 %v2482_v27, %s2531_s26 }
0x2234   :  { %1961 = vrot.lane.b32.xlu1 %v1960_v28, %s2534_s29 }
0x2287   :  { %v1957_v34 = vpop.permute.xlu2 %1956 }
0x2288   :  { %v1959_v37 = vmul.f32 %v1957_v34, %v1954_v35 }
0x229e   :  { %v2001_v13 = vpop.permute.xlu1 %2000 }
0x229f   :  { %v2003_v32 = vmul.f32 %v2001_v13, %v1998_v31 }
0x22a1   :  { %v2008_v38 = vadd.f32 %v2007_v55, %v2003_v32 }
0x22a3   :  { %v2014_v33 = vrot.slane %v2008_v38, 6 }
0x22a5   :  { %2015 = vrot.lane.b32.xlu2 %v2014_v33, %s2532_s27 }
0x22a6   :  { %v1962_v36 = vpop.permute.xlu1 %1961 }
0x22a7   :  { %v1964_v40 = vmul.f32 %v1962_v36, %v1942_v30 }
0x22a9   :  { %v1965_v41 = vadd.f32 %v1964_v40, %v1959_v37 }
0x22ab   :  { %2010 = vrot.lane.b32.xlu0 %v1965_v41, %s2531_s26  ;;  %v2535_v41 = vmov 32.0  }
0x22ff   :  { %v2016_v16 = vpop.permute.xlu2 %2015 }
0x231d   :  { %v2011_v43 = vpop.permute.xlu0 %2010 }
0x231e   :  { %v2018_v44 = vsel %vm47_vm0, %v2011_v43, %v2016_v16 }
0x231f   :  { %v2020_v45 = vrot.slane %v2018_v44, 4  ;;  %v2082_v42 = vrot.slane %v2018_v44, 6 }
0x2321   :  { %2276 = vmatmul.msk.f32.vlgmr.msra.gmra.mxu3 %vm142_vm1, %v2020_v45 }
0x23a4   :  { %v2040_v48 = vpop.f32.mrf.mxu3 }
0x23a5   :  { %v2041_v46 = vadd.f32 %v3049_v49, %v2040_v48 }
0x23a7   :  { %v2044_v50 = vrot.slane %v2041_v46, 2  ;;  %2108 = vrot.lane.b32.xlu1 %v2041_v46, %s2529_s24  ;;  %v2088_v51 = vadd.f32 %v2041_v46, %v2928_v4 }
0x23a9   :  { %2066 = vrot.lane.b32.xlu0 %v2044_v50, %s2529_s24  ;;  %v2046_v53 = vadd.f32 %v2044_v50, %v2931_v7  ;;  %v2278_v52 = vmul.f32 -1.442695, %v2088_v51 }
0x23ab   :  { %v2277_v57 = vmul.f32 -1.442695, %v2046_v53  ;;  %2483 = vpow2.f32 %v2278_v52 }
0x23ad   :  { %2485 = vpow2.f32 %v2277_v57 }
0x23b1   :  { %v2484_v59 = vpop.eup %2483 }
0x23b2   :  { %v2092_v10 = vadd.f32 1.0, %v2484_v59  ;;  %v2182_v59 = vld [vmem:[%s3124_s11 + $0x18] sm:$0xff] }
0x23b3   :  { %v2486_v54 = vpop.eup %2485  ;;  %2203 = vmatpush.msra.mxu0 %v2182_v59 }
0x23b4   :  { %v2050_v63 = vadd.f32 1.0, %v2486_v54  ;;  %2487 = vrcp.f32 %v2092_v10  ;;  %v2104_v6 = vand.u32 2147483648, %v2092_v10  ;;  %vm2098_vm6 = vweird.f32 %v2092_v10  ;;  %v2181_v54 = vld [vmem:[%s3124_s11 + $0x10] sm:$0xff] }
0x23b5   :  { %v2102_v8 = vand.u32 2147483647, %v2092_v10  ;;  %2204 = vmatpush.msra.mxu0 %v2181_v54 }
0x23b6   :  { %2489 = vrcp.f32 %v2050_v63  ;;  %v2062_v11 = vand.u32 2147483648, %v2050_v63  ;;  %vm2056_vm9 = vweird.f32 %v2050_v63  ;;  %v2060_v15 = vand.u32 2147483647, %v2050_v63 }
0x23b7   :  { %v2105_v17 = vor.u32 1.1754944e-38, %v2104_v6  ;;  %vm2103_vm11 = vcmp.eq.f32.partialorder %v2102_v8, 8.507059e+37  ;;  %v2294_v6 = vld [vmem:[%s3122_s9] ss:$0 sm:$0xff] }
0x23b8   :  { %v2063_v21 = vor.u32 1.1754944e-38, %v2062_v11  ;;  %vm2061_vm12 = vcmp.eq.f32.partialorder %v2060_v15, 8.507059e+37  ;;  %v2295_v11 = vld [vmem:[%s3123_s10] ss:$0 sm:$0xff] }
0x23ba   :  { %v2488_v49 = vpop.eup %2487 }
0x23bb   :  { %v2094_v0 = vmul.f32 %v2488_v49, %v2092_v10  ;;  %vm2099_vm5 = vweird.f32 %v2488_v49  ;;  %v2180_v10 = vld [vmem:[%s3124_s11 + $0x8] sm:$0xff] }
0x23bc   :  { %v2490_v62 = vpop.eup %2489  ;;  %vm2100_vm8 = vmor %vm2098_vm6, %vm2099_vm5  ;;  %2205 = vmatpush.msra.mxu0 %v2180_v10 }
0x23bd   :  { %v2052_v58 = vmul.f32 %v2490_v62, %v2050_v63  ;;  %v2095_v1 = vsub.f32 1.0, %v2094_v0  ;;  %vm2057_vm7 = vweird.f32 %v2490_v62  ;;  %v2179_v63 = vld [vmem:[%s3124_s11] sm:$0xff] }
0x23be   :  { %vm2058_vm10 = vmor %vm2056_vm9, %vm2057_vm7  ;;  %2206 = vmatpush.msra.mxu0 %v2179_v63 }
0x23bf   :  { %v2053_v24 = vsub.f32 1.0, %v2052_v58  ;;  %v2096_v2 = vmul.f32 %v2488_v49, %v2095_v1 }
0x23c1   :  { %v2054_v3 = vmul.f32 %v2490_v62, %v2053_v24  ;;  %v2097_v5 = vadd.f32 %v2488_v49, %v2096_v2 }
0x23c3   :  { %v2055_v9 = vadd.f32 %v2490_v62, %v2054_v3  ;;  %v2101_v14 = vsel %vm2100_vm8, %v2488_v49, %v2097_v5 }
0x23c4   :  { %v2106_v20 = vsel %vm2103_vm11, %v2105_v17, %v2101_v14 }
0x23c5   :  { %v2059_v18 = vsel %vm2058_vm10, %v2490_v62, %v2055_v9  ;;  %v2118_v27 = vsub.f32 1.0, %v2106_v20 }
0x23c6   :  { %v2064_v22 = vsel %vm2061_vm12, %v2063_v21, %v2059_v18  ;;  %v2296_v18 = vld [vmem:[%s3125_s12] ss:$0 sm:$0xff] }
0x23c7   :  { %v2076_v32 = vsub.f32 1.0, %v2064_v22 }
0x2419   :  { %v2109_v19 = vpop.permute.xlu1 %2108 }
0x241a   :  { %v2111_v56 = vmul.f32 %v2109_v19, %v2106_v20 }
0x241b   :  { %v2067_v60 = vpop.permute.xlu0 %2066 }
0x241c   :  { %v2069_v23 = vmul.f32 %v2067_v60, %v2064_v22  ;;  %2113 = vrot.lane.b32.xlu2 %v2111_v56, %s2530_s2 }
0x241e   :  { %2071 = vrot.lane.b32.xlu1 %v2069_v23, %s2530_s2 }
0x2424   :  { %2124 = vrot.lane.b32.xlu2 %v2020_v45, %s2533_s28 }
0x2476   :  { %v2114_v61 = vpop.permute.xlu2 %2113 }
0x2477   :  { %v2116_v30 = vadd.f32 %v2114_v61, %v2928_v4 }
0x2479   :  { %2491 = vtanh.f32 %v2116_v30 }
0x247e   :  { %v2125_v26 = vpop.permute.xlu2 %2124 }
0x247f   :  { %v2492_v12 = vpop.eup %2491  ;;  %v2127_v29 = vmul.f32 %v2125_v26, %v2106_v20 }
0x2480   :  { %2120 = vrot.lane.b32.xlu0 %v2492_v12, %s2531_s26 }
0x2488   :  { %2083 = vrot.lane.b32.xlu0 %v2082_v42, %s2534_s29 }
0x2490   :  { %v2072_v39 = vpop.permute.xlu1 %2071 }
0x2491   :  { %v2074_v47 = vadd.f32 %v2072_v39, %v2931_v7 }
0x2493   :  { %2493 = vtanh.f32 %v2074_v47 }
0x2494   :  { %2495 = vrcp.f32 %v2535_v41 }
0x2499   :  { %v2494_v25 = vpop.eup %2493 }
0x249a   :  { %2078 = vrot.lane.b32.xlu1 %v2494_v25, %s2531_s26  ;;  %v2496_v16 = vpop.eup %2495 }
0x249b   :  { %v2144_v43 = vmul.f32 32.0, %v2496_v16  ;;  %vm2148_vm14 = vweird.f32 %v2496_v16 }
0x249d   :  { %v2145_v44 = vsub.f32 1.0, %v2144_v43 }
0x249f   :  { %v2146_v45 = vmul.f32 %v2496_v16, %v2145_v44 }
0x24a1   :  { %v2147_v48 = vadd.f32 %v2496_v16, %v2146_v45 }
0x24a3   :  { %v2149_v46 = vsel %vm2148_vm14, %v2496_v16, %v2147_v48 }
0x24f2   :  { %v2121_v28 = vpop.permute.xlu0 %2120 }
0x24f3   :  { %v2123_v31 = vmul.f32 %v2121_v28, %v2118_v27 }
0x24f5   :  { %v2128_v4 = vadd.f32 %v2127_v29, %v2123_v31 }
0x24f7   :  { %v2134_v13 = vrot.slane %v2128_v4, 2 }
0x24f9   :  { %2135 = vrot.lane.b32.xlu1 %v2134_v13, %s2532_s27 }
0x24fa   :  { %v2084_v55 = vpop.permute.xlu0 %2083 }
0x24fb   :  { %v2086_v33 = vmul.f32 %v2084_v55, %v2064_v22 }
0x250c   :  { %v2079_v38 = vpop.permute.xlu1 %2078 }
0x250d   :  { %v2081_v34 = vmul.f32 %v2079_v38, %v2076_v32 }
0x250f   :  { %v2087_v35 = vadd.f32 %v2086_v33, %v2081_v34 }
0x2511   :  { %2130 = vrot.lane.b32.xlu2 %v2087_v35, %s2531_s26 }
0x256b   :  { %v2131_v7 = vpop.permute.xlu2 %2130  ;;  %v2136_v36 = vpop.permute.xlu1 %2135 }
0x256c   :  { %v2138_v37 = vsel %vm47_vm0, %v2131_v7, %v2136_v36 }
0x256d   :  { %v2140_v40 = vsel %vm2139_vm13, %v2138_v37, 0.0 }
0x256e   :  { %2141 = vadd.xlane.f32.xlu0 %v2140_v40 }
0x25e1   :  { %v2142_v50 = vpop.xlane.xlu0 %2141 }
0x25e2   :  { %v2150_v51 = vmul.f32 %v2149_v46, %v2142_v50 }
0x25e4   :  { %v2151_v53 = vsub.f32 %v2138_v37, %v2150_v51 }
0x25e6   :  { %v2152_v52 = vmul.f32 %v2151_v53, %v2151_v53 }
0x25e8   :  { %v2153_v57 = vsel %vm2139_vm13, %v2152_v52, 0.0 }
0x25e9   :  { %2154 = vadd.xlane.f32.xlu2 %v2153_v57 }
0x265c   :  { %v2155_v49 = vpop.xlane.xlu2 %2154 }
0x265d   :  { %v2156_v62 = vmul.f32 %v2155_v49, %v2149_v46 }
0x265f   :  { %v2157_v0 = vadd.f32 1e-05, %v2156_v62 }
0x2661   :  { %2497 = vrsqrt.f32 %v2157_v0  ;;  %vm2164_vm15 = vweird.f32 %v2157_v0 }
0x2667   :  { %v2498_v58 = vpop.eup %2497 }
0x2668   :  { %v2159_v1 = vmul.f32 %v2498_v58, %v2157_v0  ;;  %vm2165_vm0 = vweird.f32 %v2498_v58 }
0x2669   :  { %vm2166_vm2 = vmor %vm2164_vm15, %vm2165_vm0 }
0x266a   :  { %v2160_v24 = vmul.f32 %v2498_v58, %v2159_v1 }
0x266c   :  { %v2161_v2 = vmul.f32 0.5, %v2160_v24 }
0x266e   :  { %v2162_v3 = vsub.f32 1.5, %v2161_v2 }
0x2670   :  { %v2163_v5 = vmul.f32 %v2498_v58, %v2162_v3 }
0x2672   :  { %v2167_v8 = vsel %vm2166_vm2, %v2498_v58, %v2163_v5 }
0x2673   :  { %v2168_v9 = vmul.f32 %v2167_v8, %v2151_v53 }
0x2675   :  { %v2173_v14 = vmul.f32 %v2294_v6, %v2168_v9 }
0x2677   :  { %v2178_v15 = vadd.f32 %v2295_v11, %v2173_v14 }
0x2679   :  { %v2188_v17 = vrot.slane %v2178_v15, 6 }
0x267b   :  { %2279 = vmatmul.msk.f32.vlgmr.msra.gmra.mxu0 %vm142_vm1, %v2188_v17 }
0x26f8   :  { %v2208_v19 = vpop.f32.mrf.mxu0 }
0x26f9   :  { %v2209_v20 = vadd.f32 %v2296_v18, %v2208_v19 }
0x26fb   :  { %2212 = vst.msk [vmem:[#allocation2] sm:$0x3] %vm2211_vm3, %v2209_v20 }
0x26fc   :  { %2223 = dma.vmem_to_hbm [thread:$0]  %s2219_s21, 32, %s2221_s23, [#allocation3]  }
0x26fd   :  { %2525 = dma.done.wait [#allocation3], 32  }
0x26fe   :  { %2526 = vsyncadd [#allocation3], 4294967264 }
0x26ff   :  { %2228 = vsyncpa [#allocation3], 1 }

</bundles_post_ra>
